<compile_context>
chip_gen: v6e
topology: v6e:2x2x1
jax: 0.10.0
libtpu: 0.0.40
codegen_flags: <defaults>
</compile_context>

<pallas_src>
import functools

import jax
import jax.numpy as jnp
from jax.experimental import pallas as pl
from jax.experimental.pallas import tpu as pltpu


# --------------------------- roll-direction probe ----------------------------


@functools.lru_cache(maxsize=None)
def _roll_mode():
    """Detect pltpu.roll's rotate convention once ("neg" == jnp.roll)."""
    def probe(x_ref, o_ref):
        o_ref[...] = pltpu.roll(x_ref[...], 1, axis=0)

    try:
        x = jnp.arange(8 * 128, dtype=jnp.float32).reshape(8, 128)
        y = pl.pallas_call(
            probe, out_shape=jax.ShapeDtypeStruct((8, 128), jnp.float32))(x)
        y = jax.block_until_ready(y)
        if bool(jnp.array_equal(y, jnp.roll(x, 1, axis=0))):
            return "neg"     # pltpu.roll(x, s)[i] == x[(i - s) % n]
        if bool(jnp.array_equal(y, jnp.roll(x, -1, axis=0))):
            return "pos"     # pltpu.roll(x, s)[i] == x[(i + s) % n]
    except Exception:
        pass
    return "lax"             # fall back to jnp.roll (slices + concat)


def _shift_rows(v, off, rows, mode):
    """result[r] = v[r + off]; wrapped rows are zero-masked by the caller."""
    if off == 0:
        return v
    if mode == "neg":
        return pltpu.roll(v, (-off) % rows, axis=0)
    if mode == "pos":
        return pltpu.roll(v, off % rows, axis=0)
    return jnp.roll(v, -off, axis=0)


# ------------------------------ Pallas kernel -------------------------------


def _bottleneck_kernel(x_ref, mask_ref, s1_ref, b1_ref, w1_ref,
                       s2_ref, b2_ref, w2_ref, s3_ref, b3_ref,
                       w3_ref, cb3_ref, *rest,
                       Wo, fuse_taps, has_shortcut, roll_mode):
    if has_shortcut:
        wsc_ref, o_ref = rest
    else:
        (o_ref,) = rest

    f32 = jnp.float32
    cdt = w1_ref.dtype                       # matmul operand dtype (f32/bf16)
    relu = lambda v: jnp.maximum(v, 0.0)

    x = x_ref[...]                           # (R, Cin) float32
    R, Cin = x.shape
    Cpad = o_ref.shape[-1]

    # ---- bn1 + relu + conv1 (1x1, no bias) ---------------------------------
    p1 = relu(x * s1_ref[...] + b1_ref[...])
    h1 = jnp.dot(p1.astype(cdt), w1_ref[...], preferred_element_type=f32)

    # ---- bn2 + relu ---------------------------------------------------------
    p2 = relu(h1 * s2_ref[...] + b2_ref[...])          # (R, Cm) float32
    Cm = p2.shape[-1]

    # ---- conv2 (3x3, stride 1, pad 1) ---------------------------------------
    # A (dh, dw) tap is a row shift of dh*Wo + dw on the flattened layout,
    # realized with an XLU roll.  mask_ref column (dh+1)*3+(dw+1) zeroes
    # border / cross-image rows (== zero padding).  Rolls stay in f32 (32-bit
    # sublane rotate is portable); mask + cast to cdt are fused per tap.
    acc = jnp.zeros((R, Cm), f32)
    for ih, dh in enumerate((-1, 0, 1)):
        taps = []
        for iw, dw in enumerate((-1, 0, 1)):
            off = dh * Wo + dw
            rolled = _shift_rows(p2, off, R, roll_mode)
            k = ih * 3 + iw
            ok = mask_ref[:, k:k + 1] > 0.0             # (R, 1)
            taps.append(jnp.where(ok, rolled, 0.0).astype(cdt))
        if fuse_taps:
            # fuse the 3 dw taps: one K = 3*Cm dot keeps the 256-deep MXU fed
            slab = jnp.concatenate(taps, axis=-1)       # (R, 3*Cm)
            acc = acc + jnp.dot(slab, w2_ref[ih], preferred_element_type=f32)
        else:
            for iw in range(3):
                acc = acc + jnp.dot(taps[iw], w2_ref[ih * 3 + iw],
                                    preferred_element_type=f32)

    # ---- bn3 + relu + conv3 (1x1, with bias) --------------------------------
    p3 = relu(acc * s3_ref[...] + b3_ref[...])
    y = jnp.dot(p3.astype(cdt), w3_ref[...], preferred_element_type=f32)
    y = y + cb3_ref[...]

    # ---- shortcut ------------------------------------------------------------
    if has_shortcut:                           # 1x1 projection conv
        y = y + jnp.dot(x.astype(cdt), wsc_ref[...], preferred_element_type=f32)
    elif Cpad == Cin:                          # identity: plain add, no matmul
        y = y + x
    else:                                      # identity, lane-padded output
        y = y + jnp.concatenate([x, jnp.zeros((R, Cpad - Cin), f32)], axis=-1)

    o_ref[...] = y.astype(o_ref.dtype)


# -------------------------------- wrapper ------------------------------------


def _vmem_capacity_bytes():
    try:
        info = pltpu.get_tpu_info()
        for name in ("vmem_capacity_bytes", "vmem_size_bytes", "vmem_bytes"):
            v = getattr(info, name, None)
            if v:
                return int(v)
    except Exception:
        pass
    return 64 * 1024 * 1024        # v7x per-TensorCore VMEM (smallest current)


def _pick_images_per_block(B, N, row_bytes, budget_bytes, target_rows):
    rows_cap = max(N, min(target_rows, budget_bytes // max(row_bytes, 1)))
    cap = max(1, int(rows_cap) // max(N, 1))
    if B >= 2:
        cap = min(cap, max(1, B // 2))          # keep >= 2 grid steps
    cap = min(cap, B)
    divisors = [d for d in range(cap, 0, -1) if B % d == 0]
    aligned = [d for d in divisors if (d * N) % 8 == 0]
    if aligned:
        divisors = aligned
    for d in divisors:                          # prefer even step count (v7x)
        if (B // d) % 2 == 0:
            return d
    return divisors[0] if divisors else 1


def _make_tap_mask(tb, Ho, Wo):
    """(tb*Ho*Wo, 9) f32: column (dh+1)*3+(dw+1) is 1.0 where the tap stays
    inside the same image, 0.0 on borders (== zero padding)."""
    h = jnp.arange(Ho)[:, None]
    w = jnp.arange(Wo)[None, :]
    cols = []
    for dh in (-1, 0, 1):
        for dw in (-1, 0, 1):
            ok = ((h + dh >= 0) & (h + dh < Ho) &
                  (w + dw >= 0) & (w + dw < Wo))
            cols.append(ok.reshape(-1))
    m = jnp.stack(cols, axis=-1).astype(jnp.float32)
    return jnp.tile(m, (tb, 1))


def bottleneck_forward(x, params, *, stride=1, images_per_block=None,
                       matmul_dtype=jnp.float32, out_dtype=jnp.float32,
                       fuse_taps=None, vmem_limit_bytes=None):
    """x: (B, H, W, Cin) float32 NHWC.  params: see make_bottleneck_params."""
    B, H, W, Cin = x.shape
    # The module puts the stride on conv1 and the shortcut (both 1x1), and
    # bn1/relu are pointwise, so subsampling x first is exactly equivalent.
    # For stride>1 prefer folding this subsample into the producer of x.
    xs = x[:, ::stride, ::stride, :] if stride != 1 else x
    Ho, Wo = xs.shape[1], xs.shape[2]
    N = Ho * Wo

    Cm = params["w1"].shape[-1]
    Cout = params["w3"].shape[-1]
    Cpad = ((Cout + 127) // 128) * 128            # lane-dense output stores
    has_shortcut = "wsc" in params
    if not has_shortcut:
        assert Cin == Cout and stride == 1, \
            "identity shortcut requires inplanes == outplanes and stride == 1"

    if fuse_taps is None:
        fuse_taps = Cm < 256                      # K=3*Cm feeds the 256 MXU

    cdt = jnp.dtype(matmul_dtype)

    def padcols(a):
        return a if Cpad == Cout else jnp.pad(a, ((0, 0), (0, Cpad - Cout)))

    w3p, cb3p = padcols(params["w3"]), padcols(params["cb3"])
    if fuse_taps:
        w2f = params["w2"].reshape(3, 3 * Cm, Cm)     # (kh, kw*cin, cout)
    else:
        w2f = params["w2"].reshape(9, Cm, Cm)         # (kh*3+kw, cin, cout)

    # ---- VMEM-aware block sizing + explicit scoped-VMEM limit ---------------
    vcap = _vmem_capacity_bytes()
    vlim = vmem_limit_bytes or min(int(0.75 * vcap), 100 << 20)
    csize = cdt.itemsize
    weight_bytes = csize * (Cin * Cm + 9 * Cm * Cm + Cm * Cpad
                            + (Cin * Cpad if has_shortcut else 0))
    weight_bytes += 4 * (2 * Cin + 4 * Cm + 2 * Cpad + 128)
    row_bytes = (4 * (2 * Cin + 3 * Cm + (2 if has_shortcut else 1) * Cpad)
                 + csize * 3 * Cm                 # tap slab
                 + 4 * (2 * Cin + 2 * Cpad)       # double-buffered in/out DMA
                 + 4 * 128)                       # padded mask lanes
    budget = max(int(0.85 * vlim) - 2 * weight_bytes, N * row_bytes)
    target_rows = 512 if vcap >= (96 << 20) else 256

    if images_per_block is None:
        images_per_block = _pick_images_per_block(B, N, row_bytes, budget,
                                                  target_rows)
    tb = images_per_block
    assert B % tb == 0, "batch must be divisible by images_per_block"
    R = tb * N
    assert R % 8 == 0, "images_per_block * Ho * Wo must be a multiple of 8"

    x2 = xs.reshape(B * N, Cin)
    tap_mask = _make_tap_mask(tb, Ho, Wo)             # (R, 9) f32

    kernel = functools.partial(_bottleneck_kernel, Wo=Wo, fuse_taps=fuse_taps,
                               has_shortcut=has_shortcut,
                               roll_mode=_roll_mode())

    args = [x2, tap_mask,
            params["s1"], params["b1"], params["w1"].astype(cdt),
            params["s2"], params["b2"], w2f.astype(cdt),
            params["s3"], params["b3"], w3p.astype(cdt), cb3p]
    if has_shortcut:
        args.append(padcols(params["wsc"]).astype(cdt))

    def _run(single_buffer_weights):
        def const_spec(shape):
            kwargs = ({"pipeline_mode": pl.Buffered(buffer_count=1)}
                      if single_buffer_weights else {})
            return pl.BlockSpec(shape, lambda i, _s=shape: (0,) * len(_s),
                                **kwargs)

        in_specs = [pl.BlockSpec((R, Cin), lambda i: (i, 0)),   # x row block
                    const_spec((R, 9)),                         # tap masks
                    const_spec((1, Cin)), const_spec((1, Cin)), # bn1
                    const_spec((Cin, Cm)),                      # conv1 w
                    const_spec((1, Cm)), const_spec((1, Cm)),   # bn2
                    const_spec(w2f.shape),                      # conv2 taps
                    const_spec((1, Cm)), const_spec((1, Cm)),   # bn3
                    const_spec((Cm, Cpad)), const_spec((1, Cpad))]  # conv3 w/b
        if has_shortcut:
            in_specs.append(const_spec((Cin, Cpad)))            # shortcut w

        return pl.pallas_call(
            kernel,
            out_shape=jax.ShapeDtypeStruct((B * N, Cpad), out_dtype),
            grid_spec=pltpu.PrefetchScalarGridSpec(
                num_scalar_prefetch=0,
                grid=(B // tb,),
                in_specs=in_specs,
                out_specs=pl.BlockSpec((R, Cpad), lambda i: (i, 0)),
            ),
            compiler_params=pltpu.CompilerParams(
                dimension_semantics=("parallel",),
                vmem_limit_bytes=int(vlim)),
        )(*args)

    try:                        # single-buffer the grid-invariant weights
        out2 = jax.block_until_ready(_run(True))
    except Exception:           # pl.Buffered(1) unsupported on this build
        out2 = _run(False)

    return out2[:, :Cout].reshape(B, Ho, Wo, Cout)


# --------------------------- parameter construction --------------------------


def make_bottleneck_params(key, inplanes, outplanes, expansion=4, eps=1e-5):
    assert outplanes % expansion == 0
    planes = outplanes // expansion
    keys = iter(jax.random.split(key, 20))

    def conv_weight(k, cin, cout, ksize):
        fan_in = cin * ksize * ksize
        bound = 1.0 / (fan_in ** 0.5)
        shape = (cin, cout) if ksize == 1 else (ksize, ksize, cin, cout)  # HWIO
        return jax.random.uniform(k, shape, jnp.float32, -bound, bound)

    def bn_affine(c):
        gamma = jax.random.uniform(next(keys), (1, c), jnp.float32, 0.5, 1.5)
        beta = 0.1 * jax.random.normal(next(keys), (1, c), jnp.float32)
        mean = 0.1 * jax.random.normal(next(keys), (1, c), jnp.float32)
        var = jax.random.uniform(next(keys), (1, c), jnp.float32, 0.5, 1.5)
        scale = gamma / jnp.sqrt(var + eps)
        bias = beta - mean * scale
        return scale, bias

    s1, b1 = bn_affine(inplanes)
    s2, b2 = bn_affine(planes)
    s3, b3 = bn_affine(planes)
    bound3 = 1.0 / (planes ** 0.5)
    params = {
        "s1": s1, "b1": b1,
        "w1": conv_weight(next(keys), inplanes, planes, 1),
        "s2": s2, "b2": b2,
        "w2": conv_weight(next(keys), planes, planes, 3),
        "s3": s3, "b3": b3,
        "w3": conv_weight(next(keys), planes, outplanes, 1),
        "cb3": jax.random.uniform(next(keys), (1, outplanes), jnp.float32,
                                  -bound3, bound3),
    }
    if inplanes != outplanes:
        params["wsc"] = conv_weight(next(keys), inplanes, outplanes, 1)
    return params


# ------------------------------ JAX reference --------------------------------


def bottleneck_reference(x, params, *, stride=1, matmul_dtype=jnp.float32):
    f32 = jnp.float32
    cdt = matmul_dtype
    relu = lambda v: jnp.maximum(v, 0.0)
    xs = x[:, ::stride, ::stride, :] if stride != 1 else x

    p1 = relu(xs * params["s1"] + params["b1"])
    h1 = jnp.einsum("bhwc,cd->bhwd", p1.astype(cdt), params["w1"].astype(cdt),
                    preferred_element_type=f32)
    p2 = relu(h1 * params["s2"] + params["b2"])
    h2 = jax.lax.conv_general_dilated(
        p2.astype(cdt), params["w2"].astype(cdt),
        window_strides=(1, 1), padding=((1, 1), (1, 1)),
        dimension_numbers=("NHWC", "HWIO", "NHWC"),
        preferred_element_type=f32)
    p3 = relu(h2 * params["s3"] + params["b3"])
    y = jnp.einsum("bhwc,cd->bhwd", p3.astype(cdt), params["w3"].astype(cdt),
                   preferred_element_type=f32) + params["cb3"]
    if "wsc" in params:
        res = jnp.einsum("bhwc,cd->bhwd", xs.astype(cdt),
                         params["wsc"].astype(cdt), preferred_element_type=f32)
    else:
        res = xs
    return y + res


# ----------------------------------- main ------------------------------------


if __name__ == "__main__":
    key = jax.random.PRNGKey(0)
    k_param, k_x, k_id = jax.random.split(key, 3)

    B, H, W = 2, 8, 8
    inplanes, outplanes = 16, 32                # expansion=4 -> bottleneck=8

    params = make_bottleneck_params(k_param, inplanes, outplanes)
    x = jax.random.normal(k_x, (B, H, W, inplanes), jnp.float32)

    # f32, projection shortcut, fused 3x3 taps
    out = jax.block_until_ready(bottleneck_forward(x, params, stride=1))
    ref = bottleneck_reference(x, params, stride=1)
    assert out.shape == (B, H, W, outplanes)
    assert jnp.allclose(out, ref, atol=1e-4, rtol=1e-4), "f32 mismatch"

    # stride=2 (conv1 + shortcut strided), un-fused tap path
    out_s2 = jax.block_until_ready(
        bottleneck_forward(x, params, stride=2, fuse_taps=False))
    ref_s2 = bottleneck_reference(x, params, stride=2)
    assert out_s2.shape == (B, H // 2, W // 2, outplanes)
    assert jnp.allclose(out_s2, ref_s2, atol=1e-4, rtol=1e-4), "stride-2 mismatch"

    # identity shortcut (inplanes == outplanes): no eye-matmul in the kernel
    params_id = make_bottleneck_params(k_id, outplanes, outplanes)
    x_id = jax.random.normal(k_x, (B, H, W, outplanes), jnp.float32)
    out_id = jax.block_until_ready(bottleneck_forward(x_id, params_id))
    ref_id = bottleneck_reference(x_id, params_id)
    assert jnp.allclose(out_id, ref_id, atol=1e-4, rtol=1e-4), "identity mismatch"

    # bf16 MXU-operand path (f32 accumulation); reference matches precision
    out_bf = jax.block_until_ready(
        bottleneck_forward(x, params, stride=1, matmul_dtype=jnp.bfloat16))
    ref_bf = bottleneck_reference(x, params, stride=1, matmul_dtype=jnp.bfloat16)
    assert jnp.allclose(out_bf, ref_bf, atol=3e-2, rtol=3e-2), "bf16 mismatch"

    print("KERNEL_OK")
</pallas_src>

<mosaic_0001>
module attributes {stable_mosaic.version = 11 : i64} {
  func.func @probe(%arg0: memref<8x128xf32, #tpu.memory_space<vmem>>, %arg1: memref<8x128xf32, #tpu.memory_space<vmem>>) attributes {dimension_semantics = [], scalar_prefetch = 0 : i64, scratch_operands = 0 : i64, tpu.core_type = #tpu.core_type<tc>} {
    %c0 = arith.constant 0 : index
    %c0_0 = arith.constant 0 : index
    %0 = vector.load %arg0[%c0, %c0_0] : memref<8x128xf32, #tpu.memory_space<vmem>>, vector<8x128xf32>
    %c1_i32 = arith.constant 1 : i32
    %1 = tpu.dynamic_rotate %0 by %c1_i32 dim 0 : vector<8x128xf32>, i32 -> vector<8x128xf32>
    %c0_1 = arith.constant 0 : index
    %c0_2 = arith.constant 0 : index
    %2 = vector.load %arg1[%c0_1, %c0_2] : memref<8x128xf32, #tpu.memory_space<vmem>>, vector<8x128xf32>
    tpu.vector_store %arg1[%c0_1, %c0_2], %1 {strides = array<i32>} : memref<8x128xf32, #tpu.memory_space<vmem>>, vector<8x128xf32>,
    return
  }
}

module attributes {stable_mosaic.version = 11 : i64} {
  func.func @_bottleneck_kernel(%arg0: i32, %arg1: memref<64x16xf32, #tpu.memory_space<vmem>>, %arg2: memref<64x9xf32, #tpu.memory_space<vmem>>, %arg3: memref<1x16xf32, #tpu.memory_space<vmem>>, %arg4: memref<1x16xf32, #tpu.memory_space<vmem>>, %arg5: memref<16x8xf32, #tpu.memory_space<vmem>>, %arg6: memref<1x8xf32, #tpu.memory_space<vmem>>, %arg7: memref<1x8xf32, #tpu.memory_space<vmem>>, %arg8: memref<3x24x8xf32, #tpu.memory_space<vmem>>, %arg9: memref<1x8xf32, #tpu.memory_space<vmem>>, %arg10: memref<1x8xf32, #tpu.memory_space<vmem>>, %arg11: memref<8x128xf32, #tpu.memory_space<vmem>>, %arg12: memref<1x128xf32, #tpu.memory_space<vmem>>, %arg13: memref<16x128xf32, #tpu.memory_space<vmem>>, %arg14: memref<64x128xf32, #tpu.memory_space<vmem>>) attributes {dimension_semantics = [#tpu.dimension_semantics<parallel>], iteration_bounds = array<i64: 2>, scalar_prefetch = 0 : i64, scratch_operands = 0 : i64, tpu.core_type = #tpu.core_type<tc>, window_params = [{transform_indices = @transform_0, window_bounds = array<i64: 64, 16>}, {pipeline_mode = #tpu.pipeline_mode<synchronous>, transform_indices = @transform_1, window_bounds = array<i64: 64, 9>}, {pipeline_mode = #tpu.pipeline_mode<synchronous>, transform_indices = @transform_2, window_bounds = array<i64: 1, 16>}, {pipeline_mode = #tpu.pipeline_mode<synchronous>, transform_indices = @transform_3, window_bounds = array<i64: 1, 16>}, {pipeline_mode = #tpu.pipeline_mode<synchronous>, transform_indices = @transform_4, window_bounds = array<i64: 16, 8>}, {pipeline_mode = #tpu.pipeline_mode<synchronous>, transform_indices = @transform_5, window_bounds = array<i64: 1, 8>}, {pipeline_mode = #tpu.pipeline_mode<synchronous>, transform_indices = @transform_6, window_bounds = array<i64: 1, 8>}, {pipeline_mode = #tpu.pipeline_mode<synchronous>, transform_indices = @transform_7, window_bounds = array<i64: 3, 24, 8>}, {pipeline_mode = #tpu.pipeline_mode<synchronous>, transform_indices = @transform_8, window_bounds = array<i64: 1, 8>}, {pipeline_mode = #tpu.pipeline_mode<synchronous>, transform_indices = @transform_9, window_bounds = array<i64: 1, 8>}, {pipeline_mode = #tpu.pipeline_mode<synchronous>, transform_indices = @transform_10, window_bounds = array<i64: 8, 128>}, {pipeline_mode = #tpu.pipeline_mode<synchronous>, transform_indices = @transform_11, window_bounds = array<i64: 1, 128>}, {pipeline_mode = #tpu.pipeline_mode<synchronous>, transform_indices = @transform_12, window_bounds = array<i64: 16, 128>}, {transform_indices = @transform_13, window_bounds = array<i64: 64, 128>}]} {
    %c0 = arith.constant 0 : index
    %c0_0 = arith.constant 0 : index
    %0 = vector.load %arg1[%c0, %c0_0] : memref<64x16xf32, #tpu.memory_space<vmem>>, vector<64x16xf32>
    %c0_1 = arith.constant 0 : index
    %c0_2 = arith.constant 0 : index
    %1 = vector.load %arg3[%c0_1, %c0_2] : memref<1x16xf32, #tpu.memory_space<vmem>>, vector<1x16xf32>
    %2 = vector.broadcast %1 : vector<1x16xf32> to vector<64x16xf32>
    %3 = arith.mulf %0, %2 : vector<64x16xf32>
    %c0_3 = arith.constant 0 : index
    %c0_4 = arith.constant 0 : index
    %4 = vector.load %arg4[%c0_3, %c0_4] : memref<1x16xf32, #tpu.memory_space<vmem>>, vector<1x16xf32>
    %5 = vector.broadcast %4 : vector<1x16xf32> to vector<64x16xf32>
    %6 = arith.addf %3, %5 : vector<64x16xf32>
    %cst = arith.constant 0.000000e+00 : f32
    %7 = vector.broadcast %cst : f32 to vector<64x16xf32>
    %8 = arith.maximumf %6, %7 : vector<64x16xf32>
    %c0_5 = arith.constant 0 : index
    %c0_6 = arith.constant 0 : index
    %9 = vector.load %arg5[%c0_5, %c0_6] : memref<16x8xf32, #tpu.memory_space<vmem>>, vector<16x8xf32>
    %cst_7 = arith.constant dense<0.000000e+00> : vector<64x8xf32>
    %10 = tpu.matmul %8, %9, %cst_7 {dimension_numbers = #tpu.dot_dimension_numbers<[1], [0], [0], [1], [0, 0, 1, 1], [], []>} : vector<64x16xf32>, vector<16x8xf32>, vector<64x8xf32> -> vector<64x8xf32>
    %c0_8 = arith.constant 0 : index
    %c0_9 = arith.constant 0 : index
    %11 = vector.load %arg6[%c0_8, %c0_9] : memref<1x8xf32, #tpu.memory_space<vmem>>, vector<1x8xf32>
    %12 = vector.broadcast %11 : vector<1x8xf32> to vector<64x8xf32>
    %13 = arith.mulf %10, %12 : vector<64x8xf32>
    %c0_10 = arith.constant 0 : index
    %c0_11 = arith.constant 0 : index
    %14 = vector.load %arg7[%c0_10, %c0_11] : memref<1x8xf32, #tpu.memory_space<vmem>>, vector<1x8xf32>
    %15 = vector.broadcast %14 : vector<1x8xf32> to vector<64x8xf32>
    %16 = arith.addf %13, %15 : vector<64x8xf32>
    %cst_12 = arith.constant 0.000000e+00 : f32
    %17 = vector.broadcast %cst_12 : f32 to vector<64x8xf32>
    %18 = arith.maximumf %16, %17 : vector<64x8xf32>
    %cst_13 = arith.constant 0.000000e+00 : f32
    %19 = vector.broadcast %cst_13 : f32 to vector<64x8xf32>
    %20 = vector.extract_strided_slice %18 {offsets = [55, 0], sizes = [9, 8], strides = [1, 1]} : vector<64x8xf32> to vector<9x8xf32>
    %21 = vector.extract_strided_slice %18 {offsets = [0, 0], sizes = [55, 8], strides = [1, 1]} : vector<64x8xf32> to vector<55x8xf32>
    %22 = tpu.concatenate %20, %21 in 0 : vector<9x8xf32>, vector<55x8xf32> -> vector<64x8xf32>
    %c0_14 = arith.constant 0 : index
    %c0_15 = arith.constant 0 : index
    %23 = vector.load %arg2[%c0_14, %c0_15] : memref<64x9xf32, #tpu.memory_space<vmem>>, vector<64x1xf32>
    %cst_16 = arith.constant 0.000000e+00 : f32
    %24 = vector.broadcast %cst_16 : f32 to vector<64x1xf32>
    %25 = arith.cmpf ogt, %23, %24 : vector<64x1xf32>
    %cst_17 = arith.constant 0.000000e+00 : f32
    %26 = vector.shape_cast %25 : vector<64x1xi1> to vector<64x1xi1>
    %27 = vector.broadcast %26 : vector<64x1xi1> to vector<64x8xi1>
    %28 = vector.broadcast %cst_17 : f32 to vector<64x8xf32>
    %29 = arith.select %27, %22, %28 : vector<64x8xi1>, vector<64x8xf32>
    %30 = vector.extract_strided_slice %18 {offsets = [56, 0], sizes = [8, 8], strides = [1, 1]} : vector<64x8xf32> to vector<8x8xf32>
    %31 = vector.extract_strided_slice %18 {offsets = [0, 0], sizes = [56, 8], strides = [1, 1]} : vector<64x8xf32> to vector<56x8xf32>
    %32 = tpu.concatenate %30, %31 in 0 : vector<8x8xf32>, vector<56x8xf32> -> vector<64x8xf32>
    %c0_18 = arith.constant 0 : index
    %c1 = arith.constant 1 : index
    %33 = vector.load %arg2[%c0_18, %c1] : memref<64x9xf32, #tpu.memory_space<vmem>>, vector<64x1xf32>
    %cst_19 = arith.constant 0.000000e+00 : f32
    %34 = vector.broadcast %cst_19 : f32 to vector<64x1xf32>
    %35 = arith.cmpf ogt, %33, %34 : vector<64x1xf32>
    %cst_20 = arith.constant 0.000000e+00 : f32
    %36 = vector.shape_cast %35 : vector<64x1xi1> to vector<64x1xi1>
    %37 = vector.broadcast %36 : vector<64x1xi1> to vector<64x8xi1>
    %38 = vector.broadcast %cst_20 : f32 to vector<64x8xf32>
    %39 = arith.select %37, %32, %38 : vector<64x8xi1>, vector<64x8xf32>
    %40 = vector.extract_strided_slice %18 {offsets = [57, 0], sizes = [7, 8], strides = [1, 1]} : vector<64x8xf32> to vector<7x8xf32>
    %41 = vector.extract_strided_slice %18 {offsets = [0, 0], sizes = [57, 8], strides = [1, 1]} : vector<64x8xf32> to vector<57x8xf32>
    %42 = tpu.concatenate %40, %41 in 0 : vector<7x8xf32>, vector<57x8xf32> -> vector<64x8xf32>
    %c0_21 = arith.constant 0 : index
    %c2 = arith.constant 2 : index
    %43 = vector.load %arg2[%c0_21, %c2] : memref<64x9xf32, #tpu.memory_space<vmem>>, vector<64x1xf32>
    %cst_22 = arith.constant 0.000000e+00 : f32
    %44 = vector.broadcast %cst_22 : f32 to vector<64x1xf32>
    %45 = arith.cmpf ogt, %43, %44 : vector<64x1xf32>
    %cst_23 = arith.constant 0.000000e+00 : f32
    %46 = vector.shape_cast %45 : vector<64x1xi1> to vector<64x1xi1>
    %47 = vector.broadcast %46 : vector<64x1xi1> to vector<64x8xi1>
    %48 = vector.broadcast %cst_23 : f32 to vector<64x8xf32>
    %49 = arith.select %47, %42, %48 : vector<64x8xi1>, vector<64x8xf32>
    %50 = tpu.concatenate %29, %39, %49 in 1 : vector<64x8xf32>, vector<64x8xf32>, vector<64x8xf32> -> vector<64x24xf32>
    %c0_24 = arith.constant 0 : index
    %c0_25 = arith.constant 0 : index
    %c0_26 = arith.constant 0 : index
    %51 = vector.load %arg8[%c0_24, %c0_25, %c0_26] : memref<3x24x8xf32, #tpu.memory_space<vmem>>, vector<1x24x8xf32>
    %52 = vector.shape_cast %51 : vector<1x24x8xf32> to vector<24x8xf32>
    %cst_27 = arith.constant dense<0.000000e+00> : vector<64x8xf32>
    %53 = tpu.matmul %50, %52, %cst_27 {dimension_numbers = #tpu.dot_dimension_numbers<[1], [0], [0], [1], [0, 0, 1, 1], [], []>} : vector<64x24xf32>, vector<24x8xf32>, vector<64x8xf32> -> vector<64x8xf32>
    %54 = arith.addf %19, %53 : vector<64x8xf32>
    %55 = vector.extract_strided_slice %18 {offsets = [63, 0], sizes = [1, 8], strides = [1, 1]} : vector<64x8xf32> to vector<1x8xf32>
    %56 = vector.extract_strided_slice %18 {offsets = [0, 0], sizes = [63, 8], strides = [1, 1]} : vector<64x8xf32> to vector<63x8xf32>
    %57 = tpu.concatenate %55, %56 in 0 : vector<1x8xf32>, vector<63x8xf32> -> vector<64x8xf32>
    %c0_28 = arith.constant 0 : index
    %c3 = arith.constant 3 : index
    %58 = vector.load %arg2[%c0_28, %c3] : memref<64x9xf32, #tpu.memory_space<vmem>>, vector<64x1xf32>
    %cst_29 = arith.constant 0.000000e+00 : f32
    %59 = vector.broadcast %cst_29 : f32 to vector<64x1xf32>
    %60 = arith.cmpf ogt, %58, %59 : vector<64x1xf32>
    %cst_30 = arith.constant 0.000000e+00 : f32
    %61 = vector.shape_cast %60 : vector<64x1xi1> to vector<64x1xi1>
    %62 = vector.broadcast %61 : vector<64x1xi1> to vector<64x8xi1>
    %63 = vector.broadcast %cst_30 : f32 to vector<64x8xf32>
    %64 = arith.select %62, %57, %63 : vector<64x8xi1>, vector<64x8xf32>
    %c0_31 = arith.constant 0 : index
    %c4 = arith.constant 4 : index
    %65 = vector.load %arg2[%c0_31, %c4] : memref<64x9xf32, #tpu.memory_space<vmem>>, vector<64x1xf32>
    %cst_32 = arith.constant 0.000000e+00 : f32
    %66 = vector.broadcast %cst_32 : f32 to vector<64x1xf32>
    %67 = arith.cmpf ogt, %65, %66 : vector<64x1xf32>
    %cst_33 = arith.constant 0.000000e+00 : f32
    %68 = vector.shape_cast %67 : vector<64x1xi1> to vector<64x1xi1>
    %69 = vector.broadcast %68 : vector<64x1xi1> to vector<64x8xi1>
    %70 = vector.broadcast %cst_33 : f32 to vector<64x8xf32>
    %71 = arith.select %69, %18, %70 : vector<64x8xi1>, vector<64x8xf32>
    %72 = vector.extract_strided_slice %18 {offsets = [1, 0], sizes = [63, 8], strides = [1, 1]} : vector<64x8xf32> to vector<63x8xf32>
    %73 = vector.extract_strided_slice %18 {offsets = [0, 0], sizes = [1, 8], strides = [1, 1]} : vector<64x8xf32> to vector<1x8xf32>
    %74 = tpu.concatenate %72, %73 in 0 : vector<63x8xf32>, vector<1x8xf32> -> vector<64x8xf32>
    %c0_34 = arith.constant 0 : index
    %c5 = arith.constant 5 : index
    %75 = vector.load %arg2[%c0_34, %c5] : memref<64x9xf32, #tpu.memory_space<vmem>>, vector<64x1xf32>
    %cst_35 = arith.constant 0.000000e+00 : f32
    %76 = vector.broadcast %cst_35 : f32 to vector<64x1xf32>
    %77 = arith.cmpf ogt, %75, %76 : vector<64x1xf32>
    %cst_36 = arith.constant 0.000000e+00 : f32
    %78 = vector.shape_cast %77 : vector<64x1xi1> to vector<64x1xi1>
    %79 = vector.broadcast %78 : vector<64x1xi1> to vector<64x8xi1>
    %80 = vector.broadcast %cst_36 : f32 to vector<64x8xf32>
    %81 = arith.select %79, %74, %80 : vector<64x8xi1>, vector<64x8xf32>
    %82 = tpu.concatenate %64, %71, %81 in 1 : vector<64x8xf32>, vector<64x8xf32>, vector<64x8xf32> -> vector<64x24xf32>
    %c1_37 = arith.constant 1 : index
    %c0_38 = arith.constant 0 : index
    %c0_39 = arith.constant 0 : index
    %83 = vector.load %arg8[%c1_37, %c0_38, %c0_39] : memref<3x24x8xf32, #tpu.memory_space<vmem>>, vector<1x24x8xf32>
    %84 = vector.shape_cast %83 : vector<1x24x8xf32> to vector<24x8xf32>
    %cst_40 = arith.constant dense<0.000000e+00> : vector<64x8xf32>
    %85 = tpu.matmul %82, %84, %cst_40 {dimension_numbers = #tpu.dot_dimension_numbers<[1], [0], [0], [1], [0, 0, 1, 1], [], []>} : vector<64x24xf32>, vector<24x8xf32>, vector<64x8xf32> -> vector<64x8xf32>
    %86 = arith.addf %54, %85 : vector<64x8xf32>
    %87 = vector.extract_strided_slice %18 {offsets = [7, 0], sizes = [57, 8], strides = [1, 1]} : vector<64x8xf32> to vector<57x8xf32>
    %88 = vector.extract_strided_slice %18 {offsets = [0, 0], sizes = [7, 8], strides = [1, 1]} : vector<64x8xf32> to vector<7x8xf32>
    %89 = tpu.concatenate %87, %88 in 0 : vector<57x8xf32>, vector<7x8xf32> -> vector<64x8xf32>
    %c0_41 = arith.constant 0 : index
    %c6 = arith.constant 6 : index
    %90 = vector.load %arg2[%c0_41, %c6] : memref<64x9xf32, #tpu.memory_space<vmem>>, vector<64x1xf32>
    %cst_42 = arith.constant 0.000000e+00 : f32
    %91 = vector.broadcast %cst_42 : f32 to vector<64x1xf32>
    %92 = arith.cmpf ogt, %90, %91 : vector<64x1xf32>
    %cst_43 = arith.constant 0.000000e+00 : f32
    %93 = vector.shape_cast %92 : vector<64x1xi1> to vector<64x1xi1>
    %94 = vector.broadcast %93 : vector<64x1xi1> to vector<64x8xi1>
    %95 = vector.broadcast %cst_43 : f32 to vector<64x8xf32>
    %96 = arith.select %94, %89, %95 : vector<64x8xi1>, vector<64x8xf32>
    %97 = vector.extract_strided_slice %18 {offsets = [8, 0], sizes = [56, 8], strides = [1, 1]} : vector<64x8xf32> to vector<56x8xf32>
    %98 = vector.extract_strided_slice %18 {offsets = [0, 0], sizes = [8, 8], strides = [1, 1]} : vector<64x8xf32> to vector<8x8xf32>
    %99 = tpu.concatenate %97, %98 in 0 : vector<56x8xf32>, vector<8x8xf32> -> vector<64x8xf32>
    %c0_44 = arith.constant 0 : index
    %c7 = arith.constant 7 : index
    %100 = vector.load %arg2[%c0_44, %c7] : memref<64x9xf32, #tpu.memory_space<vmem>>, vector<64x1xf32>
    %cst_45 = arith.constant 0.000000e+00 : f32
    %101 = vector.broadcast %cst_45 : f32 to vector<64x1xf32>
    %102 = arith.cmpf ogt, %100, %101 : vector<64x1xf32>
    %cst_46 = arith.constant 0.000000e+00 : f32
    %103 = vector.shape_cast %102 : vector<64x1xi1> to vector<64x1xi1>
    %104 = vector.broadcast %103 : vector<64x1xi1> to vector<64x8xi1>
    %105 = vector.broadcast %cst_46 : f32 to vector<64x8xf32>
    %106 = arith.select %104, %99, %105 : vector<64x8xi1>, vector<64x8xf32>
    %107 = vector.extract_strided_slice %18 {offsets = [9, 0], sizes = [55, 8], strides = [1, 1]} : vector<64x8xf32> to vector<55x8xf32>
    %108 = vector.extract_strided_slice %18 {offsets = [0, 0], sizes = [9, 8], strides = [1, 1]} : vector<64x8xf32> to vector<9x8xf32>
    %109 = tpu.concatenate %107, %108 in 0 : vector<55x8xf32>, vector<9x8xf32> -> vector<64x8xf32>
    %c0_47 = arith.constant 0 : index
    %c8 = arith.constant 8 : index
    %110 = vector.load %arg2[%c0_47, %c8] : memref<64x9xf32, #tpu.memory_space<vmem>>, vector<64x1xf32>
    %cst_48 = arith.constant 0.000000e+00 : f32
    %111 = vector.broadcast %cst_48 : f32 to vector<64x1xf32>
    %112 = arith.cmpf ogt, %110, %111 : vector<64x1xf32>
    %cst_49 = arith.constant 0.000000e+00 : f32
    %113 = vector.shape_cast %112 : vector<64x1xi1> to vector<64x1xi1>
    %114 = vector.broadcast %113 : vector<64x1xi1> to vector<64x8xi1>
    %115 = vector.broadcast %cst_49 : f32 to vector<64x8xf32>
    %116 = arith.select %114, %109, %115 : vector<64x8xi1>, vector<64x8xf32>
    %117 = tpu.concatenate %96, %106, %116 in 1 : vector<64x8xf32>, vector<64x8xf32>, vector<64x8xf32> -> vector<64x24xf32>
    %c2_50 = arith.constant 2 : index
    %c0_51 = arith.constant 0 : index
    %c0_52 = arith.constant 0 : index
    %118 = vector.load %arg8[%c2_50, %c0_51, %c0_52] : memref<3x24x8xf32, #tpu.memory_space<vmem>>, vector<1x24x8xf32>
    %119 = vector.shape_cast %118 : vector<1x24x8xf32> to vector<24x8xf32>
    %cst_53 = arith.constant dense<0.000000e+00> : vector<64x8xf32>
    %120 = tpu.matmul %117, %119, %cst_53 {dimension_numbers = #tpu.dot_dimension_numbers<[1], [0], [0], [1], [0, 0, 1, 1], [], []>} : vector<64x24xf32>, vector<24x8xf32>, vector<64x8xf32> -> vector<64x8xf32>
    %121 = arith.addf %86, %120 : vector<64x8xf32>
    %c0_54 = arith.constant 0 : index
    %c0_55 = arith.constant 0 : index
    %122 = vector.load %arg9[%c0_54, %c0_55] : memref<1x8xf32, #tpu.memory_space<vmem>>, vector<1x8xf32>
    %123 = vector.broadcast %122 : vector<1x8xf32> to vector<64x8xf32>
    %124 = arith.mulf %121, %123 : vector<64x8xf32>
    %c0_56 = arith.constant 0 : index
    %c0_57 = arith.constant 0 : index
    %125 = vector.load %arg10[%c0_56, %c0_57] : memref<1x8xf32, #tpu.memory_space<vmem>>, vector<1x8xf32>
    %126 = vector.broadcast %125 : vector<1x8xf32> to vector<64x8xf32>
    %127 = arith.addf %124, %126 : vector<64x8xf32>
    %cst_58 = arith.constant 0.000000e+00 : f32
    %128 = vector.broadcast %cst_58 : f32 to vector<64x8xf32>
    %129 = arith.maximumf %127, %128 : vector<64x8xf32>
    %c0_59 = arith.constant 0 : index
    %c0_60 = arith.constant 0 : index
    %130 = vector.load %arg11[%c0_59, %c0_60] : memref<8x128xf32, #tpu.memory_space<vmem>>, vector<8x128xf32>
    %cst_61 = arith.constant dense<0.000000e+00> : vector<64x128xf32>
    %131 = tpu.matmul %129, %130, %cst_61 {dimension_numbers = #tpu.dot_dimension_numbers<[1], [0], [0], [1], [0, 0, 1, 1], [], []>} : vector<64x8xf32>, vector<8x128xf32>, vector<64x128xf32> -> vector<64x128xf32>
    %c0_62 = arith.constant 0 : index
    %c0_63 = arith.constant 0 : index
    %132 = vector.load %arg12[%c0_62, %c0_63] : memref<1x128xf32, #tpu.memory_space<vmem>>, vector<1x128xf32>
    %133 = vector.broadcast %132 : vector<1x128xf32> to vector<64x128xf32>
    %134 = arith.addf %131, %133 : vector<64x128xf32>
    %c0_64 = arith.constant 0 : index
    %c0_65 = arith.constant 0 : index
    %135 = vector.load %arg13[%c0_64, %c0_65] : memref<16x128xf32, #tpu.memory_space<vmem>>, vector<16x128xf32>
    %cst_66 = arith.constant dense<0.000000e+00> : vector<64x128xf32>
    %136 = tpu.matmul %0, %135, %cst_66 {dimension_numbers = #tpu.dot_dimension_numbers<[1], [0], [0], [1], [0, 0, 1, 1], [], []>} : vector<64x16xf32>, vector<16x128xf32>, vector<64x128xf32> -> vector<64x128xf32>
    %137 = arith.addf %134, %136 : vector<64x128xf32>
    %c0_67 = arith.constant 0 : index
    %c0_68 = arith.constant 0 : index
    %138 = vector.load %arg14[%c0_67, %c0_68] : memref<64x128xf32, #tpu.memory_space<vmem>>, vector<64x128xf32>
    tpu.vector_store %arg14[%c0_67, %c0_68], %137 {strides = array<i32>} : memref<64x128xf32, #tpu.memory_space<vmem>>, vector<64x128xf32>,
    return
  }
  func.func @transform_0(%arg0: i32) -> (i32, i32) {
    %c0_i32 = arith.constant 0 : i32
    %c0_i32_0 = arith.constant 0 : i32
    return %arg0, %c0_i32 : i32, i32
  }
  func.func @transform_1(%arg0: i32) -> (i32, i32) {
    %c0_i32 = arith.constant 0 : i32
    %c0_i32_0 = arith.constant 0 : i32
    %c0_i32_1 = arith.constant 0 : i32
    return %c0_i32, %c0_i32_0 : i32, i32
  }
  func.func @transform_2(%arg0: i32) -> (i32, i32) {
    %c0_i32 = arith.constant 0 : i32
    %c0_i32_0 = arith.constant 0 : i32
    %c0_i32_1 = arith.constant 0 : i32
    return %c0_i32, %c0_i32_0 : i32, i32
  }
  func.func @transform_3(%arg0: i32) -> (i32, i32) {
    %c0_i32 = arith.constant 0 : i32
    %c0_i32_0 = arith.constant 0 : i32
    %c0_i32_1 = arith.constant 0 : i32
    return %c0_i32, %c0_i32_0 : i32, i32
  }
  func.func @transform_4(%arg0: i32) -> (i32, i32) {
    %c0_i32 = arith.constant 0 : i32
    %c0_i32_0 = arith.constant 0 : i32
    %c0_i32_1 = arith.constant 0 : i32
    return %c0_i32, %c0_i32_0 : i32, i32
  }
  func.func @transform_5(%arg0: i32) -> (i32, i32) {
    %c0_i32 = arith.constant 0 : i32
    %c0_i32_0 = arith.constant 0 : i32
    %c0_i32_1 = arith.constant 0 : i32
    return %c0_i32, %c0_i32_0 : i32, i32
  }
  func.func @transform_6(%arg0: i32) -> (i32, i32) {
    %c0_i32 = arith.constant 0 : i32
    %c0_i32_0 = arith.constant 0 : i32
    %c0_i32_1 = arith.constant 0 : i32
    return %c0_i32, %c0_i32_0 : i32, i32
  }
  func.func @transform_7(%arg0: i32) -> (i32, i32, i32) {
    %c0_i32 = arith.constant 0 : i32
    %c0_i32_0 = arith.constant 0 : i32
    %c0_i32_1 = arith.constant 0 : i32
    %c0_i32_2 = arith.constant 0 : i32
    return %c0_i32, %c0_i32_0, %c0_i32_1 : i32, i32, i32
  }
  func.func @transform_8(%arg0: i32) -> (i32, i32) {
    %c0_i32 = arith.constant 0 : i32
    %c0_i32_0 = arith.constant 0 : i32
    %c0_i32_1 = arith.constant 0 : i32
    return %c0_i32, %c0_i32_0 : i32, i32
  }
  func.func @transform_9(%arg0: i32) -> (i32, i32) {
    %c0_i32 = arith.constant 0 : i32
    %c0_i32_0 = arith.constant 0 : i32
    %c0_i32_1 = arith.constant 0 : i32
    return %c0_i32, %c0_i32_0 : i32, i32
  }
  func.func @transform_10(%arg0: i32) -> (i32, i32) {
    %c0_i32 = arith.constant 0 : i32
    %c0_i32_0 = arith.constant 0 : i32
    %c0_i32_1 = arith.constant 0 : i32
    return %c0_i32, %c0_i32_0 : i32, i32
  }
  func.func @transform_11(%arg0: i32) -> (i32, i32) {
    %c0_i32 = arith.constant 0 : i32
    %c0_i32_0 = arith.constant 0 : i32
    %c0_i32_1 = arith.constant 0 : i32
    return %c0_i32, %c0_i32_0 : i32, i32
  }
  func.func @transform_12(%arg0: i32) -> (i32, i32) {
    %c0_i32 = arith.constant 0 : i32
    %c0_i32_0 = arith.constant 0 : i32
    %c0_i32_1 = arith.constant 0 : i32
    return %c0_i32, %c0_i32_0 : i32, i32
  }
  func.func @transform_13(%arg0: i32) -> (i32, i32) {
    %c0_i32 = arith.constant 0 : i32
    %c0_i32_0 = arith.constant 0 : i32
    return %arg0, %c0_i32 : i32, i32
  }
}

module attributes {stable_mosaic.version = 11 : i64} {
  func.func @_bottleneck_kernel(%arg0: i32, %arg1: memref<64x16xf32, #tpu.memory_space<vmem>>, %arg2: memref<64x9xf32, #tpu.memory_space<vmem>>, %arg3: memref<1x16xf32, #tpu.memory_space<vmem>>, %arg4: memref<1x16xf32, #tpu.memory_space<vmem>>, %arg5: memref<16x8xf32, #tpu.memory_space<vmem>>, %arg6: memref<1x8xf32, #tpu.memory_space<vmem>>, %arg7: memref<1x8xf32, #tpu.memory_space<vmem>>, %arg8: memref<3x24x8xf32, #tpu.memory_space<vmem>>, %arg9: memref<1x8xf32, #tpu.memory_space<vmem>>, %arg10: memref<1x8xf32, #tpu.memory_space<vmem>>, %arg11: memref<8x128xf32, #tpu.memory_space<vmem>>, %arg12: memref<1x128xf32, #tpu.memory_space<vmem>>, %arg13: memref<16x128xf32, #tpu.memory_space<vmem>>, %arg14: memref<64x128xf32, #tpu.memory_space<vmem>>) attributes {dimension_semantics = [#tpu.dimension_semantics<parallel>], iteration_bounds = array<i64: 2>, scalar_prefetch = 0 : i64, scratch_operands = 0 : i64, tpu.core_type = #tpu.core_type<tc>, window_params = [{transform_indices = @transform_0, window_bounds = array<i64: 64, 16>}, {pipeline_mode = #tpu.pipeline_mode<synchronous>, transform_indices = @transform_1, window_bounds = array<i64: 64, 9>}, {pipeline_mode = #tpu.pipeline_mode<synchronous>, transform_indices = @transform_2, window_bounds = array<i64: 1, 16>}, {pipeline_mode = #tpu.pipeline_mode<synchronous>, transform_indices = @transform_3, window_bounds = array<i64: 1, 16>}, {pipeline_mode = #tpu.pipeline_mode<synchronous>, transform_indices = @transform_4, window_bounds = array<i64: 16, 8>}, {pipeline_mode = #tpu.pipeline_mode<synchronous>, transform_indices = @transform_5, window_bounds = array<i64: 1, 8>}, {pipeline_mode = #tpu.pipeline_mode<synchronous>, transform_indices = @transform_6, window_bounds = array<i64: 1, 8>}, {pipeline_mode = #tpu.pipeline_mode<synchronous>, transform_indices = @transform_7, window_bounds = array<i64: 3, 24, 8>}, {pipeline_mode = #tpu.pipeline_mode<synchronous>, transform_indices = @transform_8, window_bounds = array<i64: 1, 8>}, {pipeline_mode = #tpu.pipeline_mode<synchronous>, transform_indices = @transform_9, window_bounds = array<i64: 1, 8>}, {pipeline_mode = #tpu.pipeline_mode<synchronous>, transform_indices = @transform_10, window_bounds = array<i64: 8, 128>}, {pipeline_mode = #tpu.pipeline_mode<synchronous>, transform_indices = @transform_11, window_bounds = array<i64: 1, 128>}, {pipeline_mode = #tpu.pipeline_mode<synchronous>, transform_indices = @transform_12, window_bounds = array<i64: 16, 128>}, {transform_indices = @transform_13, window_bounds = array<i64: 64, 128>}]} {
    %c0 = arith.constant 0 : index
    %c0_0 = arith.constant 0 : index
    %0 = vector.load %arg1[%c0, %c0_0] : memref<64x16xf32, #tpu.memory_space<vmem>>, vector<64x16xf32>
    %c0_1 = arith.constant 0 : index
    %c0_2 = arith.constant 0 : index
    %1 = vector.load %arg3[%c0_1, %c0_2] : memref<1x16xf32, #tpu.memory_space<vmem>>, vector<1x16xf32>
    %2 = vector.broadcast %1 : vector<1x16xf32> to vector<64x16xf32>
    %3 = arith.mulf %0, %2 : vector<64x16xf32>
    %c0_3 = arith.constant 0 : index
    %c0_4 = arith.constant 0 : index
    %4 = vector.load %arg4[%c0_3, %c0_4] : memref<1x16xf32, #tpu.memory_space<vmem>>, vector<1x16xf32>
    %5 = vector.broadcast %4 : vector<1x16xf32> to vector<64x16xf32>
    %6 = arith.addf %3, %5 : vector<64x16xf32>
    %cst = arith.constant 0.000000e+00 : f32
    %7 = vector.broadcast %cst : f32 to vector<64x16xf32>
    %8 = arith.maximumf %6, %7 : vector<64x16xf32>
    %c0_5 = arith.constant 0 : index
    %c0_6 = arith.constant 0 : index
    %9 = vector.load %arg5[%c0_5, %c0_6] : memref<16x8xf32, #tpu.memory_space<vmem>>, vector<16x8xf32>
    %cst_7 = arith.constant dense<0.000000e+00> : vector<64x8xf32>
    %10 = tpu.matmul %8, %9, %cst_7 {dimension_numbers = #tpu.dot_dimension_numbers<[1], [0], [0], [1], [0, 0, 1, 1], [], []>} : vector<64x16xf32>, vector<16x8xf32>, vector<64x8xf32> -> vector<64x8xf32>
    %c0_8 = arith.constant 0 : index
    %c0_9 = arith.constant 0 : index
    %11 = vector.load %arg6[%c0_8, %c0_9] : memref<1x8xf32, #tpu.memory_space<vmem>>, vector<1x8xf32>
    %12 = vector.broadcast %11 : vector<1x8xf32> to vector<64x8xf32>
    %13 = arith.mulf %10, %12 : vector<64x8xf32>
    %c0_10 = arith.constant 0 : index
    %c0_11 = arith.constant 0 : index
    %14 = vector.load %arg7[%c0_10, %c0_11] : memref<1x8xf32, #tpu.memory_space<vmem>>, vector<1x8xf32>
    %15 = vector.broadcast %14 : vector<1x8xf32> to vector<64x8xf32>
    %16 = arith.addf %13, %15 : vector<64x8xf32>
    %cst_12 = arith.constant 0.000000e+00 : f32
    %17 = vector.broadcast %cst_12 : f32 to vector<64x8xf32>
    %18 = arith.maximumf %16, %17 : vector<64x8xf32>
    %cst_13 = arith.constant 0.000000e+00 : f32
    %19 = vector.broadcast %cst_13 : f32 to vector<64x8xf32>
    %20 = vector.extract_strided_slice %18 {offsets = [55, 0], sizes = [9, 8], strides = [1, 1]} : vector<64x8xf32> to vector<9x8xf32>
    %21 = vector.extract_strided_slice %18 {offsets = [0, 0], sizes = [55, 8], strides = [1, 1]} : vector<64x8xf32> to vector<55x8xf32>
    %22 = tpu.concatenate %20, %21 in 0 : vector<9x8xf32>, vector<55x8xf32> -> vector<64x8xf32>
    %c0_14 = arith.constant 0 : index
    %c0_15 = arith.constant 0 : index
    %23 = vector.load %arg2[%c0_14, %c0_15] : memref<64x9xf32, #tpu.memory_space<vmem>>, vector<64x1xf32>
    %cst_16 = arith.constant 0.000000e+00 : f32
    %24 = vector.broadcast %cst_16 : f32 to vector<64x1xf32>
    %25 = arith.cmpf ogt, %23, %24 : vector<64x1xf32>
    %cst_17 = arith.constant 0.000000e+00 : f32
    %26 = vector.shape_cast %25 : vector<64x1xi1> to vector<64x1xi1>
    %27 = vector.broadcast %26 : vector<64x1xi1> to vector<64x8xi1>
    %28 = vector.broadcast %cst_17 : f32 to vector<64x8xf32>
    %29 = arith.select %27, %22, %28 : vector<64x8xi1>, vector<64x8xf32>
    %30 = vector.extract_strided_slice %18 {offsets = [56, 0], sizes = [8, 8], strides = [1, 1]} : vector<64x8xf32> to vector<8x8xf32>
    %31 = vector.extract_strided_slice %18 {offsets = [0, 0], sizes = [56, 8], strides = [1, 1]} : vector<64x8xf32> to vector<56x8xf32>
    %32 = tpu.concatenate %30, %31 in 0 : vector<8x8xf32>, vector<56x8xf32> -> vector<64x8xf32>
    %c0_18 = arith.constant 0 : index
    %c1 = arith.constant 1 : index
    %33 = vector.load %arg2[%c0_18, %c1] : memref<64x9xf32, #tpu.memory_space<vmem>>, vector<64x1xf32>
    %cst_19 = arith.constant 0.000000e+00 : f32
    %34 = vector.broadcast %cst_19 : f32 to vector<64x1xf32>
    %35 = arith.cmpf ogt, %33, %34 : vector<64x1xf32>
    %cst_20 = arith.constant 0.000000e+00 : f32
    %36 = vector.shape_cast %35 : vector<64x1xi1> to vector<64x1xi1>
    %37 = vector.broadcast %36 : vector<64x1xi1> to vector<64x8xi1>
    %38 = vector.broadcast %cst_20 : f32 to vector<64x8xf32>
    %39 = arith.select %37, %32, %38 : vector<64x8xi1>, vector<64x8xf32>
    %40 = vector.extract_strided_slice %18 {offsets = [57, 0], sizes = [7, 8], strides = [1, 1]} : vector<64x8xf32> to vector<7x8xf32>
    %41 = vector.extract_strided_slice %18 {offsets = [0, 0], sizes = [57, 8], strides = [1, 1]} : vector<64x8xf32> to vector<57x8xf32>
    %42 = tpu.concatenate %40, %41 in 0 : vector<7x8xf32>, vector<57x8xf32> -> vector<64x8xf32>
    %c0_21 = arith.constant 0 : index
    %c2 = arith.constant 2 : index
    %43 = vector.load %arg2[%c0_21, %c2] : memref<64x9xf32, #tpu.memory_space<vmem>>, vector<64x1xf32>
    %cst_22 = arith.constant 0.000000e+00 : f32
    %44 = vector.broadcast %cst_22 : f32 to vector<64x1xf32>
    %45 = arith.cmpf ogt, %43, %44 : vector<64x1xf32>
    %cst_23 = arith.constant 0.000000e+00 : f32
    %46 = vector.shape_cast %45 : vector<64x1xi1> to vector<64x1xi1>
    %47 = vector.broadcast %46 : vector<64x1xi1> to vector<64x8xi1>
    %48 = vector.broadcast %cst_23 : f32 to vector<64x8xf32>
    %49 = arith.select %47, %42, %48 : vector<64x8xi1>, vector<64x8xf32>
    %50 = tpu.concatenate %29, %39, %49 in 1 : vector<64x8xf32>, vector<64x8xf32>, vector<64x8xf32> -> vector<64x24xf32>
    %c0_24 = arith.constant 0 : index
    %c0_25 = arith.constant 0 : index
    %c0_26 = arith.constant 0 : index
    %51 = vector.load %arg8[%c0_24, %c0_25, %c0_26] : memref<3x24x8xf32, #tpu.memory_space<vmem>>, vector<1x24x8xf32>
    %52 = vector.shape_cast %51 : vector<1x24x8xf32> to vector<24x8xf32>
    %cst_27 = arith.constant dense<0.000000e+00> : vector<64x8xf32>
    %53 = tpu.matmul %50, %52, %cst_27 {dimension_numbers = #tpu.dot_dimension_numbers<[1], [0], [0], [1], [0, 0, 1, 1], [], []>} : vector<64x24xf32>, vector<24x8xf32>, vector<64x8xf32> -> vector<64x8xf32>
    %54 = arith.addf %19, %53 : vector<64x8xf32>
    %55 = vector.extract_strided_slice %18 {offsets = [63, 0], sizes = [1, 8], strides = [1, 1]} : vector<64x8xf32> to vector<1x8xf32>
    %56 = vector.extract_strided_slice %18 {offsets = [0, 0], sizes = [63, 8], strides = [1, 1]} : vector<64x8xf32> to vector<63x8xf32>
    %57 = tpu.concatenate %55, %56 in 0 : vector<1x8xf32>, vector<63x8xf32> -> vector<64x8xf32>
    %c0_28 = arith.constant 0 : index
    %c3 = arith.constant 3 : index
    %58 = vector.load %arg2[%c0_28, %c3] : memref<64x9xf32, #tpu.memory_space<vmem>>, vector<64x1xf32>
    %cst_29 = arith.constant 0.000000e+00 : f32
    %59 = vector.broadcast %cst_29 : f32 to vector<64x1xf32>
    %60 = arith.cmpf ogt, %58, %59 : vector<64x1xf32>
    %cst_30 = arith.constant 0.000000e+00 : f32
    %61 = vector.shape_cast %60 : vector<64x1xi1> to vector<64x1xi1>
    %62 = vector.broadcast %61 : vector<64x1xi1> to vector<64x8xi1>
    %63 = vector.broadcast %cst_30 : f32 to vector<64x8xf32>
    %64 = arith.select %62, %57, %63 : vector<64x8xi1>, vector<64x8xf32>
    %c0_31 = arith.constant 0 : index
    %c4 = arith.constant 4 : index
    %65 = vector.load %arg2[%c0_31, %c4] : memref<64x9xf32, #tpu.memory_space<vmem>>, vector<64x1xf32>
    %cst_32 = arith.constant 0.000000e+00 : f32
    %66 = vector.broadcast %cst_32 : f32 to vector<64x1xf32>
    %67 = arith.cmpf ogt, %65, %66 : vector<64x1xf32>
    %cst_33 = arith.constant 0.000000e+00 : f32
    %68 = vector.shape_cast %67 : vector<64x1xi1> to vector<64x1xi1>
    %69 = vector.broadcast %68 : vector<64x1xi1> to vector<64x8xi1>
    %70 = vector.broadcast %cst_33 : f32 to vector<64x8xf32>
    %71 = arith.select %69, %18, %70 : vector<64x8xi1>, vector<64x8xf32>
    %72 = vector.extract_strided_slice %18 {offsets = [1, 0], sizes = [63, 8], strides = [1, 1]} : vector<64x8xf32> to vector<63x8xf32>
    %73 = vector.extract_strided_slice %18 {offsets = [0, 0], sizes = [1, 8], strides = [1, 1]} : vector<64x8xf32> to vector<1x8xf32>
    %74 = tpu.concatenate %72, %73 in 0 : vector<63x8xf32>, vector<1x8xf32> -> vector<64x8xf32>
    %c0_34 = arith.constant 0 : index
    %c5 = arith.constant 5 : index
    %75 = vector.load %arg2[%c0_34, %c5] : memref<64x9xf32, #tpu.memory_space<vmem>>, vector<64x1xf32>
    %cst_35 = arith.constant 0.000000e+00 : f32
    %76 = vector.broadcast %cst_35 : f32 to vector<64x1xf32>
    %77 = arith.cmpf ogt, %75, %76 : vector<64x1xf32>
    %cst_36 = arith.constant 0.000000e+00 : f32
    %78 = vector.shape_cast %77 : vector<64x1xi1> to vector<64x1xi1>
    %79 = vector.broadcast %78 : vector<64x1xi1> to vector<64x8xi1>
    %80 = vector.broadcast %cst_36 : f32 to vector<64x8xf32>
    %81 = arith.select %79, %74, %80 : vector<64x8xi1>, vector<64x8xf32>
    %82 = tpu.concatenate %64, %71, %81 in 1 : vector<64x8xf32>, vector<64x8xf32>, vector<64x8xf32> -> vector<64x24xf32>
    %c1_37 = arith.constant 1 : index
    %c0_38 = arith.constant 0 : index
    %c0_39 = arith.constant 0 : index
    %83 = vector.load %arg8[%c1_37, %c0_38, %c0_39] : memref<3x24x8xf32, #tpu.memory_space<vmem>>, vector<1x24x8xf32>
    %84 = vector.shape_cast %83 : vector<1x24x8xf32> to vector<24x8xf32>
    %cst_40 = arith.constant dense<0.000000e+00> : vector<64x8xf32>
    %85 = tpu.matmul %82, %84, %cst_40 {dimension_numbers = #tpu.dot_dimension_numbers<[1], [0], [0], [1], [0, 0, 1, 1], [], []>} : vector<64x24xf32>, vector<24x8xf32>, vector<64x8xf32> -> vector<64x8xf32>
    %86 = arith.addf %54, %85 : vector<64x8xf32>
    %87 = vector.extract_strided_slice %18 {offsets = [7, 0], sizes = [57, 8], strides = [1, 1]} : vector<64x8xf32> to vector<57x8xf32>
    %88 = vector.extract_strided_slice %18 {offsets = [0, 0], sizes = [7, 8], strides = [1, 1]} : vector<64x8xf32> to vector<7x8xf32>
    %89 = tpu.concatenate %87, %88 in 0 : vector<57x8xf32>, vector<7x8xf32> -> vector<64x8xf32>
    %c0_41 = arith.constant 0 : index
    %c6 = arith.constant 6 : index
    %90 = vector.load %arg2[%c0_41, %c6] : memref<64x9xf32, #tpu.memory_space<vmem>>, vector<64x1xf32>
    %cst_42 = arith.constant 0.000000e+00 : f32
    %91 = vector.broadcast %cst_42 : f32 to vector<64x1xf32>
    %92 = arith.cmpf ogt, %90, %91 : vector<64x1xf32>
    %cst_43 = arith.constant 0.000000e+00 : f32
    %93 = vector.shape_cast %92 : vector<64x1xi1> to vector<64x1xi1>
    %94 = vector.broadcast %93 : vector<64x1xi1> to vector<64x8xi1>
    %95 = vector.broadcast %cst_43 : f32 to vector<64x8xf32>
    %96 = arith.select %94, %89, %95 : vector<64x8xi1>, vector<64x8xf32>
    %97 = vector.extract_strided_slice %18 {offsets = [8, 0], sizes = [56, 8], strides = [1, 1]} : vector<64x8xf32> to vector<56x8xf32>
    %98 = vector.extract_strided_slice %18 {offsets = [0, 0], sizes = [8, 8], strides = [1, 1]} : vector<64x8xf32> to vector<8x8xf32>
    %99 = tpu.concatenate %97, %98 in 0 : vector<56x8xf32>, vector<8x8xf32> -> vector<64x8xf32>
    %c0_44 = arith.constant 0 : index
    %c7 = arith.constant 7 : index
    %100 = vector.load %arg2[%c0_44, %c7] : memref<64x9xf32, #tpu.memory_space<vmem>>, vector<64x1xf32>
    %cst_45 = arith.constant 0.000000e+00 : f32
    %101 = vector.broadcast %cst_45 : f32 to vector<64x1xf32>
    %102 = arith.cmpf ogt, %100, %101 : vector<64x1xf32>
    %cst_46 = arith.constant 0.000000e+00 : f32
    %103 = vector.shape_cast %102 : vector<64x1xi1> to vector<64x1xi1>
    %104 = vector.broadcast %103 : vector<64x1xi1> to vector<64x8xi1>
    %105 = vector.broadcast %cst_46 : f32 to vector<64x8xf32>
    %106 = arith.select %104, %99, %105 : vector<64x8xi1>, vector<64x8xf32>
    %107 = vector.extract_strided_slice %18 {offsets = [9, 0], sizes = [55, 8], strides = [1, 1]} : vector<64x8xf32> to vector<55x8xf32>
    %108 = vector.extract_strided_slice %18 {offsets = [0, 0], sizes = [9, 8], strides = [1, 1]} : vector<64x8xf32> to vector<9x8xf32>
    %109 = tpu.concatenate %107, %108 in 0 : vector<55x8xf32>, vector<9x8xf32> -> vector<64x8xf32>
    %c0_47 = arith.constant 0 : index
    %c8 = arith.constant 8 : index
    %110 = vector.load %arg2[%c0_47, %c8] : memref<64x9xf32, #tpu.memory_space<vmem>>, vector<64x1xf32>
    %cst_48 = arith.constant 0.000000e+00 : f32
    %111 = vector.broadcast %cst_48 : f32 to vector<64x1xf32>
    %112 = arith.cmpf ogt, %110, %111 : vector<64x1xf32>
    %cst_49 = arith.constant 0.000000e+00 : f32
    %113 = vector.shape_cast %112 : vector<64x1xi1> to vector<64x1xi1>
    %114 = vector.broadcast %113 : vector<64x1xi1> to vector<64x8xi1>
    %115 = vector.broadcast %cst_49 : f32 to vector<64x8xf32>
    %116 = arith.select %114, %109, %115 : vector<64x8xi1>, vector<64x8xf32>
    %117 = tpu.concatenate %96, %106, %116 in 1 : vector<64x8xf32>, vector<64x8xf32>, vector<64x8xf32> -> vector<64x24xf32>
    %c2_50 = arith.constant 2 : index
    %c0_51 = arith.constant 0 : index
    %c0_52 = arith.constant 0 : index
    %118 = vector.load %arg8[%c2_50, %c0_51, %c0_52] : memref<3x24x8xf32, #tpu.memory_space<vmem>>, vector<1x24x8xf32>
    %119 = vector.shape_cast %118 : vector<1x24x8xf32> to vector<24x8xf32>
    %cst_53 = arith.constant dense<0.000000e+00> : vector<64x8xf32>
    %120 = tpu.matmul %117, %119, %cst_53 {dimension_numbers = #tpu.dot_dimension_numbers<[1], [0], [0], [1], [0, 0, 1, 1], [], []>} : vector<64x24xf32>, vector<24x8xf32>, vector<64x8xf32> -> vector<64x8xf32>
    %121 = arith.addf %86, %120 : vector<64x8xf32>
    %c0_54 = arith.constant 0 : index
    %c0_55 = arith.constant 0 : index
    %122 = vector.load %arg9[%c0_54, %c0_55] : memref<1x8xf32, #tpu.memory_space<vmem>>, vector<1x8xf32>
    %123 = vector.broadcast %122 : vector<1x8xf32> to vector<64x8xf32>
    %124 = arith.mulf %121, %123 : vector<64x8xf32>
    %c0_56 = arith.constant 0 : index
    %c0_57 = arith.constant 0 : index
    %125 = vector.load %arg10[%c0_56, %c0_57] : memref<1x8xf32, #tpu.memory_space<vmem>>, vector<1x8xf32>
    %126 = vector.broadcast %125 : vector<1x8xf32> to vector<64x8xf32>
    %127 = arith.addf %124, %126 : vector<64x8xf32>
    %cst_58 = arith.constant 0.000000e+00 : f32
    %128 = vector.broadcast %cst_58 : f32 to vector<64x8xf32>
    %129 = arith.maximumf %127, %128 : vector<64x8xf32>
    %c0_59 = arith.constant 0 : index
    %c0_60 = arith.constant 0 : index
    %130 = vector.load %arg11[%c0_59, %c0_60] : memref<8x128xf32, #tpu.memory_space<vmem>>, vector<8x128xf32>
    %cst_61 = arith.constant dense<0.000000e+00> : vector<64x128xf32>
    %131 = tpu.matmul %129, %130, %cst_61 {dimension_numbers = #tpu.dot_dimension_numbers<[1], [0], [0], [1], [0, 0, 1, 1], [], []>} : vector<64x8xf32>, vector<8x128xf32>, vector<64x128xf32> -> vector<64x128xf32>
    %c0_62 = arith.constant 0 : index
    %c0_63 = arith.constant 0 : index
    %132 = vector.load %arg12[%c0_62, %c0_63] : memref<1x128xf32, #tpu.memory_space<vmem>>, vector<1x128xf32>
    %133 = vector.broadcast %132 : vector<1x128xf32> to vector<64x128xf32>
    %134 = arith.addf %131, %133 : vector<64x128xf32>
    %c0_64 = arith.constant 0 : index
    %c0_65 = arith.constant 0 : index
    %135 = vector.load %arg13[%c0_64, %c0_65] : memref<16x128xf32, #tpu.memory_space<vmem>>, vector<16x128xf32>
    %cst_66 = arith.constant dense<0.000000e+00> : vector<64x128xf32>
    %136 = tpu.matmul %0, %135, %cst_66 {dimension_numbers = #tpu.dot_dimension_numbers<[1], [0], [0], [1], [0, 0, 1, 1], [], []>} : vector<64x16xf32>, vector<16x128xf32>, vector<64x128xf32> -> vector<64x128xf32>
    %137 = arith.addf %134, %136 : vector<64x128xf32>
    %c0_67 = arith.constant 0 : index
    %c0_68 = arith.constant 0 : index
    %138 = vector.load %arg14[%c0_67, %c0_68] : memref<64x128xf32, #tpu.memory_space<vmem>>, vector<64x128xf32>
    tpu.vector_store %arg14[%c0_67, %c0_68], %137 {strides = array<i32>} : memref<64x128xf32, #tpu.memory_space<vmem>>, vector<64x128xf32>,
    return
  }
  func.func @transform_0(%arg0: i32) -> (i32, i32) {
    %c0_i32 = arith.constant 0 : i32
    %c0_i32_0 = arith.constant 0 : i32
    return %arg0, %c0_i32 : i32, i32
  }
  func.func @transform_1(%arg0: i32) -> (i32, i32) {
    %c0_i32 = arith.constant 0 : i32
    %c0_i32_0 = arith.constant 0 : i32
    %c0_i32_1 = arith.constant 0 : i32
    return %c0_i32, %c0_i32_0 : i32, i32
  }
  func.func @transform_2(%arg0: i32) -> (i32, i32) {
    %c0_i32 = arith.constant 0 : i32
    %c0_i32_0 = arith.constant 0 : i32
    %c0_i32_1 = arith.constant 0 : i32
    return %c0_i32, %c0_i32_0 : i32, i32
  }
  func.func @transform_3(%arg0: i32) -> (i32, i32) {
    %c0_i32 = arith.constant 0 : i32
    %c0_i32_0 = arith.constant 0 : i32
    %c0_i32_1 = arith.constant 0 : i32
    return %c0_i32, %c0_i32_0 : i32, i32
  }
  func.func @transform_4(%arg0: i32) -> (i32, i32) {
    %c0_i32 = arith.constant 0 : i32
    %c0_i32_0 = arith.constant 0 : i32
    %c0_i32_1 = arith.constant 0 : i32
    return %c0_i32, %c0_i32_0 : i32, i32
  }
  func.func @transform_5(%arg0: i32) -> (i32, i32) {
    %c0_i32 = arith.constant 0 : i32
    %c0_i32_0 = arith.constant 0 : i32
    %c0_i32_1 = arith.constant 0 : i32
    return %c0_i32, %c0_i32_0 : i32, i32
  }
  func.func @transform_6(%arg0: i32) -> (i32, i32) {
    %c0_i32 = arith.constant 0 : i32
    %c0_i32_0 = arith.constant 0 : i32
    %c0_i32_1 = arith.constant 0 : i32
    return %c0_i32, %c0_i32_0 : i32, i32
  }
  func.func @transform_7(%arg0: i32) -> (i32, i32, i32) {
    %c0_i32 = arith.constant 0 : i32
    %c0_i32_0 = arith.constant 0 : i32
    %c0_i32_1 = arith.constant 0 : i32
    %c0_i32_2 = arith.constant 0 : i32
    return %c0_i32, %c0_i32_0, %c0_i32_1 : i32, i32, i32
  }
  func.func @transform_8(%arg0: i32) -> (i32, i32) {
    %c0_i32 = arith.constant 0 : i32
    %c0_i32_0 = arith.constant 0 : i32
    %c0_i32_1 = arith.constant 0 : i32
    return %c0_i32, %c0_i32_0 : i32, i32
  }
  func.func @transform_9(%arg0: i32) -> (i32, i32) {
    %c0_i32 = arith.constant 0 : i32
    %c0_i32_0 = arith.constant 0 : i32
    %c0_i32_1 = arith.constant 0 : i32
    return %c0_i32, %c0_i32_0 : i32, i32
  }
  func.func @transform_10(%arg0: i32) -> (i32, i32) {
    %c0_i32 = arith.constant 0 : i32
    %c0_i32_0 = arith.constant 0 : i32
    %c0_i32_1 = arith.constant 0 : i32
    return %c0_i32, %c0_i32_0 : i32, i32
  }
  func.func @transform_11(%arg0: i32) -> (i32, i32) {
    %c0_i32 = arith.constant 0 : i32
    %c0_i32_0 = arith.constant 0 : i32
    %c0_i32_1 = arith.constant 0 : i32
    return %c0_i32, %c0_i32_0 : i32, i32
  }
  func.func @transform_12(%arg0: i32) -> (i32, i32) {
    %c0_i32 = arith.constant 0 : i32
    %c0_i32_0 = arith.constant 0 : i32
    %c0_i32_1 = arith.constant 0 : i32
    return %c0_i32, %c0_i32_0 : i32, i32
  }
  func.func @transform_13(%arg0: i32) -> (i32, i32) {
    %c0_i32 = arith.constant 0 : i32
    %c0_i32_0 = arith.constant 0 : i32
    return %arg0, %c0_i32 : i32, i32
  }
}

</mosaic_0001>

<bundles_post_ra>
// kernel: tpu_custom_call.1
= control target key start
LH: loop header
LB: loop body
LE: loop exit
PB: predicated region body
PF: predicated region fallthrough
CT: control target
= control target key end

     0   :  { %6 = vsyncpa [#allocation3], 0  ;;  %s103_s0 = inlined_call_operand.hbm [shape: f32[8,128], index: 0, kind: input, shape index: {}]   ;;  %s104_s1 = inlined_call_operand.hbm [shape: f32[8,128], index: 1, kind: output, shape index: {}]  }
   0x1   :  { %7 = vsyncpa [#allocation4], 0  ;;  %s85_s6 = smov [#allocation2]  }
   0x2   :  { %s14_s7 = sshll.u32 %s85_s6, 4  ;;  %s15_s7 = int_to_ptr.vmem [resolvable:$true] %s14_s7 }
   0x3   :  { %s49_s8 = scalar_lea.vmem %s15_s7, 128  ;;  %p54_p1 = scmp.lt.s32.totalorder %s15_s7, %s15_s7 }
   0x4   :  { %p50_p0 = scmp.ne.s32.totalorder %s15_s7, %s49_s8  ;;  %p55_p2 = scmp.lt.s32.totalorder %s49_s8, %s49_s8 }
   0x6   :  { %p56_p3 = por %p55_p2, %p54_p1 }
   0x8   :  { %p57_p4 = pnand %p56_p3, %p50_p0 }
   0xa   :  { %60 = shalt.err (!%p57_p4)
}
   0xb   :  { %17 = dma.hbm_to_vmem [thread:$0]  %s103_s0, 128, %s15_s7, [#allocation3]  }
   0xc   :  { %81 = dma.done.wait [#allocation3], 128  }
   0xd   :  { %82 = vsyncadd [#allocation3], 4294967168  ;;  %s86_s11 = smov [#allocation5]   ;;  %v21_v0 = vld [vmem:[#allocation2] sm:$0xff] }
   0xe   :  { %s30_s12 = sshll.u32 %s86_s11, 4  ;;  %v22_v1 = vrot.slane %v21_v0, 7  ;;  %s31_s12 = int_to_ptr.vmem [resolvable:$true] %s30_s12 }
   0xf   :  { %s61_s13 = scalar_lea.vmem %s31_s12, 128  ;;  %p66_p6 = scmp.lt.s32.totalorder %s31_s12, %s31_s12 }
  0x10   :  { %23 = vst [vmem:[#allocation5] sm:$0xff] %v22_v1  ;;  %p62_p5 = scmp.ne.s32.totalorder %s31_s12, %s61_s13  ;;  %p67_p7 = scmp.lt.s32.totalorder %s61_s13, %s61_s13 }
  0x12   :  { %p68_p8 = por %p67_p7, %p66_p6 }
  0x14   :  { %p69_p9 = pnand %p68_p8, %p62_p5 }
  0x16   :  { %72 = shalt.err (!%p69_p9)
}
  0x17   :  { %33 = dma.vmem_to_hbm [thread:$0]  %s31_s12, 128, %s104_s1, [#allocation4]  }
  0x18   :  { %83 = dma.done.wait [#allocation4], 128  }
  0x19   :  { %84 = vsyncadd [#allocation4], 4294967168 }
  0x1a   :  { %37 = vsyncpa [#allocation3], 1 }
  0x1b   :  { %38 = vsyncpa [#allocation4], 1 }

// kernel: tpu_custom_call.1
= control target key start
LH: loop header
LB: loop body
LE: loop exit
PB: predicated region body
PF: predicated region fallthrough
CT: control target
= control target key end

     0   :  { %s3524_s0 = inlined_call_operand.vmem [shape: f32[128,16], index: 0, kind: input, shape index: {}]   ;;  %s3525_s1 = inlined_call_operand.vmem [shape: f32[64,9], index: 1, kind: input, shape index: {}]   ;;  %s3526_s2 = inlined_call_operand.vmem [shape: f32[1,16], index: 2, kind: input, shape index: {}]   ;;  %s3527_s3 = inlined_call_operand.vmem [shape: f32[1,16], index: 3, kind: input, shape index: {}]   ;;  %s3528_s4 = inlined_call_operand.vmem [shape: f32[16,8], index: 4, kind: input, shape index: {}]   ;;  %s3529_s5 = inlined_call_operand.vmem [shape: f32[1,8], index: 5, kind: input, shape index: {}]   ;;  %s3530_s6 = inlined_call_operand.vmem [shape: f32[1,8], index: 6, kind: input, shape index: {}]   ;;  %s3531_s7 = inlined_call_operand.vmem [shape: f32[3,24,8], index: 7, kind: input, shape index: {}]   ;;  %s3532_s8 = inlined_call_operand.vmem [shape: f32[1,8], index: 8, kind: input, shape index: {}]   ;;  %s3533_s9 = inlined_call_operand.vmem [shape: f32[1,8], index: 9, kind: input, shape index: {}]   ;;  %s3534_s10 = inlined_call_operand.vmem [shape: f32[8,128], index: 10, kind: input, shape index: {}]   ;;  %s3535_s11 = inlined_call_operand.vmem [shape: f32[1,128], index: 11, kind: input, shape index: {}]   ;;  %s3536_s12 = inlined_call_operand.vmem [shape: f32[16,128], index: 12, kind: input, shape index: {}]   ;;  %s3537_s13 = inlined_call_operand.hbm [shape: f32[128,128], index: 13, kind: output, shape index: {}]  }
   0x1   :  { %3541 = sst [smem:[#allocation9_spill]] %s3524_s0 }
   0x2   :  { %3542 = sst [smem:[#allocation10_spill]] %s3528_s4 }
   0x3   :  { %18 = vsyncpa [#allocation3], 0 }
   0x4   :  { %20 = vsyncpa [#allocation3 + $0x1], 0  ;;  %s2628_s25 = smov 0   ;;  %s2630_s26 = smov 0  }
   0x5   :  { %s2632_s27 = smov 0   ;;  %s2634_s28 = smov 0  }
   0x6 LB: > { %s2649_s29 = sadd.s32 4294967295, %s2543_s28   ;;  %s2148_s30 = sadd.s32 4294967294, %s2543_s28   ;;  %s2543_s28 = sphi %s2634_s28, %s3563_s28   ;;  %s2539_s27 = sphi %s2632_s27, %s3562_s27   ;;  %s2535_s26 = sphi %s2630_s26, %s3561_s26   ;;  %s2531_s25 = sphi %s2628_s25, %s3560_s25  }
   0x7   : > { %s2653_s14 = sadd.s32 1, %s2543_s28   ;;  %s311_s15 = sadd.s32 1, %s2539_s27 }
   0x8   : > { %s308_s16 = ssub.s32 %s2543_s28, %s2653_s14  ;;  %p321_p0 = scmp.ne.s32.totalorder %s2539_s27, %s2535_s26 }
   0x9   : > { %p309_p1 = scmp.eq.s32.totalorder %s308_s16, 0  ;;  %p322_p2 = scmp.eq.s32.totalorder %s2649_s29, 1 }
   0xa   : > { %p327_p3 = scmp.ne.s32.totalorder %s2535_s26, %s2531_s25  ;;  %p328_p4 = scmp.eq.s32.totalorder %s2148_s30, 1 }
   0xb   : > { %s2664_s17 = scalar_select %p309_p1, %s2539_s27, %s311_s15  }
   0xc   : > { %p2666_p5 = por %p322_p2, %p321_p0  ;;  %p2670_p6 = por %p328_p4, %p327_p3 }
   0xd   : > { %3543 = sst [smem:[#allocation5_spill]] %s2664_s17  ;;  %p2151_p7 = scmp.ge.s32.totalorder %s2543_s28, 1 }
   0xe   : > { %p391_p8 = scmp.lt.s32.totalorder %s2543_s28, 3 }
  0x10   : > { %p392_p9 = pnand %p2151_p7, %p391_p8 }
  0x12   : > { %395 = sbr.rel (%p392_p9) target bundleno = 886 (0x376), region = 72 }
  0x17   : > { %v692_v0 = vld [vmem:[%s3525_s1] sm:$0xff]  ;;  %v693_v1 = vld [vmem:[%s3525_s1 + $0x8] sm:$0xff]  ;;  %v2545_v2 = vmov 5   ;;  %v2546_v3 = vmov 4   ;;  %s3546_s4 = sld [smem:[#allocation10_spill]]  ;;  %v2547_v5 = vmov 0  }
  0x18   : > { %2436 = vset.pattern.permute.xlu1 %v2545_v2  ;;  %2435 = vset.pattern.permute.xlu0 %v2546_v3  ;;  %vm700_vm0 = vcmp.gt.f32.partialorder %v692_v0, 0.0  ;;  %vm701_vm1 = vcmp.gt.f32.partialorder %v693_v1, 0.0  ;;  %v694_v7 = vld [vmem:[%s3525_s1 + $0x10] sm:$0xff]  ;;  %s2153_s22 = sshll.u32 %s2649_s29, 3  ;;  %v695_v9 = vld [vmem:[%s3525_s1 + $0x18] sm:$0xff]  ;;  %v697_v11 = vld [vmem:[%s3525_s1 + $0x28] sm:$0xff] }
  0x19   : > { %v2688_v6 = vsel %vm700_vm0, 1, %v2547_v5  ;;  %p436_p10 = scmp.lt.s32.totalorder %s2153_s22, 15  ;;  %v2703_v10 = vsel %vm701_vm1, 1, %v2547_v5  ;;  %vm702_vm2 = vcmp.gt.f32.partialorder %v694_v7, 0.0  ;;  %vm703_vm3 = vcmp.gt.f32.partialorder %v695_v9, 0.0  ;;  %s3547_s0 = sld [smem:[#allocation9_spill]] }
  0x1a   : > { %1027 = vperm.xlu1 %2436, %v2688_v6   ;;  %987 = vperm.xlu0 %2435, %v2688_v6   ;;  %v2155_v12 = vld [vmem:[%s3526_s2] ss:$0 sm:$0xff]  ;;  %v2714_v13 = vsel %vm702_vm2, 1, %v2547_v5  ;;  %v698_v15 = vld [vmem:[%s3525_s1 + $0x30] sm:$0xff]  ;;  %v2728_v16 = vsel %vm703_vm3, 1, %v2547_v5  ;;  %vm705_vm4 = vcmp.gt.f32.partialorder %v697_v11, 0.0 }
  0x1b   : > { %s3565_s22 = smov (!%p436_p10, %s2153_s22), 15  ;;  %v2156_v14 = vld [vmem:[%s3527_s3] ss:$0 sm:$0xff]  ;;  %vm490_vm5 = vcmask 130048   ;;  %v2742_v30 = vsel %vm705_vm4, 1, %v2547_v5  ;;  %vm706_vm6 = vcmp.gt.f32.partialorder %v698_v15, 0.0 }
  0x1c   : > { %s2154_s16 = sshll.u32 %s3565_s22, 3  ;;  %v696_v34 = vld [vmem:[%s3525_s1 + $0x20] sm:$0xff]  ;;  %v2752_v42 = vsel %vm706_vm6, 1, %v2547_v5  ;;  %v699_v53 = vld [vmem:[%s3525_s1 + $0x38] sm:$0xff]  ;;  %v2548_v54 = vmov 2   ;;  %v2549_v56 = vmov 1  }
  0x1d   : > { %v489_v4 = vld [vmem:[%s3546_s4 + $0x8] sm:$0xff]  ;;  %v488_v8 = vld [vmem:[%s3546_s4] sm:$0xff]  ;;  %vm704_vm7 = vcmp.gt.f32.partialorder %v696_v34, 0.0  ;;  %vm707_vm8 = vcmp.gt.f32.partialorder %v699_v53, 0.0  ;;  %v2550_v57 = vmov 7   ;;  %v2551_v58 = vmov 8  }
  0x1e   : > { %2284 = vmatprep.subr.mxu0 %v489_v4  ;;  %1030 = vperm.xlu1 %2436, %v2703_v10   ;;  %v2759_v48 = vsel %vm704_vm7, 1, %v2547_v5  ;;  %v2780_v55 = vsel %vm707_vm8, 1, %v2547_v5  ;;  %v2552_v59 = vmov 3   ;;  %v2553_v60 = vmov 6   ;;  %s3540_s21 = smov 8   ;;  %s2555_s30 = smov 16  }
  0x1f   : > { %2285 = vmatpush3.msra.mxu0 %v489_v4  ;;  %990 = vperm.xlu0 %2435, %v2703_v10   ;;  %s2719_s4 = scalar_lea.vmem %s3547_s0, %s2154_s16  ;;  %vm660_vm12 = vcmask 1040384   ;;  %vm798_vm13 = vcmask 1046528   ;;  %s432_s23 = sand.u32 1, %s2535_s26  }
  0x20   : > { %2286 = vmatprep.subr.mxu0 %v488_v8  ;;  %v442_v17 = vld [vmem:[%s2719_s4] sm:$0xff]  ;;  %v443_v18 = vld [vmem:[%s2719_s4 + $0x8] sm:$0xff]  ;;  %v444_v19 = vld [vmem:[%s2719_s4 + $0x10] sm:$0xff]  ;;  %s2221_s17 = sshll.u32 %s2649_s29, 10  ;;  %s3483_s29 = scalar_lea.sflag [#allocation3], %s432_s23 }
  0x21   : > { %2287 = vmatpush3.msra.mxu0 %v488_v8  ;;  %v457_v20 = vmul.f32 %v2155_v12, %v442_v17  ;;  %v458_v21 = vmul.f32 %v2155_v12, %v443_v18  ;;  %v459_v22 = vmul.f32 %v2155_v12, %v444_v19  ;;  %v445_v23 = vld [vmem:[%s2719_s4 + $0x18] sm:$0xff]  ;;  %v446_v24 = vld [vmem:[%s2719_s4 + $0x20] sm:$0xff]  ;;  %v447_v25 = vld [vmem:[%s2719_s4 + $0x28] sm:$0xff]  ;;  %s3475_s24 = scalar_lea.hbm %s3537_s13, %s2221_s17 }
  0x22   : > { %2437 = vset.pattern.permute.xlu1 %v2546_v3  ;;  %v460_v26 = vmul.f32 %v2155_v12, %v445_v23  ;;  %v461_v27 = vmul.f32 %v2155_v12, %v446_v24  ;;  %v448_v28 = vld [vmem:[%s2719_s4 + $0x30] sm:$0xff]  ;;  %v462_v35 = vmul.f32 %v2155_v12, %v447_v25  ;;  %v449_v41 = vld [vmem:[%s2719_s4 + $0x38] sm:$0xff] }
  0x23   : > { %993 = vperm.xlu0 %2435, %v2714_v13   ;;  %996 = vperm.xlu1 %2437, %v2728_v16   ;;  %v472_v29 = vadd.f32 %v2156_v14, %v457_v20  ;;  %v473_v31 = vadd.f32 %v2156_v14, %v458_v21  ;;  %v474_v32 = vadd.f32 %v2156_v14, %v459_v22 }
  0x24   : > { %v475_v33 = vadd.f32 %v2156_v14, %v460_v26  ;;  %v463_v36 = vmul.f32 %v2155_v12, %v448_v28  ;;  %v476_v40 = vadd.f32 %v2156_v14, %v461_v27  ;;  %v477_v44 = vadd.f32 %v2156_v14, %v462_v35 }
  0x25   : > { %v480_v37 = vmax.f32 %v472_v29, 0.0  ;;  %v481_v38 = vmax.f32 %v473_v31, 0.0  ;;  %v482_v39 = vmax.f32 %v474_v32, 0.0  ;;  %v464_v45 = vmul.f32 %v2155_v12, %v449_v41 }
  0x26   : > { %v483_v43 = vmax.f32 %v475_v33, 0.0  ;;  %v484_v46 = vmax.f32 %v476_v40, 0.0  ;;  %v478_v47 = vadd.f32 %v2156_v14, %v463_v36  ;;  %v485_v49 = vmax.f32 %v477_v44, 0.0 }
  0x27   : > { %1002 = vperm.xlu0 %2435, %v2742_v30   ;;  %2288 = vmatprep.mubr.msk.f32.mxu0 %vm490_vm5, %v480_v37  ;;  %v479_v50 = vadd.f32 %v2156_v14, %v464_v45  ;;  %v2933_v37 = vld [vmem:[%s3530_s6] ss:$0 sm:$0xff]  ;;  %v2169_v45 = vld [vmem:[%s3531_s7 + $0x28] sm:$0xff] }
  0x28   : > { %2438 = vset.pattern.permute.xlu1 %v2545_v2  ;;  %2289 = vmatmul.mubr.msk.f32.vlgmr.msra.gmra.mxu0 %vm490_vm5, %v481_v38  ;;  %v486_v51 = vmax.f32 %v478_v47, 0.0 }
  0x29   : > { %1036 = vperm.xlu1 %2438, %v2728_v16   ;;  %2291 = vmatprep.mubr.msk.f32.mxu0 %vm490_vm5, %v482_v39  ;;  %v487_v52 = vmax.f32 %v479_v50, 0.0 }
  0x2a   : > { %2300 = vmatprep.subr.mxu1 %v2169_v45 }
  0x2b   : > { %1005 = vperm.xlu0 %2435, %v2752_v42   ;;  %2301 = vmatpush3.msra.mxu1 %v2169_v45 }
  0x2c   : > { %2292 = vmatmul.mubr.msk.f32.gmra.mxu0 %vm490_vm5, %v483_v43 }
  0x2d   : > { %2439 = vset.pattern.permute.xlu1 %v2546_v3  ;;  %2294 = vmatprep.mubr.msk.f32.mxu0 %vm490_vm5, %v484_v46 }
  0x2e   : > { %999 = vperm.xlu1 %2439, %v2759_v48  }
  0x2f   : > { %2441 = vset.pattern.permute.xlu0 %v2545_v2 }
  0x30   : > { %1033 = vperm.xlu0 %2441, %v2714_v13   ;;  %2295 = vmatmul.mubr.msk.f32.gmra.mxu0 %vm490_vm5, %v485_v49 }
  0x31   : > { %2297 = vmatprep.mubr.msk.f32.mxu0 %vm490_vm5, %v486_v51 }
  0x32   : > { %2440 = vset.pattern.permute.xlu1 %v2545_v2 }
  0x33   : > { %1039 = vperm.xlu1 %2440, %v2759_v48  }
  0x34   : > { %1045 = vperm.xlu0 %2441, %v2752_v42   ;;  %2298 = vmatmul.mubr.msk.f32.gmra.mxu0 %vm490_vm5, %v487_v52 }
  0x37   : > { %1042 = vperm.xlu1 %2440, %v2742_v30  }
  0x38   : > { %2449 = vset.pattern.permute.xlu0 %v2548_v54 }
  0x39   : > { %829 = vperm.xlu0 %2449, %v2714_v13  }
  0x3b   : > { %2442 = vset.pattern.permute.xlu1 %v2546_v3 }
  0x3c   : > { %1008 = vperm.xlu1 %2442, %v2780_v55  }
  0x3d   : > { %838 = vperm.xlu0 %2449, %v2742_v30  }
  0x40   : > { %2443 = vset.pattern.permute.xlu1 %v2549_v56 }
  0x41   : > { %757 = vperm.xlu1 %2443, %v2688_v6   ;;  %2455 = vset.pattern.permute.xlu0 %v2549_v56 }
  0x42   : > { %760 = vperm.xlu0 %2455, %v2703_v10  }
  0x45   : > { %2444 = vset.pattern.permute.xlu1 %v2545_v2 }
  0x46   : > { %1048 = vperm.xlu1 %2444, %v2780_v55   ;;  %763 = vperm.xlu0 %2455, %v2714_v13  }
  0x4a   : > { %2445 = vset.pattern.permute.xlu1 %v2548_v54  ;;  %778 = vperm.xlu0 %2455, %v2780_v55  }
  0x4b   : > { %823 = vperm.xlu1 %2445, %v2688_v6  }
  0x4e   : > { %2459 = vset.pattern.permute.xlu0 %v2550_v57 }
  0x4f   : > { %826 = vperm.xlu1 %2445, %v2703_v10   ;;  %1450 = vperm.xlu0 %2459, %v2688_v6  }
  0x53   : > { %2446 = vset.pattern.permute.xlu1 %v2550_v57  ;;  %1459 = vperm.xlu0 %2459, %v2728_v16  }
  0x54   : > { %1453 = vperm.xlu1 %2446, %v2703_v10  }
  0x57   : > { %1468 = vperm.xlu0 %2459, %v2752_v42  }
  0x58   : > { %2447 = vset.pattern.permute.xlu1 %v2551_v58 }
  0x59   : > { %1490 = vperm.xlu1 %2447, %v2688_v6  }
  0x5b   : > { %2461 = vset.pattern.permute.xlu0 %v2551_v58 }
  0x5c   : > { %1499 = vperm.xlu0 %2461, %v2728_v16  }
  0x5d   : > { %1493 = vperm.xlu1 %2447, %v2703_v10  }
  0x60   : > { %1502 = vperm.xlu0 %2461, %v2759_v48  }
  0x61   : > { %2448 = vset.pattern.permute.xlu1 %v2549_v56 }
  0x62   : > { %766 = vperm.xlu1 %2448, %v2728_v16  }
  0x64   : > { %1511 = vperm.xlu0 %2461, %v2780_v55  }
  0x66   : > { %2450 = vset.pattern.permute.xlu1 %v2548_v54 }
  0x67   : > { %832 = vperm.xlu1 %2450, %v2728_v16  }
  0x68   : > { %2465 = vset.pattern.permute.xlu0 %v2552_v59 }
  0x69   : > { %953 = vperm.xlu0 %2465, %v2714_v13  }
  0x6b   : > { %2451 = vset.pattern.permute.xlu1 %v2550_v57 }
  0x6c   : > { %1456 = vperm.xlu1 %2451, %v2714_v13  }
  0x6d   : > { %959 = vperm.xlu0 %2465, %v2759_v48  }
  0x70   : > { %2452 = vset.pattern.permute.xlu1 %v2551_v58 }
  0x71   : > { %1496 = vperm.xlu1 %2452, %v2714_v13   ;;  %965 = vperm.xlu0 %2465, %v2752_v42  }
  0x75   : > { %2453 = vset.pattern.permute.xlu1 %v2549_v56  ;;  %2470 = vset.pattern.permute.xlu0 %v2553_v60 }
  0x76   : > { %769 = vperm.xlu1 %2453, %v2759_v48   ;;  %1419 = vperm.xlu0 %2470, %v2728_v16  }
  0x7a   : > { %772 = vperm.xlu1 %2453, %v2742_v30   ;;  %1422 = vperm.xlu0 %2470, %v2759_v48  }
  0x7e   : > { %2454 = vset.pattern.permute.xlu1 %v2548_v54  ;;  %1425 = vperm.xlu0 %2470, %v2742_v30  }
  0x7f   : > { %835 = vperm.xlu1 %2454, %v2759_v48  }
  0x82   : > { %2472 = vset.pattern.permute.xlu0 %v2547_v5 }
  0x83   : > { %2456 = vset.pattern.permute.xlu1 %v2550_v57  ;;  %720 = vperm.xlu0 %2472, %v2703_v10  }
  0x84   : > { %1462 = vperm.xlu1 %2456, %v2759_v48  }
  0x87   : > { %723 = vperm.xlu0 %2472, %v2714_v13  }
  0x88   : > { %1465 = vperm.xlu1 %2456, %v2742_v30  }
  0x8b   : > { %735 = vperm.xlu0 %2472, %v2752_v42  }
  0x8c   : > { %2457 = vset.pattern.permute.xlu1 %v2549_v56  ;;  %v2168_v56 = vld [vmem:[%s3531_s7 + $0x20] sm:$0xff] }
  0x8d   : > { %775 = vperm.xlu1 %2457, %v2752_v42   ;;  %2302 = vmatprep.subr.mxu1 %v2168_v56 }
  0x8e   : > { %2303 = vmatpush3.msra.mxu1 %v2168_v56 }
  0x8f   : > { %738 = vperm.xlu0 %2472, %v2780_v55  }
  0x91   : > { %2458 = vset.pattern.permute.xlu1 %v2551_v58 }
  0x92   : > { %1505 = vperm.xlu1 %2458, %v2742_v30  }
  0x93   : > { %2474 = vset.pattern.permute.xlu0 %v2551_v58 }
  0x95   : > { %v2829_v61 = vpop.permute.xlu0 %987  ;;  %v2831_v62 = vpop.permute.xlu1 %1027 }
  0x96   : > { %2460 = vset.pattern.permute.xlu1 %v2548_v54  ;;  %vm1050_vm15 = vcmp.eq.s32.totalorder %v2831_v62, 1  ;;  %vm1010_vm2 = vcmp.eq.s32.totalorder %v2829_v61, 1 }
  0x97   : > { %841 = vperm.xlu1 %2460, %v2752_v42  }
  0x99   : > { %v2837_v0 = vpop.permute.xlu1 %1030 }
  0x9a   : > { %v2834_v63 = vpop.permute.xlu0 %990  ;;  %vm1051_vm7 = vcmp.eq.s32.totalorder %v2837_v0, 1 }
  0x9b   : > { %844 = vperm.xlu1 %2460, %v2780_v55   ;;  %vm1011_vm9 = vcmp.eq.s32.totalorder %v2834_v63, 1 }
  0x9e   : > { %v2839_v1 = vpop.permute.xlu0 %993  ;;  %v2841_v2 = vpop.permute.xlu1 %996 }
  0x9f   : > { %2462 = vset.pattern.permute.xlu1 %v2550_v57  ;;  %vm1013_vm8 = vcmp.eq.s32.totalorder %v2841_v2, 1 }
  0xa0   : > { %1471 = vperm.xlu1 %2462, %v2780_v55  }
  0xa2   : > { %v2844_v3 = vpop.permute.xlu0 %1002 }
  0xa4   : > { %2463 = vset.pattern.permute.xlu1 %v2551_v58  ;;  %v2846_v4 = vpop.permute.xlu1 %1036 }
  0xa5   : > { %1508 = vperm.xlu1 %2463, %v2752_v42  }
  0xa6   : > { %v2849_v7 = vpop.permute.xlu0 %1005 }
  0xa9   : > { %2464 = vset.pattern.permute.xlu1 %v2552_v59  ;;  %v2851_v8 = vpop.permute.xlu1 %999 }
  0xaa   : > { %947 = vperm.xlu1 %2464, %v2688_v6  }
  0xab   : > { %v2854_v9 = vpop.permute.xlu0 %1033 }
  0xae   : > { %950 = vperm.xlu1 %2464, %v2703_v10   ;;  %v2857_v11 = vpop.permute.xlu1 %1039 }
  0xaf   : > { %v2859_v12 = vpop.permute.xlu0 %1045 }
  0xb2   : > { %956 = vperm.xlu1 %2464, %v2728_v16   ;;  %v2862_v14 = vpop.permute.xlu1 %1042 }
  0xb4   : > { %v2864_v15 = vpop.permute.xlu0 %829 }
  0xb6   : > { %962 = vperm.xlu1 %2464, %v2742_v30  }
  0xb7   : > { %v2867_v17 = vpop.permute.xlu1 %1008 }
  0xb8   : > { %v2869_v18 = vpop.permute.xlu0 %838 }
  0xba   : > { %968 = vperm.xlu1 %2464, %v2780_v55  }
  0xbc   : > { %v2872_v19 = vpop.permute.xlu1 %757 }
  0xbd   : > { %v2874_v20 = vpop.permute.xlu0 %760 }
  0xbe   : > { %2466 = vset.pattern.permute.xlu1 %v2547_v5  ;;  %vm781_vm6 = vcmp.eq.s32.totalorder %v2874_v20, 1 }
  0xbf   : > { %717 = vperm.xlu1 %2466, %v2688_v6  }
  0xc1   : > { %v2878_v21 = vpop.permute.xlu0 %763  ;;  %v2880_v22 = vpop.permute.xlu1 %1048 }
  0xc2   : > { %vm782_vm14 = vcmp.eq.s32.totalorder %v2878_v21, 1 }
  0xc3   : > { %2467 = vset.pattern.permute.xlu1 %v2553_v60 }
  0xc4   : > { %1410 = vperm.xlu1 %2467, %v2688_v6  }
  0xc5   : > { %v2884_v23 = vpop.permute.xlu0 %778 }
  0xc6   : > { %v2886_v24 = vpop.permute.xlu1 %823 }
  0xc8   : > { %1413 = vperm.xlu1 %2467, %v2703_v10  }
  0xca   : > { %v2889_v25 = vpop.permute.xlu0 %1450  ;;  %v2891_v26 = vpop.permute.xlu1 %826 }
  0xcb   : > { %vm1473_vm10 = vcmp.eq.s32.totalorder %v2889_v25, 1  ;;  %vm847_vm3 = vcmp.eq.s32.totalorder %v2891_v26, 1 }
  0xcc   : > { %2468 = vset.pattern.permute.xlu1 %v2547_v5 }
  0xcd   : > { %726 = vperm.xlu1 %2468, %v2728_v16  }
  0xce   : > { %v2895_v27 = vpop.permute.xlu0 %1459 }
  0xcf   : > { %v2897_v28 = vpop.permute.xlu1 %1453 }
  0xd1   : > { %2469 = vset.pattern.permute.xlu1 %v2553_v60 }
  0xd2   : > { %1416 = vperm.xlu1 %2469, %v2714_v13   ;;  %v2901_v6 = vpop.permute.xlu0 %1468 }
  0xd4   : > { %v2903_v29 = vpop.permute.xlu1 %1490 }
  0xd6   : > { %2471 = vset.pattern.permute.xlu1 %v2547_v5  ;;  %v2926_v5 = vld [vmem:[%s3529_s5] ss:$0 sm:$0xff] }
  0xd7   : > { %729 = vperm.xlu1 %2471, %v2759_v48   ;;  %v2907_v10 = vpop.permute.xlu0 %1499 }
  0xd8   : > { %v2909_v31 = vpop.permute.xlu1 %1493 }
  0xdb   : > { %732 = vperm.xlu1 %2471, %v2742_v30   ;;  %v2912_v16 = vpop.permute.xlu0 %1502 }
  0xdd   : > { %v2914_v32 = vpop.permute.xlu1 %766 }
  0xdf   : > { %v2916_v33 = vpop.permute.xlu0 %1511  ;;  %2473 = vset.pattern.permute.xlu1 %v2553_v60 }
  0xe2   : > { %v2919_v13 = vpop.permute.xlu1 %832 }
  0xe4   : > { %v2921_v34 = vpop.permute.xlu0 %953 }
  0xe7   : > { %v1457_v35 = vpop.permute.xlu1 %1456 }
  0xe8   : > { %v2928_v36 = vpop.permute.xlu0 %959  ;;  %v2290_v30 = vpop.f32.mrf.mxu0  ;;  %vm1475_vm11 = vcmp.eq.s32.totalorder %v1457_v35, 1 }
  0xe9   : > { %v628_v38 = vmul.f32 %v2290_v30, %v2926_v5 }
  0xea   : > { %v581_v39 = vpop.f32.mrf.mxu0 }
  0xeb   : > { %v643_v40 = vadd.f32 %v2933_v37, %v628_v38  ;;  %v627_v41 = vmul.f32 %v2926_v5, %v581_v39  ;;  %v2167_v38 = vld [vmem:[%s3531_s7 + $0x18] sm:$0xff] }
  0xec   : > { %v2938_v43 = vpop.permute.xlu0 %965  ;;  %v2940_v44 = vpop.permute.xlu1 %1496  ;;  %2304 = vmatprep.subr.mxu1 %v2167_v38 }
  0xed   : > { %v2293_v46 = vpop.f32.mrf.mxu0  ;;  %v2945_v47 = vmax.f32 %v643_v40, 0.0  ;;  %v642_v48 = vadd.f32 %v2933_v37, %v627_v41  ;;  %2305 = vmatpush3.msra.mxu1 %v2167_v38 }
  0xee   : > { %v630_v49 = vmul.f32 %v2293_v46, %v2926_v5 }
  0xef   : > { %v591_v50 = vpop.f32.mrf.mxu0  ;;  %v2950_v51 = vmax.f32 %v642_v48, 0.0  ;;  %v1019_v54 = vsel %vm1011_vm9, %v2945_v47, 0.0  ;;  %v1481_v46 = vsel %vm1473_vm10, %v2945_v47, 0.0  ;;  %v800_v48 = vrot.slane %v2945_v47, 1 }
  0xf0   : > { %v645_v52 = vadd.f32 %v2933_v37, %v630_v49  ;;  %v629_v53 = vmul.f32 %v2926_v5, %v591_v50  ;;  %1076 = vrot.lane.b32.xlu1 %v1019_v54, %s3540_s21  ;;  %vm1052_vm9 = vcmp.eq.s32.totalorder %v2854_v9, 1  ;;  %vm1012_vm10 = vcmp.eq.s32.totalorder %v2839_v1, 1 }
  0xf1   : > { %v2296_v57 = vpop.f32.mrf.mxu0  ;;  %v1420_v58 = vpop.permute.xlu0 %1419  ;;  %v3538_v40 = vrot.slane %v2950_v51, 1  ;;  %v672_v54 = vrot.slane %v2950_v51, 7 }
  0xf2   : > { %v2960_v59 = vmax.f32 %v645_v52, 0.0  ;;  %v644_v60 = vadd.f32 %v2933_v37, %v629_v53  ;;  %v632_v63 = vmul.f32 %v2296_v57, %v2926_v5  ;;  %v2964_v30 = vpop.permute.xlu1 %769  ;;  %vm1436_vm0 = vcmp.eq.s32.totalorder %v1420_v58, 1 }
  0xf3   : > { %v601_v39 = vpop.f32.mrf.mxu0 }
  0xf4   : > { %v647_v41 = vadd.f32 %v2933_v37, %v632_v63  ;;  %v631_v45 = vmul.f32 %v2926_v5, %v601_v39  ;;  %v2977_v49 = vmax.f32 %v644_v60, 0.0  ;;  %1537 = vrot.lane.b32.xlu1 %v1481_v46, %s3540_s21  ;;  %v1483_v50 = vsel %vm1475_vm11, %v2960_v59, 0.0 }
  0xf5   : > { %v2299_v52 = vpop.f32.mrf.mxu0  ;;  %v1423_v53 = vpop.permute.xlu0 %1422  ;;  %1541 = vrot.lane.b32.xlu0 %v1483_v50, %s3540_s21  ;;  %v2991_v60 = vsel %vm798_vm13, %v3538_v40, %v800_v48  ;;  %v790_v39 = vsel %vm782_vm14, %v2945_v47, 0.0  ;;  %vm1513_vm14 = vcmp.eq.s32.totalorder %v2903_v29, 1 }
  0xf6   : > { %v2983_v56 = vmax.f32 %v647_v41, 0.0  ;;  %v646_v25 = vadd.f32 %v2933_v37, %v631_v45  ;;  %v634_v57 = vmul.f32 %v2299_v52, %v2926_v5  ;;  %v2993_v63 = vpop.permute.xlu1 %772  ;;  %v3539_v41 = vrot.slane %v2945_v47, 7 }
  0xf7   : > { %v611_v38 = vpop.f32.mrf.mxu0  ;;  %vm1437_vm1 = vcmp.eq.s32.totalorder %v1423_v53, 1  ;;  %v1058_v62 = vsel %vm1050_vm15, %v2991_v60, 0.0  ;;  %v855_v26 = vsel %vm847_vm3, %v2991_v60, 0.0  ;;  %v1020_v2 = vsel %vm1012_vm10, %v2977_v49, 0.0 }
  0xf8   : > { %v3001_v45 = vmax.f32 %v646_v25, 0.0  ;;  %v649_v46 = vadd.f32 %v2933_v37, %v634_v57  ;;  %v633_v50 = vmul.f32 %v2926_v5, %v611_v38  ;;  %v681_v52 = vrot.slane %v2983_v56, 7  ;;  %874 = vrot.lane.b32.xlu1 %v790_v39, %s3540_s21 }
  0xf9   : > { %v1426_v40 = vpop.permute.xlu0 %1425  ;;  %v3011_v21 = vsel %vm660_vm12, %v672_v54, %v3539_v41  ;;  %1106 = vrot.lane.b32.xlu0 %v1058_v62, %s2555_s30  ;;  %v802_v38 = vrot.slane %v2977_v49, 1  ;;  %v3548_v39 = vrot.slane %v2960_v59, 7  ;;  %vm976_vm15 = vcmp.eq.s32.totalorder %v2938_v43, 1 }
  0xfa   : > { %v679_v25 = vrot.slane %v3001_v45, 7  ;;  %v3014_v35 = vmax.f32 %v649_v46, 0.0  ;;  %v648_v5 = vadd.f32 %v2933_v37, %v633_v50  ;;  %v3018_v57 = vpop.permute.xlu1 %835  ;;  %v1018_v50 = vsel %vm1010_vm2, %v2950_v51, 0.0 }
  0xfb   : > { %vm1438_vm4 = vcmp.eq.s32.totalorder %v1426_v40, 1  ;;  %v789_v40 = vsel %vm781_vm6, %v2950_v51, 0.0  ;;  %v806_v29 = vrot.slane %v3001_v45, 1  ;;  %v3553_v43 = vrot.slane %v2945_v47, 7  ;;  %v945_v47 = vld [vmem:[%s3531_s7 + $0x10] sm:$0xff] }
  0xfc   : > { %v3026_v41 = vsel %vm660_vm12, %v3548_v39, %v679_v25  ;;  %v3028_v46 = vmax.f32 %v648_v5, 0.0  ;;  %v3031_v37 = vsel %vm660_vm12, %v679_v25, %v681_v52  ;;  %1074 = vrot.lane.b32.xlu1 %v1018_v50, %s3540_s21  ;;  %v662_v5 = vrot.slane %v3014_v35, 7  ;;  %2318 = vmatprep.subr.mxu0 %v945_v47 }
  0xfd   : > { %v3036_v62 = vsel %vm1436_vm0, %v3026_v41, 0.0  ;;  %v3040_v61 = vsel %vm1437_vm1, %v3031_v37, 0.0  ;;  %v804_v39 = vrot.slane %v2960_v59, 1  ;;  %904 = vrot.lane.b32.xlu0 %v855_v26, %s2555_s30  ;;  %vm974_vm0 = vcmp.eq.s32.totalorder %v2928_v36, 1  ;;  %2319 = vmatpush3.msra.mxu0 %v945_v47 }
  0xfe   : > { %3549 = vst [vmem:[#allocation6_spill] sm:$0xff] %v3036_v62  ;;  %3550 = vst [vmem:[#allocation7_spill] sm:$0xff] %v3040_v61  ;;  %v661_v25 = vrot.slane %v3028_v46, 7  ;;  %v3048_v58 = vpop.permute.xlu0 %720  ;;  %v3051_v62 = vsel %vm798_vm13, %v800_v48, %v802_v38  ;;  %v3055_v53 = vsel %vm660_vm12, %v662_v5, %v672_v54  ;;  %vm1474_vm1 = vcmp.eq.s32.totalorder %v2897_v28, 1  ;;  %v944_v28 = vld [vmem:[%s3531_s7 + $0x8] sm:$0xff] }
  0xff   : > { %v3057_v50 = vpop.permute.xlu1 %1462  ;;  %v1059_v48 = vsel %vm1051_vm7, %v3051_v62, 0.0  ;;  %v3073_v54 = vsel %vm798_vm13, %v802_v38, %v804_v39  ;;  %vm780_vm2 = vcmp.eq.s32.totalorder %v2872_v19, 1  ;;  %v1482_v36 = vsel %vm1474_vm1, %v2977_v49, 0.0  ;;  %2320 = vmatprep.subr.mxu0 %v944_v28 }
 0x100   : > { %v3061_v61 = vsel %vm660_vm12, %v681_v52, %v661_v25  ;;  %872 = vrot.lane.b32.xlu1 %v789_v40, %s3540_s21  ;;  %v1021_v52 = vsel %vm1013_vm8, %v2960_v59, 0.0  ;;  %v1060_v40 = vsel %vm1052_vm9, %v3073_v54, 0.0  ;;  %v3096_v1 = vsel %vm660_vm12, %v661_v25, %v662_v5  ;;  %2321 = vmatpush3.msra.mxu0 %v944_v28 }
 0x101   : > { %v3065_v26 = vsel %vm1438_vm4, %v3061_v61, 0.0  ;;  %1108 = vrot.lane.b32.xlu0 %v1059_v48, %s2555_s30  ;;  %v3115_v5 = vsel %vm976_vm15, %v3061_v61, 0.0  ;;  %v788_v25 = vsel %vm780_vm2, %v3014_v35, 0.0  ;;  %v3128_v19 = vsel %vm974_vm0, %v3026_v41, 0.0 }
 0x102   : > { %3551 = vst [vmem:[#allocation8_spill] sm:$0xff] %v3065_v26  ;;  %v3070_v20 = vpop.permute.xlu0 %723  ;;  %v675_v26 = vrot.slane %v2977_v49, 7  ;;  %vm1053_vm3 = vcmp.eq.s32.totalorder %v2846_v4, 1  ;;  %vm1015_vm4 = vcmp.eq.s32.totalorder %v2844_v3, 1  ;;  %vm1054_vm6 = vcmp.eq.s32.totalorder %v2857_v11, 1 }
 0x103   : > { %v3076_v0 = vpop.permute.xlu1 %1465  ;;  %v1023_v4 = vsel %vm1015_vm4, %v2983_v56, 0.0  ;;  %v796_v47 = vrot.slane %v3014_v35, 1  ;;  %vm1514_vm7 = vcmp.eq.s32.totalorder %v2909_v31, 1  ;;  %vm1016_vm8 = vcmp.eq.s32.totalorder %v2849_v7, 1 }
 0x104   : > { %1080 = vrot.lane.b32.xlu1 %v1021_v52, %s3540_s21  ;;  %v1521_v52 = vsel %vm1513_vm14, %v3051_v62, 0.0  ;;  %v1522_v3 = vsel %vm1514_vm7, %v3073_v54, 0.0  ;;  %v1024_v11 = vsel %vm1016_vm8, %v3028_v46, 0.0  ;;  %vm848_vm9 = vcmp.eq.s32.totalorder %v2864_v15, 1 }
 0x105   : > { %1110 = vrot.lane.b32.xlu0 %v1060_v40, %s2555_s30  ;;  %v3552_v40 = vrot.slane %v2960_v59, 7  ;;  %vm846_vm10 = vcmp.eq.s32.totalorder %v2886_v24, 1  ;;  %v856_v7 = vsel %vm848_vm9, %v3051_v62, 0.0  ;;  %vm1055_vm14 = vcmp.eq.s32.totalorder %v2862_v14, 1 }
 0x106   : > { %v736_v48 = vpop.permute.xlu0 %735  ;;  %vm1014_vm15 = vcmp.eq.s32.totalorder %v2851_v8, 1  ;;  %vm1056_vm0 = vcmp.eq.s32.totalorder %v2859_v12, 1  ;;  %vm1017_vm1 = vcmp.eq.s32.totalorder %v2867_v17, 1  ;;  %vm784_vm2 = vcmp.eq.s32.totalorder %v2964_v30, 1 }
 0x107   : > { %vm746_vm11 = vcmp.eq.s32.totalorder %v736_v48, 1  ;;  %v3104_v48 = vsel %vm660_vm12, %v675_v26, %v3552_v40  ;;  %v808_v40 = vrot.slane %v2983_v56, 1  ;;  %v792_v17 = vsel %vm784_vm2, %v2960_v59, 0.0 }
 0x108   : > { %v3086_v38 = vpop.permute.xlu1 %775  ;;  %v3089_v9 = vsel %vm746_vm11, %v3031_v37, 0.0  ;;  %1078 = vrot.lane.b32.xlu1 %v1020_v2, %s3540_s21  ;;  %v3109_v2 = vsel %vm660_vm12, %v3553_v43, %v675_v26  ;;  %v3131_v26 = vsel %vm798_vm13, %v804_v39, %v806_v29  ;;  %vm783_vm12 = vcmp.eq.s32.totalorder %v2914_v32, 1  ;;  %v943_v39 = vld [vmem:[%s3531_s7] sm:$0xff] }
 0x109   : > { %1569 = vrot.lane.b32.xlu0 %v1521_v52, %s2555_s30  ;;  %v791_v43 = vsel %vm783_vm12, %v2977_v49, 0.0  ;;  %v3147_v32 = vsel %vm798_vm13, %v806_v29, %v808_v40  ;;  %2322 = vmatprep.subr.mxu0 %v943_v39  ;;  %v810_v29 = vrot.slane %v3028_v46, 1  ;;  %vm849_vm11 = vcmp.eq.s32.totalorder %v2919_v13, 1 }
 0x10a   : > { %2323 = vmatpush3.msra.mxu0 %v943_v39  ;;  %v1062_v49 = vsel %vm1054_vm6, %v3147_v32, 0.0  ;;  %v857_v15 = vsel %vm849_vm11, %v3073_v54, 0.0  ;;  %v1022_v13 = vsel %vm1014_vm15, %v3001_v45, 0.0  ;;  %vm1057_vm12 = vcmp.eq.s32.totalorder %v2880_v22, 1 }
 0x10b   : > { %vm1515_vm6 = vcmp.eq.s32.totalorder %v2940_v44, 1  ;;  %vm850_vm7 = vcmp.eq.s32.totalorder %v3018_v57, 1  ;;  %vm1477_vm9 = vcmp.eq.s32.totalorder %v3057_v50, 1  ;;  %vm785_vm11 = vcmp.eq.s32.totalorder %v2993_v63, 1 }
 0x10c   : > { %1539 = vrot.lane.b32.xlu1 %v1482_v36, %s3540_s21  ;;  %v1061_v36 = vsel %vm1053_vm3, %v3131_v26, 0.0  ;;  %vm1516_vm3 = vcmp.eq.s32.totalorder %v2907_v10, 1  ;;  %v1523_v59 = vsel %vm1515_vm6, %v3131_v26, 0.0  ;;  %v1485_v57 = vsel %vm1477_vm9, %v2983_v56, 0.0 }
 0x10d   : > { %v3119_v52 = vpop.permute.xlu1 %1505  ;;  %870 = vrot.lane.b32.xlu0 %v788_v25, %s3540_s21  ;;  %v1524_v22 = vsel %vm1516_vm3, %v3147_v32, 0.0  ;;  %v793_v50 = vsel %vm785_vm11, %v3001_v45, 0.0  ;;  %vm1478_vm2 = vcmp.eq.s32.totalorder %v3076_v0, 1  ;;  %vm1479_vm6 = vcmp.eq.s32.totalorder %v2901_v6, 1 }
 0x110   : > { %876 = vrot.lane.b32.xlu1 %v791_v43, %s3540_s21  ;;  %v3554_v43 = vrot.slane %v2950_v51, 1 }
 0x111   : > { %1112 = vrot.lane.b32.xlu0 %v1061_v36, %s2555_s30 }
 0x112   : > { %v3144_v25 = vpop.permute.xlu1 %841  ;;  %v3168_v36 = vsel %vm798_vm13, %v796_v47, %v3554_v43 }
 0x113   : > { %v854_v39 = vsel %vm846_vm10, %v3168_v36, 0.0 }
 0x114   : > { %1084 = vrot.lane.b32.xlu1 %v1023_v4, %s3540_s21  ;;  %v3180_v4 = vld [vmem:[%s3531_s7 + $0x40] sm:$0xff] }
 0x115   : > { %1114 = vrot.lane.b32.xlu0 %v1062_v49, %s2555_s30  ;;  %v3183_v49 = vsel %vm798_vm13, %v808_v40, %v810_v29  ;;  %2336 = vmatprep.subr.mxu1 %v3180_v4  ;;  %v1025_v40 = vsel %vm1017_vm1, %v3014_v35, 0.0  ;;  %vm851_vm1 = vcmp.eq.s32.totalorder %v2869_v18, 1  ;;  %v1486_v18 = vsel %vm1478_vm2, %v3028_v46, 0.0 }
 0x116   : > { %v3156_v28 = vpop.permute.xlu1 %844  ;;  %v1063_v62 = vsel %vm1055_vm14, %v3183_v49, 0.0  ;;  %vm1517_vm14 = vcmp.eq.s32.totalorder %v2912_v16, 1  ;;  %v859_v16 = vsel %vm851_vm1, %v3147_v32, 0.0  ;;  %vm926_vm1 = vcmask 64512  }
 0x117   : > { %v1525_v43 = vsel %vm1517_vm14, %v3183_v49, 0.0  ;;  %vm853_vm9 = vcmp.eq.s32.totalorder %v3156_v28, 1  ;;  %vm1150_vm2 = vcmask 195584  }
 0x118   : > { %1571 = vrot.lane.b32.xlu1 %v1522_v3, %s2555_s30  ;;  %v3195_v3 = vsel %vm798_vm13, %v810_v29, %v796_v47  ;;  %vm1476_vm13 = vcmp.eq.s32.totalorder %v2895_v27, 1  ;;  %v1065_v47 = vsel %vm1057_vm12, %v3168_v36, 0.0  ;;  %v858_v29 = vsel %vm850_vm7, %v3131_v26, 0.0 }
 0x119   : > { %1086 = vrot.lane.b32.xlu0 %v1024_v11, %s3540_s21  ;;  %v1064_v14 = vsel %vm1056_vm0, %v3195_v3, 0.0  ;;  %v1484_v8 = vsel %vm1476_vm13, %v3001_v45, 0.0  ;;  %vm1518_vm0 = vcmp.eq.s32.totalorder %v3119_v52, 1  ;;  %vm852_vm12 = vcmp.eq.s32.totalorder %v3144_v25, 1 }
 0x11a   : > { %v1526_v63 = vsel %vm1518_vm0, %v3195_v3, 0.0  ;;  %v860_v32 = vsel %vm852_vm12, %v3183_v49, 0.0  ;;  %v861_v49 = vsel %vm853_vm9, %v3195_v3, 0.0 }
 0x11b   : > { %v3171_v31 = vpop.permute.xlu1 %1471 }
 0x11c   : > { %906 = vrot.lane.b32.xlu1 %v856_v7, %s2555_s30  ;;  %vm1480_vm11 = vcmp.eq.s32.totalorder %v3171_v31, 1 }
 0x11d   : > { %902 = vrot.lane.b32.xlu0 %v854_v39, %s2555_s30  ;;  %v1487_v39 = vsel %vm1479_vm6, %v3014_v35, 0.0  ;;  %vm742_vm6 = vcmp.eq.s32.totalorder %v3070_v20, 1 }
 0x120   : > { %v3190_v24 = vpop.permute.xlu1 %1508  ;;  %908 = vrot.lane.b32.xlu1 %v857_v15, %s2555_s30 }
 0x121   : > { %1116 = vrot.lane.b32.xlu0 %v1063_v62, %s2555_s30  ;;  %vm1519_vm7 = vcmp.eq.s32.totalorder %v3190_v24, 1  ;;  %v3300_v62 = vpop.permute.xlu0 %738 }
 0x122   : > { %v1527_v6 = vsel %vm1519_vm7, %v3168_v36, 0.0  ;;  %vm747_vm9 = vcmp.eq.s32.totalorder %v3300_v62, 1 }
 0x124   : > { %1082 = vrot.lane.b32.xlu1 %v1022_v13, %s3540_s21 }
 0x125   : > { %v3203_v54 = vpop.permute.xlu1 %947  ;;  %1118 = vrot.lane.b32.xlu0 %v1064_v14, %s2555_s30 }
 0x128   : > { %1088 = vrot.lane.b32.xlu1 %v1025_v40, %s3540_s21 }
 0x129   : > { %v3211_v12 = vpop.permute.xlu1 %950  ;;  %1543 = vrot.lane.b32.xlu0 %v1484_v8, %s3540_s21 }
 0x12a   : > { %vm971_vm12 = vcmp.eq.s32.totalorder %v3211_v12, 1 }
 0x12c   : > { %1120 = vrot.lane.b32.xlu1 %v1065_v47, %s2555_s30  ;;  %v979_v47 = vsel %vm971_vm12, %v3011_v21, 0.0 }
 0x12d   : > { %v957_v27 = vpop.permute.xlu1 %956  ;;  %878 = vrot.lane.b32.xlu0 %v792_v17, %s3540_s21 }
 0x12e   : > { %vm973_vm4 = vcmp.eq.s32.totalorder %v957_v27, 1 }
 0x12f   : > { %v3222_v11 = vsel %vm973_vm4, %v3104_v48, 0.0  ;;  %vm786_vm4 = vcmp.eq.s32.totalorder %v3086_v38, 1 }
 0x130   : > { %1428 = vperm.xlu1 %2473, %v2752_v42   ;;  %v794_v25 = vsel %vm786_vm4, %v2983_v56, 0.0  ;;  %vm741_vm4 = vcmp.eq.s32.totalorder %v3048_v58, 1 }
 0x131   : > { %v963_v30 = vpop.permute.xlu1 %962  ;;  %1575 = vrot.lane.b32.xlu0 %v1524_v22, %s2555_s30 }
 0x132   : > { %vm975_vm8 = vcmp.eq.s32.totalorder %v963_v30, 1  ;;  %v2187_v30 = vld [vmem:[%s3531_s7 + $0x38] sm:$0xff] }
 0x133   : > { %v3230_v10 = vsel %vm975_vm8, %v3031_v37, 0.0  ;;  %vm787_vm8 = vcmp.eq.s32.totalorder %v2884_v23, 1 }
 0x134   : > { %1573 = vrot.lane.b32.xlu1 %v1523_v59, %s2555_s30  ;;  %v795_v38 = vsel %vm787_vm8, %v3028_v46, 0.0  ;;  %v1488_v46 = vsel %vm1480_vm11, %v2950_v51, 0.0  ;;  %v2186_v59 = vld [vmem:[%s3531_s7 + $0x30] sm:$0xff] }
 0x135   : > { %v969_v44 = vpop.permute.xlu1 %968  ;;  %910 = vrot.lane.b32.xlu0 %v858_v29, %s2555_s30 }
 0x136   : > { %vm977_vm10 = vcmp.eq.s32.totalorder %v969_v44, 1 }
 0x137   : > { %v3238_v42 = vsel %vm977_vm10, %v3096_v1, 0.0 }
 0x138   : > { %1431 = vperm.xlu1 %2473, %v2780_v55  }
 0x139   : > { %1545 = vrot.lane.b32.xlu0 %v1485_v57, %s3540_s21 }
 0x13a   : > { %v718_v37 = vpop.permute.xlu1 %717 }
 0x13b   : > { %vm740_vm15 = vcmp.eq.s32.totalorder %v718_v37, 1 }
 0x13c   : > { %v3247_v26 = vsel %vm740_vm15, %v3096_v1, 0.0  ;;  %880 = vrot.lane.b32.xlu1 %v793_v50, %s3540_s21  ;;  %vm1520_vm15 = vcmp.eq.s32.totalorder %v2916_v33, 1 }
 0x13d   : > { %1577 = vrot.lane.b32.xlu0 %v1525_v43, %s2555_s30  ;;  %v1528_v31 = vsel %vm1520_vm15, %v2991_v60, 0.0 }
 0x13f   : > { %v1411_v55 = vpop.permute.xlu1 %1410 }
 0x140   : > { %vm1433_vm13 = vcmp.eq.s32.totalorder %v1411_v55, 1  ;;  %912 = vrot.lane.b32.xlu1 %v859_v16, %s2555_s30 }
 0x141   : > { %v3258_v45 = vsel %vm1433_vm13, %v3011_v21, 0.0  ;;  %1579 = vrot.lane.b32.xlu0 %v1526_v63, %s2555_s30  ;;  %vm970_vm13 = vcmp.eq.s32.totalorder %v3203_v54, 1 }
 0x143   : > { %v1414_v52 = vpop.permute.xlu1 %1413 }
 0x144   : > { %vm1434_vm3 = vcmp.eq.s32.totalorder %v1414_v52, 1  ;;  %1547 = vrot.lane.b32.xlu1 %v1486_v18, %s3540_s21 }
 0x145   : > { %v3267_v0 = vsel %vm1434_vm3, %v3109_v2, 0.0  ;;  %914 = vrot.lane.b32.xlu0 %v860_v32, %s2555_s30  ;;  %vm972_vm3 = vcmp.eq.s32.totalorder %v2921_v34, 1 }
 0x146   : > { %v980_v57 = vsel %vm972_vm3, %v3109_v2, 0.0 }
 0x148   : > { %v3273_v7 = vpop.permute.xlu1 %726  ;;  %882 = vrot.lane.b32.xlu1 %v794_v25, %s3540_s21 }
 0x149   : > { %1549 = vrot.lane.b32.xlu0 %v1487_v39, %s3540_s21  ;;  %vm743_vm7 = vcmp.eq.s32.totalorder %v3273_v7, 1 }
 0x14a   : > { %v751_v58 = vsel %vm743_vm7, %v3109_v2, 0.0 }
 0x14c   : > { %884 = vrot.lane.b32.xlu1 %v795_v38, %s3540_s21  ;;  %v749_v38 = vsel %vm741_vm4, %v3055_v53, 0.0 }
 0x14d   : > { %v1417_v56 = vpop.permute.xlu1 %1416  ;;  %1581 = vrot.lane.b32.xlu0 %v1527_v6, %s2555_s30 }
 0x14e   : > { %vm1435_vm10 = vcmp.eq.s32.totalorder %v1417_v56, 1 }
 0x14f   : > { %v1443_v35 = vsel %vm1435_vm10, %v3104_v48, 0.0 }
 0x150   : > { %916 = vrot.lane.b32.xlu1 %v861_v49, %s2555_s30  ;;  %v750_v49 = vsel %vm742_vm6, %v3011_v21, 0.0 }
 0x152   : > { %v730_v23 = vpop.permute.xlu1 %729 }
 0x153   : > { %vm744_vm14 = vcmp.eq.s32.totalorder %v730_v23, 1 }
 0x154   : > { %v3291_v28 = vsel %vm744_vm14, %v3104_v48, 0.0  ;;  %1551 = vrot.lane.b32.xlu1 %v1488_v46, %s3540_s21 }
 0x156   : > { %v733_v36 = vpop.permute.xlu1 %732 }
 0x157   : > { %vm745_vm0 = vcmp.eq.s32.totalorder %v733_v36, 1 }
 0x158   : > { %v3296_v15 = vsel %vm745_vm0, %v3026_v41, 0.0  ;;  %1583 = vrot.lane.b32.xlu1 %v1528_v31, %s2555_s30  ;;  %v978_v41 = vsel %vm970_vm13, %v3055_v53, 0.0  ;;  %s2152_s30 = sshll.u32 %s432_s23, 6 }
 0x159   : > { %s3462_s15 = scalar_lea.vmem [#allocation2], %s2152_s30  ;;  %s2556_s30 = smov [#allocation2]  }
 0x15a   : > { %s2086_s16 = sshll.u32 %s3462_s15, 4  ;;  %s3478_s16 = int_to_ptr.vmem [resolvable:$true] %s2086_s16 }
 0x15b   : > { %s2483_s22 = scalar_lea.vmem %s3478_s16, 1024 }
 0x15c   : > { %p2484_p11 = scmp.ne.s32.totalorder %s3478_s16, %s2483_s22 }
 0x15e   : > { %p2485_p12 = pnand %p2484_p11, %p2666_p5 }
 0x160   : > { %p2486_p13 = pneg %p2485_p12 }
 0x162   : > { %v1077_v24 = vpop.permute.xlu1 %1076 }
 0x163   : > { %v1131_v27 = vsel %vm926_vm1, %v979_v47, %v1077_v24 }
 0x166   : > { %v3302_v51 = vpop.permute.xlu1 %1537 }
 0x167   : > { %v1542_v48 = vpop.permute.xlu0 %1541 }
 0x168   : > { %v3305_v33 = vsel %vm926_vm1, %v1443_v35, %v1542_v48 }
 0x16a   : > { %v875_v3 = vpop.permute.xlu1 %874 }
 0x16b   : > { %v1107_v13 = vpop.permute.xlu0 %1106  ;;  %v929_v46 = vsel %vm926_vm1, %v750_v49, %v875_v3 }
 0x16e   : > { %v1075_v14 = vpop.permute.xlu1 %1074 }
 0x16f   : > { %v1130_v60 = vsel %vm926_vm1, %v978_v41, %v1075_v14  ;;  %v905_v40 = vpop.permute.xlu0 %904 }
 0x170   : > { %v1138_v8 = vsel %vm490_vm5, %v1130_v60, %v1107_v13 }
 0x171   : > { %2306 = vmatprep.mubr.msk.f32.mxu1 %vm1150_vm2, %v1138_v8 }
 0x172   : > { %v873_v17 = vpop.permute.xlu1 %872 }
 0x173   : > { %v1109_v54 = vpop.permute.xlu0 %1108  ;;  %v928_v6 = vsel %vm926_vm1, %v749_v38, %v873_v17 }
 0x174   : > { %v1139_v22 = vsel %vm490_vm5, %v1131_v27, %v1109_v54  ;;  %v936_v36 = vsel %vm490_vm5, %v928_v6, %v905_v40  ;;  %v3557_v6 = vld [vmem:[#allocation8_spill] sm:$0xff] }
 0x175   : > { %2307 = vmatmul.mubr.msk.f32.vlgmr.msra.gmra.mxu1 %vm1150_vm2, %v1139_v22 }
 0x176   : > { %v1081_v12 = vpop.permute.xlu1 %1080  ;;  %2337 = vmatpush3.msra.mxu1 %v3180_v4 }
 0x177   : > { %v1111_v29 = vpop.permute.xlu0 %1110  ;;  %2338 = vmatprep.subr.mxu1 %v2187_v30  ;;  %v1133_v34 = vsel %vm926_vm1, %v3222_v11, %v1081_v12 }
 0x178   : > { %2339 = vmatpush3.msra.mxu1 %v2187_v30 }
 0x179   : > { %2340 = vmatprep.subr.mxu1 %v2186_v59 }
 0x17a   : > { %v1079_v44 = vpop.permute.xlu1 %1078  ;;  %2341 = vmatpush3.msra.mxu1 %v2186_v59 }
 0x17b   : > { %v1132_v37 = vsel %vm926_vm1, %v980_v57, %v1079_v44  ;;  %v1570_v50 = vpop.permute.xlu0 %1569  ;;  %v3555_v57 = vld [vmem:[#allocation6_spill] sm:$0xff] }
 0x17c   : > { %v1140_v43 = vsel %vm490_vm5, %v1132_v37, %v1111_v29 }
 0x17d   : > { %2309 = vmatprep.mubr.msk.f32.mxu1 %vm1150_vm2, %v1140_v43  ;;  %v3556_v43 = vld [vmem:[#allocation7_spill] sm:$0xff] }
 0x17e   : > { %v1540_v4 = vpop.permute.xlu1 %1539 }
 0x17f   : > { %v871_v55 = vpop.permute.xlu0 %870  ;;  %v1594_v54 = vsel %vm926_vm1, %v3267_v0, %v1540_v4 }
 0x180   : > { %v927_v56 = vsel %vm926_vm1, %v3247_v26, %v871_v55 }
 0x182   : > { %v877_v16 = vpop.permute.xlu1 %876 }
 0x183   : > { %v1113_v63 = vpop.permute.xlu0 %1112  ;;  %v930_v20 = vsel %vm926_vm1, %v751_v58, %v877_v16 }
 0x184   : > { %v1141_v52 = vsel %vm490_vm5, %v1133_v34, %v1113_v63 }
 0x185   : > { %2310 = vmatmul.mubr.msk.f32.gmra.mxu1 %vm1150_vm2, %v1141_v52 }
 0x186   : > { %v1085_v18 = vpop.permute.xlu1 %1084 }
 0x187   : > { %v1115_v32 = vpop.permute.xlu0 %1114  ;;  %v1135_v3 = vsel %vm926_vm1, %v3230_v10, %v1085_v18 }
 0x18a   : > { %v1572_v25 = vpop.permute.xlu1 %1571 }
 0x18b   : > { %v1087_v39 = vpop.permute.xlu0 %1086  ;;  %v1602_v22 = vsel %vm490_vm5, %v1594_v54, %v1572_v25 }
 0x18c   : > { %v1136_v41 = vsel %vm926_vm1, %v3115_v5, %v1087_v39  ;;  %v1593_v5 = vsel %vm926_vm1, %v3258_v45, %v3302_v51 }
 0x18d   : > { %v1601_v27 = vsel %vm490_vm5, %v1593_v5, %v1570_v50 }
 0x18e   : > { %v907_v11 = vpop.permute.xlu1 %906 }
 0x18f   : > { %v903_v35 = vpop.permute.xlu0 %902  ;;  %v937_v7 = vsel %vm490_vm5, %v929_v46, %v907_v11  ;;  %v755_v46 = vsel %vm747_vm9, %v3061_v61, 0.0  ;;  %v2475_v61 = vld [vmem:[%s2719_s4] sm:$0xff] }
 0x190   : > { %v935_v23 = vsel %vm490_vm5, %v927_v56, %v903_v35 }
 0x191   : > { %2324 = vmatprep.mubr.msk.f32.mxu0 %vm1150_vm2, %v935_v23 }
 0x192   : > { %2325 = vmatmul.mubr.msk.f32.vlgmr.msra.gmra.mxu0 %vm1150_vm2, %v936_v36  ;;  %v909_v26 = vpop.permute.xlu1 %908 }
 0x193   : > { %v938_v31 = vsel %vm490_vm5, %v930_v20, %v909_v26  ;;  %v1117_v21 = vpop.permute.xlu0 %1116  ;;  %2327 = vmatprep.mubr.msk.f32.mxu0 %vm1150_vm2, %v937_v7 }
 0x194   : > { %v1143_v14 = vsel %vm490_vm5, %v1135_v3, %v1117_v21  ;;  %v2477_v3 = vld [vmem:[%s2719_s4 + $0x10] sm:$0xff] }
 0x196   : > { %2328 = vmatmul.mubr.msk.f32.gmra.mxu0 %vm1150_vm2, %v938_v31  ;;  %v1083_v2 = vpop.permute.xlu1 %1082 }
 0x197   : > { %v1134_v24 = vsel %vm926_vm1, %v3128_v19, %v1083_v2  ;;  %v1119_v48 = vpop.permute.xlu0 %1118  ;;  %v1788_v2 = vld [vmem:[%s3534_s10] sm:$0xff] }
 0x198   : > { %v1142_v13 = vsel %vm490_vm5, %v1134_v24, %v1115_v32  ;;  %v1144_v60 = vsel %vm490_vm5, %v1136_v41, %v1119_v48  ;;  %2354 = vmatprep.subr.mxu0 %v1788_v2  ;;  %v1925_v24 = vld [vmem:[%s3536_s12] sm:$0xff]  ;;  %v2476_v48 = vld [vmem:[%s2719_s4 + $0x8] sm:$0xff] }
 0x199   : > { %2312 = vmatprep.mubr.msk.f32.mxu1 %vm1150_vm2, %v1142_v13  ;;  %2355 = vmatpush3.msra.mxu0 %v1788_v2  ;;  %v2478_v13 = vld [vmem:[%s2719_s4 + $0x18] sm:$0xff]  ;;  %v2479_v41 = vld [vmem:[%s2719_s4 + $0x20] sm:$0xff] }
 0x19a   : > { %v1089_v40 = vpop.permute.xlu1 %1088  ;;  %2313 = vmatmul.mubr.msk.f32.gmra.mxu1 %vm1150_vm2, %v1143_v14  ;;  %v2480_v14 = vld [vmem:[%s2719_s4 + $0x28] sm:$0xff] }
 0x19b   : > { %v1544_v8 = vpop.permute.xlu0 %1543  ;;  %2315 = vmatprep.mubr.msk.f32.mxu1 %vm1150_vm2, %v1144_v60  ;;  %v1137_v19 = vsel %vm926_vm1, %v3238_v42, %v1089_v40  ;;  %v2481_v60 = vld [vmem:[%s2719_s4 + $0x30] sm:$0xff]  ;;  %v2482_v40 = vld [vmem:[%s2719_s4 + $0x38] sm:$0xff]  ;;  %s2487_s4 = sshll.u32 %s2556_s30, 4  ;;  %s2488_s4 = int_to_ptr.vmem [resolvable:$false] %s2487_s4 }
 0x19c   : > { %v1596_v0 = vsel %vm926_vm1, %v3555_v57, %v1544_v8  ;;  %v2198_v57 = vld [vmem:[%s3533_s9] ss:$0 sm:$0xff]  ;;  %s2489_s17 = scalar_lea.vmem %s2488_s4, 2048  ;;  %p2490_p0 = scmp.lt.s32.totalorder %s3478_s16, %s2488_s4 }
 0x19d   : > { %p2491_p1 = scmp.lt.s32.totalorder %s2489_s17, %s2483_s22 }
 0x19e   : > { %v1121_v10 = vpop.permute.xlu1 %1120 }
 0x19f   : > { %v1145_v47 = vsel %vm490_vm5, %v1137_v19, %v1121_v10  ;;  %v879_v17 = vpop.permute.xlu0 %878  ;;  %p2492_p2 = por %p2491_p1, %p2490_p0 }
 0x1a0   : > { %2316 = vmatmul.mubr.msk.f32.gmra.mxu1 %vm1150_vm2, %v1145_v47  ;;  %v931_v45 = vsel %vm926_vm1, %v3291_v28, %v879_v17 }
 0x1a1   : > { %2342 = vmatprep.mubr.msk.f32.mxu1 %vm1150_vm2, %v1601_v27  ;;  %p2493_p3 = pnand %p2492_p2, %p2486_p13 }
 0x1a3   : > { %v1576_v42 = vpop.permute.xlu0 %1575 }
 0x1a4   : > { %2343 = vmatmul.mubr.msk.f32.vlgmr.msra.gmra.mxu1 %vm1150_vm2, %v1602_v22  ;;  %v1604_v50 = vsel %vm490_vm5, %v1596_v0, %v1576_v42 }
 0x1a7   : > { %v911_v51 = vpop.permute.xlu0 %910 }
 0x1a8   : > { %v939_v30 = vsel %vm490_vm5, %v931_v45, %v911_v51 }
 0x1a9   : > { %2330 = vmatprep.mubr.msk.f32.mxu0 %vm1150_vm2, %v939_v30  ;;  %v2197_v30 = vld [vmem:[%s3532_s8] ss:$0 sm:$0xff] }
 0x1ab   : > { %v1546_v12 = vpop.permute.xlu0 %1545  ;;  %v1429_v59 = vpop.permute.xlu1 %1428 }
 0x1ac   : > { %v1597_v28 = vsel %vm926_vm1, %v3556_v43, %v1546_v12  ;;  %vm1439_vm8 = vcmp.eq.s32.totalorder %v1429_v59, 1 }
 0x1ad   : > { %v1447_v38 = vsel %vm1439_vm8, %v3096_v1, 0.0 }
 0x1af   : > { %v1578_v29 = vpop.permute.xlu0 %1577  ;;  %v1574_v44 = vpop.permute.xlu1 %1573 }
 0x1b0   : > { %v1603_v37 = vsel %vm490_vm5, %v3305_v33, %v1574_v44  ;;  %v1605_v4 = vsel %vm490_vm5, %v1597_v28, %v1578_v29 }
 0x1b1   : > { %2345 = vmatprep.mubr.msk.f32.mxu1 %vm1150_vm2, %v1603_v37 }
 0x1b2   : > { %2346 = vmatmul.mubr.msk.f32.gmra.mxu1 %vm1150_vm2, %v1604_v50 }
 0x1b3   : > { %v1580_v55 = vpop.permute.xlu0 %1579  ;;  %v1432_v16 = vpop.permute.xlu1 %1431  ;;  %2348 = vmatprep.mubr.msk.f32.mxu1 %vm1150_vm2, %v1605_v4 }
 0x1b4   : > { %vm1440_vm10 = vcmp.eq.s32.totalorder %v1432_v16, 1 }
 0x1b7   : > { %v915_v34 = vpop.permute.xlu0 %914  ;;  %v881_v63 = vpop.permute.xlu1 %880 }
 0x1b8   : > { %v932_v33 = vsel %vm926_vm1, %v3296_v15, %v881_v63 }
 0x1bb   : > { %v1550_v52 = vpop.permute.xlu0 %1549  ;;  %v913_v18 = vpop.permute.xlu1 %912 }
 0x1bc   : > { %v940_v32 = vsel %vm490_vm5, %v932_v33, %v913_v18  ;;  %v1599_v56 = vsel %vm926_vm1, %v1447_v38, %v1550_v52 }
 0x1bd   : > { %2331 = vmatmul.mubr.msk.f32.gmra.mxu0 %vm1150_vm2, %v940_v32 }
 0x1bf   : > { %v1582_v25 = vpop.permute.xlu0 %1581  ;;  %v1548_v39 = vpop.permute.xlu1 %1547 }
 0x1c0   : > { %v1598_v11 = vsel %vm926_vm1, %v3557_v6, %v1548_v39  ;;  %v1607_v15 = vsel %vm490_vm5, %v1599_v56, %v1582_v25 }
 0x1c1   : > { %v1606_v35 = vsel %vm490_vm5, %v1598_v11, %v1580_v55 }
 0x1c2   : > { %2349 = vmatmul.mubr.msk.f32.gmra.mxu1 %vm1150_vm2, %v1606_v35 }
 0x1c3   : > { %v883_v49 = vpop.permute.xlu1 %882  ;;  %2351 = vmatprep.mubr.msk.f32.mxu1 %vm1150_vm2, %v1607_v15 }
 0x1c4   : > { %v933_v23 = vsel %vm926_vm1, %v3089_v9, %v883_v49  ;;  %v1448_v9 = vsel %vm1440_vm10, %v3055_v53, 0.0  ;;  %v1926_v53 = vld [vmem:[%s3536_s12 + $0x8] sm:$0xff] }
 0x1c5   : > { %v941_v58 = vsel %vm490_vm5, %v933_v23, %v915_v34  ;;  %2368 = vmatprep.subr.mxu1 %v1926_v53 }
 0x1c6   : > { %2333 = vmatprep.mubr.msk.f32.mxu0 %vm1150_vm2, %v941_v58  ;;  %2369 = vmatpush3.msra.mxu1 %v1926_v53 }
 0x1c7   : > { %v885_v1 = vpop.permute.xlu1 %884  ;;  %2370 = vmatprep.subr.mxu1 %v1925_v24 }
 0x1c8   : > { %v934_v36 = vsel %vm926_vm1, %v755_v46, %v885_v1  ;;  %2371 = vmatpush3.msra.mxu1 %v1925_v24 }
 0x1cb   : > { %v917_v20 = vpop.permute.xlu1 %916 }
 0x1cc   : > { %v942_v7 = vsel %vm490_vm5, %v934_v36, %v917_v20 }
 0x1cd   : > { %2334 = vmatmul.mubr.msk.f32.gmra.mxu0 %vm1150_vm2, %v942_v7 }
 0x1cf   : > { %v1552_v26 = vpop.permute.xlu1 %1551 }
 0x1d0   : > { %v1600_v31 = vsel %vm926_vm1, %v1448_v9, %v1552_v26 }
 0x1d3   : > { %v1584_v21 = vpop.permute.xlu1 %1583 }
 0x1d4   : > { %v1608_v62 = vsel %vm490_vm5, %v1600_v31, %v1584_v21 }
 0x1d5   : > { %2352 = vmatmul.mubr.msk.f32.gmra.mxu1 %vm1150_vm2, %v1608_v62 }
 0x1d6   : > { %2372 = vmatprep.mubr.msk.f32.mxu1 %vm490_vm5, %v2475_v61 }
 0x1d9   : > { %2373 = vmatmul.mubr.msk.f32.vlgmr.msra.gmra.mxu1 %vm490_vm5, %v2476_v48 }
 0x1da   : > { %2375 = vmatprep.mubr.msk.f32.mxu1 %vm490_vm5, %v2477_v3 }
 0x1dd   : > { %2376 = vmatmul.mubr.msk.f32.gmra.mxu1 %vm490_vm5, %v2478_v13 }
 0x1de   : > { %2378 = vmatprep.mubr.msk.f32.mxu1 %vm490_vm5, %v2479_v41 }
 0x1e1   : > { %2379 = vmatmul.mubr.msk.f32.gmra.mxu1 %vm490_vm5, %v2480_v14 }
 0x1e2   : > { %2381 = vmatprep.mubr.msk.f32.mxu1 %vm490_vm5, %v2481_v60 }
 0x1e5   : > { %2382 = vmatmul.mubr.msk.f32.gmra.mxu1 %vm490_vm5, %v2482_v40 }
 0x235   : > { %v2308_v8 = vpop.f32.mrf.mxu1 }
 0x237   : > { %v1241_v19 = vpop.f32.mrf.mxu1 }
 0x245   : > { %v2311_v10 = vpop.f32.mrf.mxu1 }
 0x247   : > { %v1251_v5 = vpop.f32.mrf.mxu1 }
 0x252   : > { %v2326_v17 = vpop.f32.mrf.mxu0 }
 0x253   : > { %v1376_v45 = vadd.f32 %v2326_v17, %v2308_v8 }
 0x254   : > { %v1370_v22 = vpop.f32.mrf.mxu0 }
 0x255   : > { %v1371_v12 = vadd.f32 %v1370_v22, %v1241_v19 }
 0x256   : > { %v2329_v28 = vpop.f32.mrf.mxu0 }
 0x257   : > { %v1386_v34 = vadd.f32 %v2329_v28, %v2311_v10  ;;  %v2199_v10 = vld [vmem:[%s3535_s11] ss:$0 sm:$0xff] }
 0x258   : > { %v1380_v16 = vpop.f32.mrf.mxu0 }
 0x259   : > { %v1381_v33 = vadd.f32 %v1380_v16, %v1251_v5 }
 0x25a   : > { %v2314_v47 = vpop.f32.mrf.mxu1 }
 0x25c   : > { %v1261_v27 = vpop.f32.mrf.mxu1 }
 0x260   : > { %v2317_v54 = vpop.f32.mrf.mxu1 }
 0x262   : > { %v1271_v42 = vpop.f32.mrf.mxu1 }
 0x264   : > { %v2344_v51 = vpop.f32.mrf.mxu1 }
 0x265   : > { %v1743_v59 = vadd.f32 %v2344_v51, %v1376_v45 }
 0x266   : > { %v1703_v29 = vpop.f32.mrf.mxu1 }
 0x267   : > { %v1758_v44 = vmul.f32 %v2197_v30, %v1743_v59  ;;  %v1742_v0 = vadd.f32 %v1703_v29, %v1371_v12 }
 0x269   : > { %v1757_v37 = vmul.f32 %v2197_v30, %v1742_v0  ;;  %v1773_v50 = vadd.f32 %v2198_v57, %v1758_v44 }
 0x26b   : > { %v1772_v43 = vadd.f32 %v2198_v57, %v1757_v37  ;;  %v1781_v55 = vmax.f32 %v1773_v50, 0.0 }
 0x26d   : > { %v1780_v4 = vmax.f32 %v1772_v43, 0.0 }
 0x26f   : > { %2356 = vmatprep.mubr.msk.f32.mxu0 %vm926_vm1, %v1780_v4 }
 0x270   : > { %2357 = vmatmul.mubr.msk.f32.vlgmr.msra.gmra.mxu0 %vm926_vm1, %v1781_v55 }
 0x272   : > { %v2347_v63 = vpop.f32.mrf.mxu1 }
 0x273   : > { %v1745_v52 = vadd.f32 %v2347_v63, %v1386_v34 }
 0x274   : > { %v1713_v18 = vpop.f32.mrf.mxu1 }
 0x275   : > { %v1760_v32 = vmul.f32 %v2197_v30, %v1745_v52  ;;  %v1744_v25 = vadd.f32 %v1713_v18, %v1381_v33 }
 0x277   : > { %v1759_v39 = vmul.f32 %v2197_v30, %v1744_v25  ;;  %v1775_v38 = vadd.f32 %v2198_v57, %v1760_v32 }
 0x279   : > { %v1774_v6 = vadd.f32 %v2198_v57, %v1759_v39  ;;  %v1783_v56 = vmax.f32 %v1775_v38, 0.0 }
 0x27b   : > { %v1782_v11 = vmax.f32 %v1774_v6, 0.0 }
 0x27d   : > { %v2332_v35 = vpop.f32.mrf.mxu0  ;;  %2359 = vmatprep.mubr.msk.f32.mxu0 %vm926_vm1, %v1782_v11 }
 0x27e   : > { %2360 = vmatmul.mubr.msk.f32.gmra.mxu0 %vm926_vm1, %v1783_v56  ;;  %v1396_v49 = vadd.f32 %v2332_v35, %v2314_v47 }
 0x27f   : > { %v1390_v15 = vpop.f32.mrf.mxu0 }
 0x280   : > { %v1391_v58 = vadd.f32 %v1390_v15, %v1261_v27 }
 0x282   : > { %v2350_v23 = vpop.f32.mrf.mxu1 }
 0x283   : > { %v1747_v1 = vadd.f32 %v2350_v23, %v1396_v49 }
 0x284   : > { %v1723_v46 = vpop.f32.mrf.mxu1 }
 0x285   : > { %v1762_v36 = vmul.f32 %v2197_v30, %v1747_v1  ;;  %v1746_v20 = vadd.f32 %v1723_v46, %v1391_v58 }
 0x287   : > { %v1761_v7 = vmul.f32 %v2197_v30, %v1746_v20  ;;  %v1777_v26 = vadd.f32 %v2198_v57, %v1762_v36 }
 0x289   : > { %v1776_v9 = vadd.f32 %v2198_v57, %v1761_v7  ;;  %v1785_v21 = vmax.f32 %v1777_v26, 0.0 }
 0x28b   : > { %v1784_v31 = vmax.f32 %v1776_v9, 0.0 }
 0x28d   : > { %2362 = vmatprep.mubr.msk.f32.mxu0 %vm926_vm1, %v1784_v31  ;;  %v2335_v62 = vpop.f32.mrf.mxu0 }
 0x28e   : > { %2363 = vmatmul.mubr.msk.f32.gmra.mxu0 %vm926_vm1, %v1785_v21  ;;  %v1406_v2 = vadd.f32 %v2335_v62, %v2317_v54 }
 0x28f   : > { %v1400_v61 = vpop.f32.mrf.mxu0 }
 0x290   : > { %v1401_v24 = vadd.f32 %v1400_v61, %v1271_v42 }
 0x295   : > { %v2353_v53 = vpop.f32.mrf.mxu1 }
 0x296   : > { %v1749_v48 = vadd.f32 %v2353_v53, %v1406_v2 }
 0x297   : > { %v1733_v3 = vpop.f32.mrf.mxu1 }
 0x298   : > { %v1764_v13 = vmul.f32 %v2197_v30, %v1749_v48  ;;  %v1748_v41 = vadd.f32 %v1733_v3, %v1401_v24 }
 0x299   : > { %v2374_v5 = vpop.f32.mrf.mxu1 }
 0x29a   : > { %v1763_v14 = vmul.f32 %v2197_v30, %v1748_v41  ;;  %v1779_v60 = vadd.f32 %v2198_v57, %v1764_v13 }
 0x29b   : > { %v2017_v54 = vpop.f32.mrf.mxu1 }
 0x29c   : > { %v1778_v40 = vadd.f32 %v2198_v57, %v1763_v14  ;;  %v1787_v19 = vmax.f32 %v1779_v60, 0.0 }
 0x29d   : > { %v2377_v51 = vpop.f32.mrf.mxu1 }
 0x29e   : > { %v1786_v8 = vmax.f32 %v1778_v40, 0.0 }
 0x29f   : > { %v2027_v29 = vpop.f32.mrf.mxu1 }
 0x2a0   : > { %2365 = vmatprep.mubr.msk.f32.mxu0 %vm926_vm1, %v1786_v8 }
 0x2a1   : > { %2366 = vmatmul.mubr.msk.f32.gmra.mxu0 %vm926_vm1, %v1787_v19  ;;  %v2380_v37 = vpop.f32.mrf.mxu1 }
 0x2a3   : > { %v2037_v4 = vpop.f32.mrf.mxu1 }
 0x2a5   : > { %v2383_v33 = vpop.f32.mrf.mxu1 }
 0x2a7   : > { %v2047_v39 = vpop.f32.mrf.mxu1 }
 0x330   : > { %v2358_v47 = vpop.f32.mrf.mxu0 }
 0x331   : > { %v1892_v17 = vadd.f32 %v2358_v47, %v2199_v10 }
 0x332   : > { %v1886_v27 = vpop.f32.mrf.mxu0 }
 0x333   : > { %v1887_v22 = vadd.f32 %v2199_v10, %v1886_v27  ;;  %v2057_v42 = vadd.f32 %v2374_v5, %v1892_v17 }
 0x335   : > { %2065 = vst [vmem:[%s3462_s15 + $0x8] sm:$0xff] %v2057_v42  ;;  %v2056_v45 = vadd.f32 %v2017_v54, %v1887_v22 }
 0x337   : > { %2064 = vst [vmem:[%s3462_s15] sm:$0xff] %v2056_v45 }
 0x33e   : > { %v2361_v30 = vpop.f32.mrf.mxu0 }
 0x33f   : > { %v1902_v12 = vadd.f32 %v2361_v30, %v2199_v10 }
 0x340   : > { %v1896_v59 = vpop.f32.mrf.mxu0 }
 0x341   : > { %v1897_v44 = vadd.f32 %v2199_v10, %v1896_v59  ;;  %v2059_v57 = vadd.f32 %v2377_v51, %v1902_v12 }
 0x343   : > { %2067 = vst [vmem:[%s3462_s15 + $0x18] sm:$0xff] %v2059_v57  ;;  %v2058_v0 = vadd.f32 %v2027_v29, %v1897_v44 }
 0x345   : > { %2066 = vst [vmem:[%s3462_s15 + $0x10] sm:$0xff] %v2058_v0 }
 0x34e   : > { %v2364_v50 = vpop.f32.mrf.mxu0 }
 0x34f   : > { %v1912_v43 = vadd.f32 %v2364_v50, %v2199_v10 }
 0x350   : > { %v1906_v28 = vpop.f32.mrf.mxu0 }
 0x351   : > { %v1907_v55 = vadd.f32 %v2199_v10, %v1906_v28  ;;  %v2061_v16 = vadd.f32 %v2380_v37, %v1912_v43 }
 0x353   : > { %2069 = vst [vmem:[%s3462_s15 + $0x28] sm:$0xff] %v2061_v16  ;;  %v2060_v34 = vadd.f32 %v2037_v4, %v1907_v55 }
 0x355   : > { %2068 = vst [vmem:[%s3462_s15 + $0x20] sm:$0xff] %v2060_v34 }
 0x361   : > { %v2367_v63 = vpop.f32.mrf.mxu0 }
 0x362   : > { %v1922_v52 = vadd.f32 %v2367_v63, %v2199_v10 }
 0x363   : > { %v1916_v18 = vpop.f32.mrf.mxu0 }
 0x364   : > { %v2063_v32 = vadd.f32 %v2383_v33, %v1922_v52  ;;  %v1917_v25 = vadd.f32 %v2199_v10, %v1916_v18 }
 0x366   : > { %2071 = vst [vmem:[%s3462_s15 + $0x38] sm:$0xff] %v2063_v32  ;;  %v2062_v38 = vadd.f32 %v2047_v39, %v1917_v25 }
 0x368   : > { %2070 = vst [vmem:[%s3462_s15 + $0x30] sm:$0xff] %v2062_v38 }
 0x369   : > { %2496 = shalt.err (!%p2493_p3)
}
 0x36a   : > { %s2497_s23 = scalar_lea.hbm %s3475_s24, 1024  ;;  %s2501_s30 = scalar_lea.hbm %s3537_s13, 2048 }
 0x36b   : > { %p2498_p4 = scmp.ne.s32.totalorder %s3475_s24, %s2497_s23  ;;  %p2502_p9 = scmp.lt.s32.totalorder %s3475_s24, %s3537_s13 }
 0x36c   : > { %p2503_p10 = scmp.lt.s32.totalorder %s2501_s30, %s2497_s23 }
 0x36d   : > { %p2499_p7 = pnand %p2498_p4, %p2666_p5 }
 0x36e   : > { %p2504_p11 = por %p2503_p10, %p2502_p9 }
 0x36f   : > { %p2500_p8 = pneg %p2499_p7 }
 0x371   : > { %p2505_p12 = pnand %p2504_p11, %p2500_p8 }
 0x373   : > { %2508 = shalt.err (!%p2505_p12)
}
 0x374   : > { %s2557_s22 = smov 128   ;;  %s3558_s4 = smov 8  }
 0x375   : > { %2384 = dma.vmem_to_hbm [thread:$0]  (%p2666_p5), %s3478_s16, 1024, %s3475_s24, %s3483_s29, %s2557_s22, %s2557_s22, %s3558_s4  }
 0x376 PF: > { %p2390_p13 = scmp.ge.s32.totalorder %s2543_s28, 2  ;;  %s2101_s17 = sand.u32 1, %s2531_s25  }
 0x377   : > { %s2102_s0 = scalar_lea.sflag [#allocation3], %s2101_s17 }
 0x378   : > { %p2387_p0 = pnand %p2390_p13, %p2670_p6 }
 0x37a   : > { %p2388_p1 = pneg %p2387_p0 }
 0x37c   : > { %2526 = dma.done.wait (%p2388_p1), %s2102_s0, 1024  }
 0x37d   : > { %2528 = vsyncadd (%p2388_p1), %s2102_s0, 4294966272  ;;  %s3559_s18 = sld [smem:[#allocation5_spill]]  ;;  %p23_p2 = scmp.ge.s32.totalorder %s2653_s14, 4  }
 0x37e   : > { %s3560_s25 = smov %s2535_s26  ;;  %s3561_s26 = smov %s2539_s27 }
 0x37f   : > { %s3563_s28 = smov %s2653_s14  ;;  %25 = sbr.rel (!%p23_p2) target bundleno = 6 (0x6), region = 109 }
 0x383   : > { %s3562_s27 = smov %s3559_s18 }
 0x384   :  { %2107 = vsyncpa [#allocation3], 1 }
 0x385   :  { %2109 = vsyncpa [#allocation3 + $0x1], 1 }

// kernel: tpu_custom_call.1
= control target key start
LH: loop header
LB: loop body
LE: loop exit
PB: predicated region body
PF: predicated region fallthrough
CT: control target
= control target key end

     0   :  { %s3524_s0 = inlined_call_operand.vmem [shape: f32[128,16], index: 0, kind: input, shape index: {}]   ;;  %s3525_s1 = inlined_call_operand.vmem [shape: f32[64,9], index: 1, kind: input, shape index: {}]   ;;  %s3526_s2 = inlined_call_operand.vmem [shape: f32[1,16], index: 2, kind: input, shape index: {}]   ;;  %s3527_s3 = inlined_call_operand.vmem [shape: f32[1,16], index: 3, kind: input, shape index: {}]   ;;  %s3528_s4 = inlined_call_operand.vmem [shape: f32[16,8], index: 4, kind: input, shape index: {}]   ;;  %s3529_s5 = inlined_call_operand.vmem [shape: f32[1,8], index: 5, kind: input, shape index: {}]   ;;  %s3530_s6 = inlined_call_operand.vmem [shape: f32[1,8], index: 6, kind: input, shape index: {}]   ;;  %s3531_s7 = inlined_call_operand.vmem [shape: f32[3,24,8], index: 7, kind: input, shape index: {}]   ;;  %s3532_s8 = inlined_call_operand.vmem [shape: f32[1,8], index: 8, kind: input, shape index: {}]   ;;  %s3533_s9 = inlined_call_operand.vmem [shape: f32[1,8], index: 9, kind: input, shape index: {}]   ;;  %s3534_s10 = inlined_call_operand.vmem [shape: f32[8,128], index: 10, kind: input, shape index: {}]   ;;  %s3535_s11 = inlined_call_operand.vmem [shape: f32[1,128], index: 11, kind: input, shape index: {}]   ;;  %s3536_s12 = inlined_call_operand.vmem [shape: f32[16,128], index: 12, kind: input, shape index: {}]   ;;  %s3537_s13 = inlined_call_operand.hbm [shape: f32[128,128], index: 13, kind: output, shape index: {}]  }
   0x1   :  { %3541 = sst [smem:[#allocation9_spill]] %s3524_s0 }
   0x2   :  { %3542 = sst [smem:[#allocation10_spill]] %s3528_s4 }
   0x3   :  { %18 = vsyncpa [#allocation3], 0 }
   0x4   :  { %20 = vsyncpa [#allocation3 + $0x1], 0  ;;  %s2628_s25 = smov 0   ;;  %s2630_s26 = smov 0  }
   0x5   :  { %s2632_s27 = smov 0   ;;  %s2634_s28 = smov 0  }
   0x6 LB: > { %s2649_s29 = sadd.s32 4294967295, %s2543_s28   ;;  %s2148_s30 = sadd.s32 4294967294, %s2543_s28   ;;  %s2543_s28 = sphi %s2634_s28, %s3563_s28   ;;  %s2539_s27 = sphi %s2632_s27, %s3562_s27   ;;  %s2535_s26 = sphi %s2630_s26, %s3561_s26   ;;  %s2531_s25 = sphi %s2628_s25, %s3560_s25  }
   0x7   : > { %s2653_s14 = sadd.s32 1, %s2543_s28   ;;  %s311_s15 = sadd.s32 1, %s2539_s27 }
   0x8   : > { %s308_s16 = ssub.s32 %s2543_s28, %s2653_s14  ;;  %p321_p0 = scmp.ne.s32.totalorder %s2539_s27, %s2535_s26 }
   0x9   : > { %p309_p1 = scmp.eq.s32.totalorder %s308_s16, 0  ;;  %p322_p2 = scmp.eq.s32.totalorder %s2649_s29, 1 }
   0xa   : > { %p327_p3 = scmp.ne.s32.totalorder %s2535_s26, %s2531_s25  ;;  %p328_p4 = scmp.eq.s32.totalorder %s2148_s30, 1 }
   0xb   : > { %s2664_s17 = scalar_select %p309_p1, %s2539_s27, %s311_s15  }
   0xc   : > { %p2666_p5 = por %p322_p2, %p321_p0  ;;  %p2670_p6 = por %p328_p4, %p327_p3 }
   0xd   : > { %3543 = sst [smem:[#allocation5_spill]] %s2664_s17  ;;  %p2151_p7 = scmp.ge.s32.totalorder %s2543_s28, 1 }
   0xe   : > { %p391_p8 = scmp.lt.s32.totalorder %s2543_s28, 3 }
  0x10   : > { %p392_p9 = pnand %p2151_p7, %p391_p8 }
  0x12   : > { %395 = sbr.rel (%p392_p9) target bundleno = 886 (0x376), region = 72 }
  0x17   : > { %v692_v0 = vld [vmem:[%s3525_s1] sm:$0xff]  ;;  %v693_v1 = vld [vmem:[%s3525_s1 + $0x8] sm:$0xff]  ;;  %v2545_v2 = vmov 5   ;;  %v2546_v3 = vmov 4   ;;  %s3546_s4 = sld [smem:[#allocation10_spill]]  ;;  %v2547_v5 = vmov 0  }
  0x18   : > { %2436 = vset.pattern.permute.xlu1 %v2545_v2  ;;  %2435 = vset.pattern.permute.xlu0 %v2546_v3  ;;  %vm700_vm0 = vcmp.gt.f32.partialorder %v692_v0, 0.0  ;;  %vm701_vm1 = vcmp.gt.f32.partialorder %v693_v1, 0.0  ;;  %v694_v7 = vld [vmem:[%s3525_s1 + $0x10] sm:$0xff]  ;;  %s2153_s22 = sshll.u32 %s2649_s29, 3  ;;  %v695_v9 = vld [vmem:[%s3525_s1 + $0x18] sm:$0xff]  ;;  %v697_v11 = vld [vmem:[%s3525_s1 + $0x28] sm:$0xff] }
  0x19   : > { %v2688_v6 = vsel %vm700_vm0, 1, %v2547_v5  ;;  %p436_p10 = scmp.lt.s32.totalorder %s2153_s22, 15  ;;  %v2703_v10 = vsel %vm701_vm1, 1, %v2547_v5  ;;  %vm702_vm2 = vcmp.gt.f32.partialorder %v694_v7, 0.0  ;;  %vm703_vm3 = vcmp.gt.f32.partialorder %v695_v9, 0.0  ;;  %s3547_s0 = sld [smem:[#allocation9_spill]] }
  0x1a   : > { %1027 = vperm.xlu1 %2436, %v2688_v6   ;;  %987 = vperm.xlu0 %2435, %v2688_v6   ;;  %v2155_v12 = vld [vmem:[%s3526_s2] ss:$0 sm:$0xff]  ;;  %v2714_v13 = vsel %vm702_vm2, 1, %v2547_v5  ;;  %v698_v15 = vld [vmem:[%s3525_s1 + $0x30] sm:$0xff]  ;;  %v2728_v16 = vsel %vm703_vm3, 1, %v2547_v5  ;;  %vm705_vm4 = vcmp.gt.f32.partialorder %v697_v11, 0.0 }
  0x1b   : > { %s3565_s22 = smov (!%p436_p10, %s2153_s22), 15  ;;  %v2156_v14 = vld [vmem:[%s3527_s3] ss:$0 sm:$0xff]  ;;  %vm490_vm5 = vcmask 130048   ;;  %v2742_v30 = vsel %vm705_vm4, 1, %v2547_v5  ;;  %vm706_vm6 = vcmp.gt.f32.partialorder %v698_v15, 0.0 }
  0x1c   : > { %s2154_s16 = sshll.u32 %s3565_s22, 3  ;;  %v696_v34 = vld [vmem:[%s3525_s1 + $0x20] sm:$0xff]  ;;  %v2752_v42 = vsel %vm706_vm6, 1, %v2547_v5  ;;  %v699_v53 = vld [vmem:[%s3525_s1 + $0x38] sm:$0xff]  ;;  %v2548_v54 = vmov 2   ;;  %v2549_v56 = vmov 1  }
  0x1d   : > { %v489_v4 = vld [vmem:[%s3546_s4 + $0x8] sm:$0xff]  ;;  %v488_v8 = vld [vmem:[%s3546_s4] sm:$0xff]  ;;  %vm704_vm7 = vcmp.gt.f32.partialorder %v696_v34, 0.0  ;;  %vm707_vm8 = vcmp.gt.f32.partialorder %v699_v53, 0.0  ;;  %v2550_v57 = vmov 7   ;;  %v2551_v58 = vmov 8  }
  0x1e   : > { %2284 = vmatprep.subr.mxu0 %v489_v4  ;;  %1030 = vperm.xlu1 %2436, %v2703_v10   ;;  %v2759_v48 = vsel %vm704_vm7, 1, %v2547_v5  ;;  %v2780_v55 = vsel %vm707_vm8, 1, %v2547_v5  ;;  %v2552_v59 = vmov 3   ;;  %v2553_v60 = vmov 6   ;;  %s3540_s21 = smov 8   ;;  %s2555_s30 = smov 16  }
  0x1f   : > { %2285 = vmatpush3.msra.mxu0 %v489_v4  ;;  %990 = vperm.xlu0 %2435, %v2703_v10   ;;  %s2719_s4 = scalar_lea.vmem %s3547_s0, %s2154_s16  ;;  %vm660_vm12 = vcmask 1040384   ;;  %vm798_vm13 = vcmask 1046528   ;;  %s432_s23 = sand.u32 1, %s2535_s26  }
  0x20   : > { %2286 = vmatprep.subr.mxu0 %v488_v8  ;;  %v442_v17 = vld [vmem:[%s2719_s4] sm:$0xff]  ;;  %v443_v18 = vld [vmem:[%s2719_s4 + $0x8] sm:$0xff]  ;;  %v444_v19 = vld [vmem:[%s2719_s4 + $0x10] sm:$0xff]  ;;  %s2221_s17 = sshll.u32 %s2649_s29, 10  ;;  %s3483_s29 = scalar_lea.sflag [#allocation3], %s432_s23 }
  0x21   : > { %2287 = vmatpush3.msra.mxu0 %v488_v8  ;;  %v457_v20 = vmul.f32 %v2155_v12, %v442_v17  ;;  %v458_v21 = vmul.f32 %v2155_v12, %v443_v18  ;;  %v459_v22 = vmul.f32 %v2155_v12, %v444_v19  ;;  %v445_v23 = vld [vmem:[%s2719_s4 + $0x18] sm:$0xff]  ;;  %v446_v24 = vld [vmem:[%s2719_s4 + $0x20] sm:$0xff]  ;;  %v447_v25 = vld [vmem:[%s2719_s4 + $0x28] sm:$0xff]  ;;  %s3475_s24 = scalar_lea.hbm %s3537_s13, %s2221_s17 }
  0x22   : > { %2437 = vset.pattern.permute.xlu1 %v2546_v3  ;;  %v460_v26 = vmul.f32 %v2155_v12, %v445_v23  ;;  %v461_v27 = vmul.f32 %v2155_v12, %v446_v24  ;;  %v448_v28 = vld [vmem:[%s2719_s4 + $0x30] sm:$0xff]  ;;  %v462_v35 = vmul.f32 %v2155_v12, %v447_v25  ;;  %v449_v41 = vld [vmem:[%s2719_s4 + $0x38] sm:$0xff] }
  0x23   : > { %993 = vperm.xlu0 %2435, %v2714_v13   ;;  %996 = vperm.xlu1 %2437, %v2728_v16   ;;  %v472_v29 = vadd.f32 %v2156_v14, %v457_v20  ;;  %v473_v31 = vadd.f32 %v2156_v14, %v458_v21  ;;  %v474_v32 = vadd.f32 %v2156_v14, %v459_v22 }
  0x24   : > { %v475_v33 = vadd.f32 %v2156_v14, %v460_v26  ;;  %v463_v36 = vmul.f32 %v2155_v12, %v448_v28  ;;  %v476_v40 = vadd.f32 %v2156_v14, %v461_v27  ;;  %v477_v44 = vadd.f32 %v2156_v14, %v462_v35 }
  0x25   : > { %v480_v37 = vmax.f32 %v472_v29, 0.0  ;;  %v481_v38 = vmax.f32 %v473_v31, 0.0  ;;  %v482_v39 = vmax.f32 %v474_v32, 0.0  ;;  %v464_v45 = vmul.f32 %v2155_v12, %v449_v41 }
  0x26   : > { %v483_v43 = vmax.f32 %v475_v33, 0.0  ;;  %v484_v46 = vmax.f32 %v476_v40, 0.0  ;;  %v478_v47 = vadd.f32 %v2156_v14, %v463_v36  ;;  %v485_v49 = vmax.f32 %v477_v44, 0.0 }
  0x27   : > { %1002 = vperm.xlu0 %2435, %v2742_v30   ;;  %2288 = vmatprep.mubr.msk.f32.mxu0 %vm490_vm5, %v480_v37  ;;  %v479_v50 = vadd.f32 %v2156_v14, %v464_v45  ;;  %v2933_v37 = vld [vmem:[%s3530_s6] ss:$0 sm:$0xff]  ;;  %v2169_v45 = vld [vmem:[%s3531_s7 + $0x28] sm:$0xff] }
  0x28   : > { %2438 = vset.pattern.permute.xlu1 %v2545_v2  ;;  %2289 = vmatmul.mubr.msk.f32.vlgmr.msra.gmra.mxu0 %vm490_vm5, %v481_v38  ;;  %v486_v51 = vmax.f32 %v478_v47, 0.0 }
  0x29   : > { %1036 = vperm.xlu1 %2438, %v2728_v16   ;;  %2291 = vmatprep.mubr.msk.f32.mxu0 %vm490_vm5, %v482_v39  ;;  %v487_v52 = vmax.f32 %v479_v50, 0.0 }
  0x2a   : > { %2300 = vmatprep.subr.mxu1 %v2169_v45 }
  0x2b   : > { %1005 = vperm.xlu0 %2435, %v2752_v42   ;;  %2301 = vmatpush3.msra.mxu1 %v2169_v45 }
  0x2c   : > { %2292 = vmatmul.mubr.msk.f32.gmra.mxu0 %vm490_vm5, %v483_v43 }
  0x2d   : > { %2439 = vset.pattern.permute.xlu1 %v2546_v3  ;;  %2294 = vmatprep.mubr.msk.f32.mxu0 %vm490_vm5, %v484_v46 }
  0x2e   : > { %999 = vperm.xlu1 %2439, %v2759_v48  }
  0x2f   : > { %2441 = vset.pattern.permute.xlu0 %v2545_v2 }
  0x30   : > { %1033 = vperm.xlu0 %2441, %v2714_v13   ;;  %2295 = vmatmul.mubr.msk.f32.gmra.mxu0 %vm490_vm5, %v485_v49 }
  0x31   : > { %2297 = vmatprep.mubr.msk.f32.mxu0 %vm490_vm5, %v486_v51 }
  0x32   : > { %2440 = vset.pattern.permute.xlu1 %v2545_v2 }
  0x33   : > { %1039 = vperm.xlu1 %2440, %v2759_v48  }
  0x34   : > { %1045 = vperm.xlu0 %2441, %v2752_v42   ;;  %2298 = vmatmul.mubr.msk.f32.gmra.mxu0 %vm490_vm5, %v487_v52 }
  0x37   : > { %1042 = vperm.xlu1 %2440, %v2742_v30  }
  0x38   : > { %2449 = vset.pattern.permute.xlu0 %v2548_v54 }
  0x39   : > { %829 = vperm.xlu0 %2449, %v2714_v13  }
  0x3b   : > { %2442 = vset.pattern.permute.xlu1 %v2546_v3 }
  0x3c   : > { %1008 = vperm.xlu1 %2442, %v2780_v55  }
  0x3d   : > { %838 = vperm.xlu0 %2449, %v2742_v30  }
  0x40   : > { %2443 = vset.pattern.permute.xlu1 %v2549_v56 }
  0x41   : > { %757 = vperm.xlu1 %2443, %v2688_v6   ;;  %2455 = vset.pattern.permute.xlu0 %v2549_v56 }
  0x42   : > { %760 = vperm.xlu0 %2455, %v2703_v10  }
  0x45   : > { %2444 = vset.pattern.permute.xlu1 %v2545_v2 }
  0x46   : > { %1048 = vperm.xlu1 %2444, %v2780_v55   ;;  %763 = vperm.xlu0 %2455, %v2714_v13  }
  0x4a   : > { %2445 = vset.pattern.permute.xlu1 %v2548_v54  ;;  %778 = vperm.xlu0 %2455, %v2780_v55  }
  0x4b   : > { %823 = vperm.xlu1 %2445, %v2688_v6  }
  0x4e   : > { %2459 = vset.pattern.permute.xlu0 %v2550_v57 }
  0x4f   : > { %826 = vperm.xlu1 %2445, %v2703_v10   ;;  %1450 = vperm.xlu0 %2459, %v2688_v6  }
  0x53   : > { %2446 = vset.pattern.permute.xlu1 %v2550_v57  ;;  %1459 = vperm.xlu0 %2459, %v2728_v16  }
  0x54   : > { %1453 = vperm.xlu1 %2446, %v2703_v10  }
  0x57   : > { %1468 = vperm.xlu0 %2459, %v2752_v42  }
  0x58   : > { %2447 = vset.pattern.permute.xlu1 %v2551_v58 }
  0x59   : > { %1490 = vperm.xlu1 %2447, %v2688_v6  }
  0x5b   : > { %2461 = vset.pattern.permute.xlu0 %v2551_v58 }
  0x5c   : > { %1499 = vperm.xlu0 %2461, %v2728_v16  }
  0x5d   : > { %1493 = vperm.xlu1 %2447, %v2703_v10  }
  0x60   : > { %1502 = vperm.xlu0 %2461, %v2759_v48  }
  0x61   : > { %2448 = vset.pattern.permute.xlu1 %v2549_v56 }
  0x62   : > { %766 = vperm.xlu1 %2448, %v2728_v16  }
  0x64   : > { %1511 = vperm.xlu0 %2461, %v2780_v55  }
  0x66   : > { %2450 = vset.pattern.permute.xlu1 %v2548_v54 }
  0x67   : > { %832 = vperm.xlu1 %2450, %v2728_v16  }
  0x68   : > { %2465 = vset.pattern.permute.xlu0 %v2552_v59 }
  0x69   : > { %953 = vperm.xlu0 %2465, %v2714_v13  }
  0x6b   : > { %2451 = vset.pattern.permute.xlu1 %v2550_v57 }
  0x6c   : > { %1456 = vperm.xlu1 %2451, %v2714_v13  }
  0x6d   : > { %959 = vperm.xlu0 %2465, %v2759_v48  }
  0x70   : > { %2452 = vset.pattern.permute.xlu1 %v2551_v58 }
  0x71   : > { %1496 = vperm.xlu1 %2452, %v2714_v13   ;;  %965 = vperm.xlu0 %2465, %v2752_v42  }
  0x75   : > { %2453 = vset.pattern.permute.xlu1 %v2549_v56  ;;  %2470 = vset.pattern.permute.xlu0 %v2553_v60 }
  0x76   : > { %769 = vperm.xlu1 %2453, %v2759_v48   ;;  %1419 = vperm.xlu0 %2470, %v2728_v16  }
  0x7a   : > { %772 = vperm.xlu1 %2453, %v2742_v30   ;;  %1422 = vperm.xlu0 %2470, %v2759_v48  }
  0x7e   : > { %2454 = vset.pattern.permute.xlu1 %v2548_v54  ;;  %1425 = vperm.xlu0 %2470, %v2742_v30  }
  0x7f   : > { %835 = vperm.xlu1 %2454, %v2759_v48  }
  0x82   : > { %2472 = vset.pattern.permute.xlu0 %v2547_v5 }
  0x83   : > { %2456 = vset.pattern.permute.xlu1 %v2550_v57  ;;  %720 = vperm.xlu0 %2472, %v2703_v10  }
  0x84   : > { %1462 = vperm.xlu1 %2456, %v2759_v48  }
  0x87   : > { %723 = vperm.xlu0 %2472, %v2714_v13  }
  0x88   : > { %1465 = vperm.xlu1 %2456, %v2742_v30  }
  0x8b   : > { %735 = vperm.xlu0 %2472, %v2752_v42  }
  0x8c   : > { %2457 = vset.pattern.permute.xlu1 %v2549_v56  ;;  %v2168_v56 = vld [vmem:[%s3531_s7 + $0x20] sm:$0xff] }
  0x8d   : > { %775 = vperm.xlu1 %2457, %v2752_v42   ;;  %2302 = vmatprep.subr.mxu1 %v2168_v56 }
  0x8e   : > { %2303 = vmatpush3.msra.mxu1 %v2168_v56 }
  0x8f   : > { %738 = vperm.xlu0 %2472, %v2780_v55  }
  0x91   : > { %2458 = vset.pattern.permute.xlu1 %v2551_v58 }
  0x92   : > { %1505 = vperm.xlu1 %2458, %v2742_v30  }
  0x93   : > { %2474 = vset.pattern.permute.xlu0 %v2551_v58 }
  0x95   : > { %v2829_v61 = vpop.permute.xlu0 %987  ;;  %v2831_v62 = vpop.permute.xlu1 %1027 }
  0x96   : > { %2460 = vset.pattern.permute.xlu1 %v2548_v54  ;;  %vm1050_vm15 = vcmp.eq.s32.totalorder %v2831_v62, 1  ;;  %vm1010_vm2 = vcmp.eq.s32.totalorder %v2829_v61, 1 }
  0x97   : > { %841 = vperm.xlu1 %2460, %v2752_v42  }
  0x99   : > { %v2837_v0 = vpop.permute.xlu1 %1030 }
  0x9a   : > { %v2834_v63 = vpop.permute.xlu0 %990  ;;  %vm1051_vm7 = vcmp.eq.s32.totalorder %v2837_v0, 1 }
  0x9b   : > { %844 = vperm.xlu1 %2460, %v2780_v55   ;;  %vm1011_vm9 = vcmp.eq.s32.totalorder %v2834_v63, 1 }
  0x9e   : > { %v2839_v1 = vpop.permute.xlu0 %993  ;;  %v2841_v2 = vpop.permute.xlu1 %996 }
  0x9f   : > { %2462 = vset.pattern.permute.xlu1 %v2550_v57  ;;  %vm1013_vm8 = vcmp.eq.s32.totalorder %v2841_v2, 1 }
  0xa0   : > { %1471 = vperm.xlu1 %2462, %v2780_v55  }
  0xa2   : > { %v2844_v3 = vpop.permute.xlu0 %1002 }
  0xa4   : > { %2463 = vset.pattern.permute.xlu1 %v2551_v58  ;;  %v2846_v4 = vpop.permute.xlu1 %1036 }
  0xa5   : > { %1508 = vperm.xlu1 %2463, %v2752_v42  }
  0xa6   : > { %v2849_v7 = vpop.permute.xlu0 %1005 }
  0xa9   : > { %2464 = vset.pattern.permute.xlu1 %v2552_v59  ;;  %v2851_v8 = vpop.permute.xlu1 %999 }
  0xaa   : > { %947 = vperm.xlu1 %2464, %v2688_v6  }
  0xab   : > { %v2854_v9 = vpop.permute.xlu0 %1033 }
  0xae   : > { %950 = vperm.xlu1 %2464, %v2703_v10   ;;  %v2857_v11 = vpop.permute.xlu1 %1039 }
  0xaf   : > { %v2859_v12 = vpop.permute.xlu0 %1045 }
  0xb2   : > { %956 = vperm.xlu1 %2464, %v2728_v16   ;;  %v2862_v14 = vpop.permute.xlu1 %1042 }
  0xb4   : > { %v2864_v15 = vpop.permute.xlu0 %829 }
  0xb6   : > { %962 = vperm.xlu1 %2464, %v2742_v30  }
  0xb7   : > { %v2867_v17 = vpop.permute.xlu1 %1008 }
  0xb8   : > { %v2869_v18 = vpop.permute.xlu0 %838 }
  0xba   : > { %968 = vperm.xlu1 %2464, %v2780_v55  }
  0xbc   : > { %v2872_v19 = vpop.permute.xlu1 %757 }
  0xbd   : > { %v2874_v20 = vpop.permute.xlu0 %760 }
  0xbe   : > { %2466 = vset.pattern.permute.xlu1 %v2547_v5  ;;  %vm781_vm6 = vcmp.eq.s32.totalorder %v2874_v20, 1 }
  0xbf   : > { %717 = vperm.xlu1 %2466, %v2688_v6  }
  0xc1   : > { %v2878_v21 = vpop.permute.xlu0 %763  ;;  %v2880_v22 = vpop.permute.xlu1 %1048 }
  0xc2   : > { %vm782_vm14 = vcmp.eq.s32.totalorder %v2878_v21, 1 }
  0xc3   : > { %2467 = vset.pattern.permute.xlu1 %v2553_v60 }
  0xc4   : > { %1410 = vperm.xlu1 %2467, %v2688_v6  }
  0xc5   : > { %v2884_v23 = vpop.permute.xlu0 %778 }
  0xc6   : > { %v2886_v24 = vpop.permute.xlu1 %823 }
  0xc8   : > { %1413 = vperm.xlu1 %2467, %v2703_v10  }
  0xca   : > { %v2889_v25 = vpop.permute.xlu0 %1450  ;;  %v2891_v26 = vpop.permute.xlu1 %826 }
  0xcb   : > { %vm1473_vm10 = vcmp.eq.s32.totalorder %v2889_v25, 1  ;;  %vm847_vm3 = vcmp.eq.s32.totalorder %v2891_v26, 1 }
  0xcc   : > { %2468 = vset.pattern.permute.xlu1 %v2547_v5 }
  0xcd   : > { %726 = vperm.xlu1 %2468, %v2728_v16  }
  0xce   : > { %v2895_v27 = vpop.permute.xlu0 %1459 }
  0xcf   : > { %v2897_v28 = vpop.permute.xlu1 %1453 }
  0xd1   : > { %2469 = vset.pattern.permute.xlu1 %v2553_v60 }
  0xd2   : > { %1416 = vperm.xlu1 %2469, %v2714_v13   ;;  %v2901_v6 = vpop.permute.xlu0 %1468 }
  0xd4   : > { %v2903_v29 = vpop.permute.xlu1 %1490 }
  0xd6   : > { %2471 = vset.pattern.permute.xlu1 %v2547_v5  ;;  %v2926_v5 = vld [vmem:[%s3529_s5] ss:$0 sm:$0xff] }
  0xd7   : > { %729 = vperm.xlu1 %2471, %v2759_v48   ;;  %v2907_v10 = vpop.permute.xlu0 %1499 }
  0xd8   : > { %v2909_v31 = vpop.permute.xlu1 %1493 }
  0xdb   : > { %732 = vperm.xlu1 %2471, %v2742_v30   ;;  %v2912_v16 = vpop.permute.xlu0 %1502 }
  0xdd   : > { %v2914_v32 = vpop.permute.xlu1 %766 }
  0xdf   : > { %v2916_v33 = vpop.permute.xlu0 %1511  ;;  %2473 = vset.pattern.permute.xlu1 %v2553_v60 }
  0xe2   : > { %v2919_v13 = vpop.permute.xlu1 %832 }
  0xe4   : > { %v2921_v34 = vpop.permute.xlu0 %953 }
  0xe7   : > { %v1457_v35 = vpop.permute.xlu1 %1456 }
  0xe8   : > { %v2928_v36 = vpop.permute.xlu0 %959  ;;  %v2290_v30 = vpop.f32.mrf.mxu0  ;;  %vm1475_vm11 = vcmp.eq.s32.totalorder %v1457_v35, 1 }
  0xe9   : > { %v628_v38 = vmul.f32 %v2290_v30, %v2926_v5 }
  0xea   : > { %v581_v39 = vpop.f32.mrf.mxu0 }
  0xeb   : > { %v643_v40 = vadd.f32 %v2933_v37, %v628_v38  ;;  %v627_v41 = vmul.f32 %v2926_v5, %v581_v39  ;;  %v2167_v38 = vld [vmem:[%s3531_s7 + $0x18] sm:$0xff] }
  0xec   : > { %v2938_v43 = vpop.permute.xlu0 %965  ;;  %v2940_v44 = vpop.permute.xlu1 %1496  ;;  %2304 = vmatprep.subr.mxu1 %v2167_v38 }
  0xed   : > { %v2293_v46 = vpop.f32.mrf.mxu0  ;;  %v2945_v47 = vmax.f32 %v643_v40, 0.0  ;;  %v642_v48 = vadd.f32 %v2933_v37, %v627_v41  ;;  %2305 = vmatpush3.msra.mxu1 %v2167_v38 }
  0xee   : > { %v630_v49 = vmul.f32 %v2293_v46, %v2926_v5 }
  0xef   : > { %v591_v50 = vpop.f32.mrf.mxu0  ;;  %v2950_v51 = vmax.f32 %v642_v48, 0.0  ;;  %v1019_v54 = vsel %vm1011_vm9, %v2945_v47, 0.0  ;;  %v1481_v46 = vsel %vm1473_vm10, %v2945_v47, 0.0  ;;  %v800_v48 = vrot.slane %v2945_v47, 1 }
  0xf0   : > { %v645_v52 = vadd.f32 %v2933_v37, %v630_v49  ;;  %v629_v53 = vmul.f32 %v2926_v5, %v591_v50  ;;  %1076 = vrot.lane.b32.xlu1 %v1019_v54, %s3540_s21  ;;  %vm1052_vm9 = vcmp.eq.s32.totalorder %v2854_v9, 1  ;;  %vm1012_vm10 = vcmp.eq.s32.totalorder %v2839_v1, 1 }
  0xf1   : > { %v2296_v57 = vpop.f32.mrf.mxu0  ;;  %v1420_v58 = vpop.permute.xlu0 %1419  ;;  %v3538_v40 = vrot.slane %v2950_v51, 1  ;;  %v672_v54 = vrot.slane %v2950_v51, 7 }
  0xf2   : > { %v2960_v59 = vmax.f32 %v645_v52, 0.0  ;;  %v644_v60 = vadd.f32 %v2933_v37, %v629_v53  ;;  %v632_v63 = vmul.f32 %v2296_v57, %v2926_v5  ;;  %v2964_v30 = vpop.permute.xlu1 %769  ;;  %vm1436_vm0 = vcmp.eq.s32.totalorder %v1420_v58, 1 }
  0xf3   : > { %v601_v39 = vpop.f32.mrf.mxu0 }
  0xf4   : > { %v647_v41 = vadd.f32 %v2933_v37, %v632_v63  ;;  %v631_v45 = vmul.f32 %v2926_v5, %v601_v39  ;;  %v2977_v49 = vmax.f32 %v644_v60, 0.0  ;;  %1537 = vrot.lane.b32.xlu1 %v1481_v46, %s3540_s21  ;;  %v1483_v50 = vsel %vm1475_vm11, %v2960_v59, 0.0 }
  0xf5   : > { %v2299_v52 = vpop.f32.mrf.mxu0  ;;  %v1423_v53 = vpop.permute.xlu0 %1422  ;;  %1541 = vrot.lane.b32.xlu0 %v1483_v50, %s3540_s21  ;;  %v2991_v60 = vsel %vm798_vm13, %v3538_v40, %v800_v48  ;;  %v790_v39 = vsel %vm782_vm14, %v2945_v47, 0.0  ;;  %vm1513_vm14 = vcmp.eq.s32.totalorder %v2903_v29, 1 }
  0xf6   : > { %v2983_v56 = vmax.f32 %v647_v41, 0.0  ;;  %v646_v25 = vadd.f32 %v2933_v37, %v631_v45  ;;  %v634_v57 = vmul.f32 %v2299_v52, %v2926_v5  ;;  %v2993_v63 = vpop.permute.xlu1 %772  ;;  %v3539_v41 = vrot.slane %v2945_v47, 7 }
  0xf7   : > { %v611_v38 = vpop.f32.mrf.mxu0  ;;  %vm1437_vm1 = vcmp.eq.s32.totalorder %v1423_v53, 1  ;;  %v1058_v62 = vsel %vm1050_vm15, %v2991_v60, 0.0  ;;  %v855_v26 = vsel %vm847_vm3, %v2991_v60, 0.0  ;;  %v1020_v2 = vsel %vm1012_vm10, %v2977_v49, 0.0 }
  0xf8   : > { %v3001_v45 = vmax.f32 %v646_v25, 0.0  ;;  %v649_v46 = vadd.f32 %v2933_v37, %v634_v57  ;;  %v633_v50 = vmul.f32 %v2926_v5, %v611_v38  ;;  %v681_v52 = vrot.slane %v2983_v56, 7  ;;  %874 = vrot.lane.b32.xlu1 %v790_v39, %s3540_s21 }
  0xf9   : > { %v1426_v40 = vpop.permute.xlu0 %1425  ;;  %v3011_v21 = vsel %vm660_vm12, %v672_v54, %v3539_v41  ;;  %1106 = vrot.lane.b32.xlu0 %v1058_v62, %s2555_s30  ;;  %v802_v38 = vrot.slane %v2977_v49, 1  ;;  %v3548_v39 = vrot.slane %v2960_v59, 7  ;;  %vm976_vm15 = vcmp.eq.s32.totalorder %v2938_v43, 1 }
  0xfa   : > { %v679_v25 = vrot.slane %v3001_v45, 7  ;;  %v3014_v35 = vmax.f32 %v649_v46, 0.0  ;;  %v648_v5 = vadd.f32 %v2933_v37, %v633_v50  ;;  %v3018_v57 = vpop.permute.xlu1 %835  ;;  %v1018_v50 = vsel %vm1010_vm2, %v2950_v51, 0.0 }
  0xfb   : > { %vm1438_vm4 = vcmp.eq.s32.totalorder %v1426_v40, 1  ;;  %v789_v40 = vsel %vm781_vm6, %v2950_v51, 0.0  ;;  %v806_v29 = vrot.slane %v3001_v45, 1  ;;  %v3553_v43 = vrot.slane %v2945_v47, 7  ;;  %v945_v47 = vld [vmem:[%s3531_s7 + $0x10] sm:$0xff] }
  0xfc   : > { %v3026_v41 = vsel %vm660_vm12, %v3548_v39, %v679_v25  ;;  %v3028_v46 = vmax.f32 %v648_v5, 0.0  ;;  %v3031_v37 = vsel %vm660_vm12, %v679_v25, %v681_v52  ;;  %1074 = vrot.lane.b32.xlu1 %v1018_v50, %s3540_s21  ;;  %v662_v5 = vrot.slane %v3014_v35, 7  ;;  %2318 = vmatprep.subr.mxu0 %v945_v47 }
  0xfd   : > { %v3036_v62 = vsel %vm1436_vm0, %v3026_v41, 0.0  ;;  %v3040_v61 = vsel %vm1437_vm1, %v3031_v37, 0.0  ;;  %v804_v39 = vrot.slane %v2960_v59, 1  ;;  %904 = vrot.lane.b32.xlu0 %v855_v26, %s2555_s30  ;;  %vm974_vm0 = vcmp.eq.s32.totalorder %v2928_v36, 1  ;;  %2319 = vmatpush3.msra.mxu0 %v945_v47 }
  0xfe   : > { %3549 = vst [vmem:[#allocation6_spill] sm:$0xff] %v3036_v62  ;;  %3550 = vst [vmem:[#allocation7_spill] sm:$0xff] %v3040_v61  ;;  %v661_v25 = vrot.slane %v3028_v46, 7  ;;  %v3048_v58 = vpop.permute.xlu0 %720  ;;  %v3051_v62 = vsel %vm798_vm13, %v800_v48, %v802_v38  ;;  %v3055_v53 = vsel %vm660_vm12, %v662_v5, %v672_v54  ;;  %vm1474_vm1 = vcmp.eq.s32.totalorder %v2897_v28, 1  ;;  %v944_v28 = vld [vmem:[%s3531_s7 + $0x8] sm:$0xff] }
  0xff   : > { %v3057_v50 = vpop.permute.xlu1 %1462  ;;  %v1059_v48 = vsel %vm1051_vm7, %v3051_v62, 0.0  ;;  %v3073_v54 = vsel %vm798_vm13, %v802_v38, %v804_v39  ;;  %vm780_vm2 = vcmp.eq.s32.totalorder %v2872_v19, 1  ;;  %v1482_v36 = vsel %vm1474_vm1, %v2977_v49, 0.0  ;;  %2320 = vmatprep.subr.mxu0 %v944_v28 }
 0x100   : > { %v3061_v61 = vsel %vm660_vm12, %v681_v52, %v661_v25  ;;  %872 = vrot.lane.b32.xlu1 %v789_v40, %s3540_s21  ;;  %v1021_v52 = vsel %vm1013_vm8, %v2960_v59, 0.0  ;;  %v1060_v40 = vsel %vm1052_vm9, %v3073_v54, 0.0  ;;  %v3096_v1 = vsel %vm660_vm12, %v661_v25, %v662_v5  ;;  %2321 = vmatpush3.msra.mxu0 %v944_v28 }
 0x101   : > { %v3065_v26 = vsel %vm1438_vm4, %v3061_v61, 0.0  ;;  %1108 = vrot.lane.b32.xlu0 %v1059_v48, %s2555_s30  ;;  %v3115_v5 = vsel %vm976_vm15, %v3061_v61, 0.0  ;;  %v788_v25 = vsel %vm780_vm2, %v3014_v35, 0.0  ;;  %v3128_v19 = vsel %vm974_vm0, %v3026_v41, 0.0 }
 0x102   : > { %3551 = vst [vmem:[#allocation8_spill] sm:$0xff] %v3065_v26  ;;  %v3070_v20 = vpop.permute.xlu0 %723  ;;  %v675_v26 = vrot.slane %v2977_v49, 7  ;;  %vm1053_vm3 = vcmp.eq.s32.totalorder %v2846_v4, 1  ;;  %vm1015_vm4 = vcmp.eq.s32.totalorder %v2844_v3, 1  ;;  %vm1054_vm6 = vcmp.eq.s32.totalorder %v2857_v11, 1 }
 0x103   : > { %v3076_v0 = vpop.permute.xlu1 %1465  ;;  %v1023_v4 = vsel %vm1015_vm4, %v2983_v56, 0.0  ;;  %v796_v47 = vrot.slane %v3014_v35, 1  ;;  %vm1514_vm7 = vcmp.eq.s32.totalorder %v2909_v31, 1  ;;  %vm1016_vm8 = vcmp.eq.s32.totalorder %v2849_v7, 1 }
 0x104   : > { %1080 = vrot.lane.b32.xlu1 %v1021_v52, %s3540_s21  ;;  %v1521_v52 = vsel %vm1513_vm14, %v3051_v62, 0.0  ;;  %v1522_v3 = vsel %vm1514_vm7, %v3073_v54, 0.0  ;;  %v1024_v11 = vsel %vm1016_vm8, %v3028_v46, 0.0  ;;  %vm848_vm9 = vcmp.eq.s32.totalorder %v2864_v15, 1 }
 0x105   : > { %1110 = vrot.lane.b32.xlu0 %v1060_v40, %s2555_s30  ;;  %v3552_v40 = vrot.slane %v2960_v59, 7  ;;  %vm846_vm10 = vcmp.eq.s32.totalorder %v2886_v24, 1  ;;  %v856_v7 = vsel %vm848_vm9, %v3051_v62, 0.0  ;;  %vm1055_vm14 = vcmp.eq.s32.totalorder %v2862_v14, 1 }
 0x106   : > { %v736_v48 = vpop.permute.xlu0 %735  ;;  %vm1014_vm15 = vcmp.eq.s32.totalorder %v2851_v8, 1  ;;  %vm1056_vm0 = vcmp.eq.s32.totalorder %v2859_v12, 1  ;;  %vm1017_vm1 = vcmp.eq.s32.totalorder %v2867_v17, 1  ;;  %vm784_vm2 = vcmp.eq.s32.totalorder %v2964_v30, 1 }
 0x107   : > { %vm746_vm11 = vcmp.eq.s32.totalorder %v736_v48, 1  ;;  %v3104_v48 = vsel %vm660_vm12, %v675_v26, %v3552_v40  ;;  %v808_v40 = vrot.slane %v2983_v56, 1  ;;  %v792_v17 = vsel %vm784_vm2, %v2960_v59, 0.0 }
 0x108   : > { %v3086_v38 = vpop.permute.xlu1 %775  ;;  %v3089_v9 = vsel %vm746_vm11, %v3031_v37, 0.0  ;;  %1078 = vrot.lane.b32.xlu1 %v1020_v2, %s3540_s21  ;;  %v3109_v2 = vsel %vm660_vm12, %v3553_v43, %v675_v26  ;;  %v3131_v26 = vsel %vm798_vm13, %v804_v39, %v806_v29  ;;  %vm783_vm12 = vcmp.eq.s32.totalorder %v2914_v32, 1  ;;  %v943_v39 = vld [vmem:[%s3531_s7] sm:$0xff] }
 0x109   : > { %1569 = vrot.lane.b32.xlu0 %v1521_v52, %s2555_s30  ;;  %v791_v43 = vsel %vm783_vm12, %v2977_v49, 0.0  ;;  %v3147_v32 = vsel %vm798_vm13, %v806_v29, %v808_v40  ;;  %2322 = vmatprep.subr.mxu0 %v943_v39  ;;  %v810_v29 = vrot.slane %v3028_v46, 1  ;;  %vm849_vm11 = vcmp.eq.s32.totalorder %v2919_v13, 1 }
 0x10a   : > { %2323 = vmatpush3.msra.mxu0 %v943_v39  ;;  %v1062_v49 = vsel %vm1054_vm6, %v3147_v32, 0.0  ;;  %v857_v15 = vsel %vm849_vm11, %v3073_v54, 0.0  ;;  %v1022_v13 = vsel %vm1014_vm15, %v3001_v45, 0.0  ;;  %vm1057_vm12 = vcmp.eq.s32.totalorder %v2880_v22, 1 }
 0x10b   : > { %vm1515_vm6 = vcmp.eq.s32.totalorder %v2940_v44, 1  ;;  %vm850_vm7 = vcmp.eq.s32.totalorder %v3018_v57, 1  ;;  %vm1477_vm9 = vcmp.eq.s32.totalorder %v3057_v50, 1  ;;  %vm785_vm11 = vcmp.eq.s32.totalorder %v2993_v63, 1 }
 0x10c   : > { %1539 = vrot.lane.b32.xlu1 %v1482_v36, %s3540_s21  ;;  %v1061_v36 = vsel %vm1053_vm3, %v3131_v26, 0.0  ;;  %vm1516_vm3 = vcmp.eq.s32.totalorder %v2907_v10, 1  ;;  %v1523_v59 = vsel %vm1515_vm6, %v3131_v26, 0.0  ;;  %v1485_v57 = vsel %vm1477_vm9, %v2983_v56, 0.0 }
 0x10d   : > { %v3119_v52 = vpop.permute.xlu1 %1505  ;;  %870 = vrot.lane.b32.xlu0 %v788_v25, %s3540_s21  ;;  %v1524_v22 = vsel %vm1516_vm3, %v3147_v32, 0.0  ;;  %v793_v50 = vsel %vm785_vm11, %v3001_v45, 0.0  ;;  %vm1478_vm2 = vcmp.eq.s32.totalorder %v3076_v0, 1  ;;  %vm1479_vm6 = vcmp.eq.s32.totalorder %v2901_v6, 1 }
 0x110   : > { %876 = vrot.lane.b32.xlu1 %v791_v43, %s3540_s21  ;;  %v3554_v43 = vrot.slane %v2950_v51, 1 }
 0x111   : > { %1112 = vrot.lane.b32.xlu0 %v1061_v36, %s2555_s30 }
 0x112   : > { %v3144_v25 = vpop.permute.xlu1 %841  ;;  %v3168_v36 = vsel %vm798_vm13, %v796_v47, %v3554_v43 }
 0x113   : > { %v854_v39 = vsel %vm846_vm10, %v3168_v36, 0.0 }
 0x114   : > { %1084 = vrot.lane.b32.xlu1 %v1023_v4, %s3540_s21  ;;  %v3180_v4 = vld [vmem:[%s3531_s7 + $0x40] sm:$0xff] }
 0x115   : > { %1114 = vrot.lane.b32.xlu0 %v1062_v49, %s2555_s30  ;;  %v3183_v49 = vsel %vm798_vm13, %v808_v40, %v810_v29  ;;  %2336 = vmatprep.subr.mxu1 %v3180_v4  ;;  %v1025_v40 = vsel %vm1017_vm1, %v3014_v35, 0.0  ;;  %vm851_vm1 = vcmp.eq.s32.totalorder %v2869_v18, 1  ;;  %v1486_v18 = vsel %vm1478_vm2, %v3028_v46, 0.0 }
 0x116   : > { %v3156_v28 = vpop.permute.xlu1 %844  ;;  %v1063_v62 = vsel %vm1055_vm14, %v3183_v49, 0.0  ;;  %vm1517_vm14 = vcmp.eq.s32.totalorder %v2912_v16, 1  ;;  %v859_v16 = vsel %vm851_vm1, %v3147_v32, 0.0  ;;  %vm926_vm1 = vcmask 64512  }
 0x117   : > { %v1525_v43 = vsel %vm1517_vm14, %v3183_v49, 0.0  ;;  %vm853_vm9 = vcmp.eq.s32.totalorder %v3156_v28, 1  ;;  %vm1150_vm2 = vcmask 195584  }
 0x118   : > { %1571 = vrot.lane.b32.xlu1 %v1522_v3, %s2555_s30  ;;  %v3195_v3 = vsel %vm798_vm13, %v810_v29, %v796_v47  ;;  %vm1476_vm13 = vcmp.eq.s32.totalorder %v2895_v27, 1  ;;  %v1065_v47 = vsel %vm1057_vm12, %v3168_v36, 0.0  ;;  %v858_v29 = vsel %vm850_vm7, %v3131_v26, 0.0 }
 0x119   : > { %1086 = vrot.lane.b32.xlu0 %v1024_v11, %s3540_s21  ;;  %v1064_v14 = vsel %vm1056_vm0, %v3195_v3, 0.0  ;;  %v1484_v8 = vsel %vm1476_vm13, %v3001_v45, 0.0  ;;  %vm1518_vm0 = vcmp.eq.s32.totalorder %v3119_v52, 1  ;;  %vm852_vm12 = vcmp.eq.s32.totalorder %v3144_v25, 1 }
 0x11a   : > { %v1526_v63 = vsel %vm1518_vm0, %v3195_v3, 0.0  ;;  %v860_v32 = vsel %vm852_vm12, %v3183_v49, 0.0  ;;  %v861_v49 = vsel %vm853_vm9, %v3195_v3, 0.0 }
 0x11b   : > { %v3171_v31 = vpop.permute.xlu1 %1471 }
 0x11c   : > { %906 = vrot.lane.b32.xlu1 %v856_v7, %s2555_s30  ;;  %vm1480_vm11 = vcmp.eq.s32.totalorder %v3171_v31, 1 }
 0x11d   : > { %902 = vrot.lane.b32.xlu0 %v854_v39, %s2555_s30  ;;  %v1487_v39 = vsel %vm1479_vm6, %v3014_v35, 0.0  ;;  %vm742_vm6 = vcmp.eq.s32.totalorder %v3070_v20, 1 }
 0x120   : > { %v3190_v24 = vpop.permute.xlu1 %1508  ;;  %908 = vrot.lane.b32.xlu1 %v857_v15, %s2555_s30 }
 0x121   : > { %1116 = vrot.lane.b32.xlu0 %v1063_v62, %s2555_s30  ;;  %vm1519_vm7 = vcmp.eq.s32.totalorder %v3190_v24, 1  ;;  %v3300_v62 = vpop.permute.xlu0 %738 }
 0x122   : > { %v1527_v6 = vsel %vm1519_vm7, %v3168_v36, 0.0  ;;  %vm747_vm9 = vcmp.eq.s32.totalorder %v3300_v62, 1 }
 0x124   : > { %1082 = vrot.lane.b32.xlu1 %v1022_v13, %s3540_s21 }
 0x125   : > { %v3203_v54 = vpop.permute.xlu1 %947  ;;  %1118 = vrot.lane.b32.xlu0 %v1064_v14, %s2555_s30 }
 0x128   : > { %1088 = vrot.lane.b32.xlu1 %v1025_v40, %s3540_s21 }
 0x129   : > { %v3211_v12 = vpop.permute.xlu1 %950  ;;  %1543 = vrot.lane.b32.xlu0 %v1484_v8, %s3540_s21 }
 0x12a   : > { %vm971_vm12 = vcmp.eq.s32.totalorder %v3211_v12, 1 }
 0x12c   : > { %1120 = vrot.lane.b32.xlu1 %v1065_v47, %s2555_s30  ;;  %v979_v47 = vsel %vm971_vm12, %v3011_v21, 0.0 }
 0x12d   : > { %v957_v27 = vpop.permute.xlu1 %956  ;;  %878 = vrot.lane.b32.xlu0 %v792_v17, %s3540_s21 }
 0x12e   : > { %vm973_vm4 = vcmp.eq.s32.totalorder %v957_v27, 1 }
 0x12f   : > { %v3222_v11 = vsel %vm973_vm4, %v3104_v48, 0.0  ;;  %vm786_vm4 = vcmp.eq.s32.totalorder %v3086_v38, 1 }
 0x130   : > { %1428 = vperm.xlu1 %2473, %v2752_v42   ;;  %v794_v25 = vsel %vm786_vm4, %v2983_v56, 0.0  ;;  %vm741_vm4 = vcmp.eq.s32.totalorder %v3048_v58, 1 }
 0x131   : > { %v963_v30 = vpop.permute.xlu1 %962  ;;  %1575 = vrot.lane.b32.xlu0 %v1524_v22, %s2555_s30 }
 0x132   : > { %vm975_vm8 = vcmp.eq.s32.totalorder %v963_v30, 1  ;;  %v2187_v30 = vld [vmem:[%s3531_s7 + $0x38] sm:$0xff] }
 0x133   : > { %v3230_v10 = vsel %vm975_vm8, %v3031_v37, 0.0  ;;  %vm787_vm8 = vcmp.eq.s32.totalorder %v2884_v23, 1 }
 0x134   : > { %1573 = vrot.lane.b32.xlu1 %v1523_v59, %s2555_s30  ;;  %v795_v38 = vsel %vm787_vm8, %v3028_v46, 0.0  ;;  %v1488_v46 = vsel %vm1480_vm11, %v2950_v51, 0.0  ;;  %v2186_v59 = vld [vmem:[%s3531_s7 + $0x30] sm:$0xff] }
 0x135   : > { %v969_v44 = vpop.permute.xlu1 %968  ;;  %910 = vrot.lane.b32.xlu0 %v858_v29, %s2555_s30 }
 0x136   : > { %vm977_vm10 = vcmp.eq.s32.totalorder %v969_v44, 1 }
 0x137   : > { %v3238_v42 = vsel %vm977_vm10, %v3096_v1, 0.0 }
 0x138   : > { %1431 = vperm.xlu1 %2473, %v2780_v55  }
 0x139   : > { %1545 = vrot.lane.b32.xlu0 %v1485_v57, %s3540_s21 }
 0x13a   : > { %v718_v37 = vpop.permute.xlu1 %717 }
 0x13b   : > { %vm740_vm15 = vcmp.eq.s32.totalorder %v718_v37, 1 }
 0x13c   : > { %v3247_v26 = vsel %vm740_vm15, %v3096_v1, 0.0  ;;  %880 = vrot.lane.b32.xlu1 %v793_v50, %s3540_s21  ;;  %vm1520_vm15 = vcmp.eq.s32.totalorder %v2916_v33, 1 }
 0x13d   : > { %1577 = vrot.lane.b32.xlu0 %v1525_v43, %s2555_s30  ;;  %v1528_v31 = vsel %vm1520_vm15, %v2991_v60, 0.0 }
 0x13f   : > { %v1411_v55 = vpop.permute.xlu1 %1410 }
 0x140   : > { %vm1433_vm13 = vcmp.eq.s32.totalorder %v1411_v55, 1  ;;  %912 = vrot.lane.b32.xlu1 %v859_v16, %s2555_s30 }
 0x141   : > { %v3258_v45 = vsel %vm1433_vm13, %v3011_v21, 0.0  ;;  %1579 = vrot.lane.b32.xlu0 %v1526_v63, %s2555_s30  ;;  %vm970_vm13 = vcmp.eq.s32.totalorder %v3203_v54, 1 }
 0x143   : > { %v1414_v52 = vpop.permute.xlu1 %1413 }
 0x144   : > { %vm1434_vm3 = vcmp.eq.s32.totalorder %v1414_v52, 1  ;;  %1547 = vrot.lane.b32.xlu1 %v1486_v18, %s3540_s21 }
 0x145   : > { %v3267_v0 = vsel %vm1434_vm3, %v3109_v2, 0.0  ;;  %914 = vrot.lane.b32.xlu0 %v860_v32, %s2555_s30  ;;  %vm972_vm3 = vcmp.eq.s32.totalorder %v2921_v34, 1 }
 0x146   : > { %v980_v57 = vsel %vm972_vm3, %v3109_v2, 0.0 }
 0x148   : > { %v3273_v7 = vpop.permute.xlu1 %726  ;;  %882 = vrot.lane.b32.xlu1 %v794_v25, %s3540_s21 }
 0x149   : > { %1549 = vrot.lane.b32.xlu0 %v1487_v39, %s3540_s21  ;;  %vm743_vm7 = vcmp.eq.s32.totalorder %v3273_v7, 1 }
 0x14a   : > { %v751_v58 = vsel %vm743_vm7, %v3109_v2, 0.0 }
 0x14c   : > { %884 = vrot.lane.b32.xlu1 %v795_v38, %s3540_s21  ;;  %v749_v38 = vsel %vm741_vm4, %v3055_v53, 0.0 }
 0x14d   : > { %v1417_v56 = vpop.permute.xlu1 %1416  ;;  %1581 = vrot.lane.b32.xlu0 %v1527_v6, %s2555_s30 }
 0x14e   : > { %vm1435_vm10 = vcmp.eq.s32.totalorder %v1417_v56, 1 }
 0x14f   : > { %v1443_v35 = vsel %vm1435_vm10, %v3104_v48, 0.0 }
 0x150   : > { %916 = vrot.lane.b32.xlu1 %v861_v49, %s2555_s30  ;;  %v750_v49 = vsel %vm742_vm6, %v3011_v21, 0.0 }
 0x152   : > { %v730_v23 = vpop.permute.xlu1 %729 }
 0x153   : > { %vm744_vm14 = vcmp.eq.s32.totalorder %v730_v23, 1 }
 0x154   : > { %v3291_v28 = vsel %vm744_vm14, %v3104_v48, 0.0  ;;  %1551 = vrot.lane.b32.xlu1 %v1488_v46, %s3540_s21 }
 0x156   : > { %v733_v36 = vpop.permute.xlu1 %732 }
 0x157   : > { %vm745_vm0 = vcmp.eq.s32.totalorder %v733_v36, 1 }
 0x158   : > { %v3296_v15 = vsel %vm745_vm0, %v3026_v41, 0.0  ;;  %1583 = vrot.lane.b32.xlu1 %v1528_v31, %s2555_s30  ;;  %v978_v41 = vsel %vm970_vm13, %v3055_v53, 0.0  ;;  %s2152_s30 = sshll.u32 %s432_s23, 6 }
 0x159   : > { %s3462_s15 = scalar_lea.vmem [#allocation2], %s2152_s30  ;;  %s2556_s30 = smov [#allocation2]  }
 0x15a   : > { %s2086_s16 = sshll.u32 %s3462_s15, 4  ;;  %s3478_s16 = int_to_ptr.vmem [resolvable:$true] %s2086_s16 }
 0x15b   : > { %s2483_s22 = scalar_lea.vmem %s3478_s16, 1024 }
 0x15c   : > { %p2484_p11 = scmp.ne.s32.totalorder %s3478_s16, %s2483_s22 }
 0x15e   : > { %p2485_p12 = pnand %p2484_p11, %p2666_p5 }
 0x160   : > { %p2486_p13 = pneg %p2485_p12 }
 0x162   : > { %v1077_v24 = vpop.permute.xlu1 %1076 }
 0x163   : > { %v1131_v27 = vsel %vm926_vm1, %v979_v47, %v1077_v24 }
 0x166   : > { %v3302_v51 = vpop.permute.xlu1 %1537 }
 0x167   : > { %v1542_v48 = vpop.permute.xlu0 %1541 }
 0x168   : > { %v3305_v33 = vsel %vm926_vm1, %v1443_v35, %v1542_v48 }
 0x16a   : > { %v875_v3 = vpop.permute.xlu1 %874 }
 0x16b   : > { %v1107_v13 = vpop.permute.xlu0 %1106  ;;  %v929_v46 = vsel %vm926_vm1, %v750_v49, %v875_v3 }
 0x16e   : > { %v1075_v14 = vpop.permute.xlu1 %1074 }
 0x16f   : > { %v1130_v60 = vsel %vm926_vm1, %v978_v41, %v1075_v14  ;;  %v905_v40 = vpop.permute.xlu0 %904 }
 0x170   : > { %v1138_v8 = vsel %vm490_vm5, %v1130_v60, %v1107_v13 }
 0x171   : > { %2306 = vmatprep.mubr.msk.f32.mxu1 %vm1150_vm2, %v1138_v8 }
 0x172   : > { %v873_v17 = vpop.permute.xlu1 %872 }
 0x173   : > { %v1109_v54 = vpop.permute.xlu0 %1108  ;;  %v928_v6 = vsel %vm926_vm1, %v749_v38, %v873_v17 }
 0x174   : > { %v1139_v22 = vsel %vm490_vm5, %v1131_v27, %v1109_v54  ;;  %v936_v36 = vsel %vm490_vm5, %v928_v6, %v905_v40  ;;  %v3557_v6 = vld [vmem:[#allocation8_spill] sm:$0xff] }
 0x175   : > { %2307 = vmatmul.mubr.msk.f32.vlgmr.msra.gmra.mxu1 %vm1150_vm2, %v1139_v22 }
 0x176   : > { %v1081_v12 = vpop.permute.xlu1 %1080  ;;  %2337 = vmatpush3.msra.mxu1 %v3180_v4 }
 0x177   : > { %v1111_v29 = vpop.permute.xlu0 %1110  ;;  %2338 = vmatprep.subr.mxu1 %v2187_v30  ;;  %v1133_v34 = vsel %vm926_vm1, %v3222_v11, %v1081_v12 }
 0x178   : > { %2339 = vmatpush3.msra.mxu1 %v2187_v30 }
 0x179   : > { %2340 = vmatprep.subr.mxu1 %v2186_v59 }
 0x17a   : > { %v1079_v44 = vpop.permute.xlu1 %1078  ;;  %2341 = vmatpush3.msra.mxu1 %v2186_v59 }
 0x17b   : > { %v1132_v37 = vsel %vm926_vm1, %v980_v57, %v1079_v44  ;;  %v1570_v50 = vpop.permute.xlu0 %1569  ;;  %v3555_v57 = vld [vmem:[#allocation6_spill] sm:$0xff] }
 0x17c   : > { %v1140_v43 = vsel %vm490_vm5, %v1132_v37, %v1111_v29 }
 0x17d   : > { %2309 = vmatprep.mubr.msk.f32.mxu1 %vm1150_vm2, %v1140_v43  ;;  %v3556_v43 = vld [vmem:[#allocation7_spill] sm:$0xff] }
 0x17e   : > { %v1540_v4 = vpop.permute.xlu1 %1539 }
 0x17f   : > { %v871_v55 = vpop.permute.xlu0 %870  ;;  %v1594_v54 = vsel %vm926_vm1, %v3267_v0, %v1540_v4 }
 0x180   : > { %v927_v56 = vsel %vm926_vm1, %v3247_v26, %v871_v55 }
 0x182   : > { %v877_v16 = vpop.permute.xlu1 %876 }
 0x183   : > { %v1113_v63 = vpop.permute.xlu0 %1112  ;;  %v930_v20 = vsel %vm926_vm1, %v751_v58, %v877_v16 }
 0x184   : > { %v1141_v52 = vsel %vm490_vm5, %v1133_v34, %v1113_v63 }
 0x185   : > { %2310 = vmatmul.mubr.msk.f32.gmra.mxu1 %vm1150_vm2, %v1141_v52 }
 0x186   : > { %v1085_v18 = vpop.permute.xlu1 %1084 }
 0x187   : > { %v1115_v32 = vpop.permute.xlu0 %1114  ;;  %v1135_v3 = vsel %vm926_vm1, %v3230_v10, %v1085_v18 }
 0x18a   : > { %v1572_v25 = vpop.permute.xlu1 %1571 }
 0x18b   : > { %v1087_v39 = vpop.permute.xlu0 %1086  ;;  %v1602_v22 = vsel %vm490_vm5, %v1594_v54, %v1572_v25 }
 0x18c   : > { %v1136_v41 = vsel %vm926_vm1, %v3115_v5, %v1087_v39  ;;  %v1593_v5 = vsel %vm926_vm1, %v3258_v45, %v3302_v51 }
 0x18d   : > { %v1601_v27 = vsel %vm490_vm5, %v1593_v5, %v1570_v50 }
 0x18e   : > { %v907_v11 = vpop.permute.xlu1 %906 }
 0x18f   : > { %v903_v35 = vpop.permute.xlu0 %902  ;;  %v937_v7 = vsel %vm490_vm5, %v929_v46, %v907_v11  ;;  %v755_v46 = vsel %vm747_vm9, %v3061_v61, 0.0  ;;  %v2475_v61 = vld [vmem:[%s2719_s4] sm:$0xff] }
 0x190   : > { %v935_v23 = vsel %vm490_vm5, %v927_v56, %v903_v35 }
 0x191   : > { %2324 = vmatprep.mubr.msk.f32.mxu0 %vm1150_vm2, %v935_v23 }
 0x192   : > { %2325 = vmatmul.mubr.msk.f32.vlgmr.msra.gmra.mxu0 %vm1150_vm2, %v936_v36  ;;  %v909_v26 = vpop.permute.xlu1 %908 }
 0x193   : > { %v938_v31 = vsel %vm490_vm5, %v930_v20, %v909_v26  ;;  %v1117_v21 = vpop.permute.xlu0 %1116  ;;  %2327 = vmatprep.mubr.msk.f32.mxu0 %vm1150_vm2, %v937_v7 }
 0x194   : > { %v1143_v14 = vsel %vm490_vm5, %v1135_v3, %v1117_v21  ;;  %v2477_v3 = vld [vmem:[%s2719_s4 + $0x10] sm:$0xff] }
 0x196   : > { %2328 = vmatmul.mubr.msk.f32.gmra.mxu0 %vm1150_vm2, %v938_v31  ;;  %v1083_v2 = vpop.permute.xlu1 %1082 }
 0x197   : > { %v1134_v24 = vsel %vm926_vm1, %v3128_v19, %v1083_v2  ;;  %v1119_v48 = vpop.permute.xlu0 %1118  ;;  %v1788_v2 = vld [vmem:[%s3534_s10] sm:$0xff] }
 0x198   : > { %v1142_v13 = vsel %vm490_vm5, %v1134_v24, %v1115_v32  ;;  %v1144_v60 = vsel %vm490_vm5, %v1136_v41, %v1119_v48  ;;  %2354 = vmatprep.subr.mxu0 %v1788_v2  ;;  %v1925_v24 = vld [vmem:[%s3536_s12] sm:$0xff]  ;;  %v2476_v48 = vld [vmem:[%s2719_s4 + $0x8] sm:$0xff] }
 0x199   : > { %2312 = vmatprep.mubr.msk.f32.mxu1 %vm1150_vm2, %v1142_v13  ;;  %2355 = vmatpush3.msra.mxu0 %v1788_v2  ;;  %v2478_v13 = vld [vmem:[%s2719_s4 + $0x18] sm:$0xff]  ;;  %v2479_v41 = vld [vmem:[%s2719_s4 + $0x20] sm:$0xff] }
 0x19a   : > { %v1089_v40 = vpop.permute.xlu1 %1088  ;;  %2313 = vmatmul.mubr.msk.f32.gmra.mxu1 %vm1150_vm2, %v1143_v14  ;;  %v2480_v14 = vld [vmem:[%s2719_s4 + $0x28] sm:$0xff] }
 0x19b   : > { %v1544_v8 = vpop.permute.xlu0 %1543  ;;  %2315 = vmatprep.mubr.msk.f32.mxu1 %vm1150_vm2, %v1144_v60  ;;  %v1137_v19 = vsel %vm926_vm1, %v3238_v42, %v1089_v40  ;;  %v2481_v60 = vld [vmem:[%s2719_s4 + $0x30] sm:$0xff]  ;;  %v2482_v40 = vld [vmem:[%s2719_s4 + $0x38] sm:$0xff]  ;;  %s2487_s4 = sshll.u32 %s2556_s30, 4  ;;  %s2488_s4 = int_to_ptr.vmem [resolvable:$false] %s2487_s4 }
 0x19c   : > { %v1596_v0 = vsel %vm926_vm1, %v3555_v57, %v1544_v8  ;;  %v2198_v57 = vld [vmem:[%s3533_s9] ss:$0 sm:$0xff]  ;;  %s2489_s17 = scalar_lea.vmem %s2488_s4, 2048  ;;  %p2490_p0 = scmp.lt.s32.totalorder %s3478_s16, %s2488_s4 }
 0x19d   : > { %p2491_p1 = scmp.lt.s32.totalorder %s2489_s17, %s2483_s22 }
 0x19e   : > { %v1121_v10 = vpop.permute.xlu1 %1120 }
 0x19f   : > { %v1145_v47 = vsel %vm490_vm5, %v1137_v19, %v1121_v10  ;;  %v879_v17 = vpop.permute.xlu0 %878  ;;  %p2492_p2 = por %p2491_p1, %p2490_p0 }
 0x1a0   : > { %2316 = vmatmul.mubr.msk.f32.gmra.mxu1 %vm1150_vm2, %v1145_v47  ;;  %v931_v45 = vsel %vm926_vm1, %v3291_v28, %v879_v17 }
 0x1a1   : > { %2342 = vmatprep.mubr.msk.f32.mxu1 %vm1150_vm2, %v1601_v27  ;;  %p2493_p3 = pnand %p2492_p2, %p2486_p13 }
 0x1a3   : > { %v1576_v42 = vpop.permute.xlu0 %1575 }
 0x1a4   : > { %2343 = vmatmul.mubr.msk.f32.vlgmr.msra.gmra.mxu1 %vm1150_vm2, %v1602_v22  ;;  %v1604_v50 = vsel %vm490_vm5, %v1596_v0, %v1576_v42 }
 0x1a7   : > { %v911_v51 = vpop.permute.xlu0 %910 }
 0x1a8   : > { %v939_v30 = vsel %vm490_vm5, %v931_v45, %v911_v51 }
 0x1a9   : > { %2330 = vmatprep.mubr.msk.f32.mxu0 %vm1150_vm2, %v939_v30  ;;  %v2197_v30 = vld [vmem:[%s3532_s8] ss:$0 sm:$0xff] }
 0x1ab   : > { %v1546_v12 = vpop.permute.xlu0 %1545  ;;  %v1429_v59 = vpop.permute.xlu1 %1428 }
 0x1ac   : > { %v1597_v28 = vsel %vm926_vm1, %v3556_v43, %v1546_v12  ;;  %vm1439_vm8 = vcmp.eq.s32.totalorder %v1429_v59, 1 }
 0x1ad   : > { %v1447_v38 = vsel %vm1439_vm8, %v3096_v1, 0.0 }
 0x1af   : > { %v1578_v29 = vpop.permute.xlu0 %1577  ;;  %v1574_v44 = vpop.permute.xlu1 %1573 }
 0x1b0   : > { %v1603_v37 = vsel %vm490_vm5, %v3305_v33, %v1574_v44  ;;  %v1605_v4 = vsel %vm490_vm5, %v1597_v28, %v1578_v29 }
 0x1b1   : > { %2345 = vmatprep.mubr.msk.f32.mxu1 %vm1150_vm2, %v1603_v37 }
 0x1b2   : > { %2346 = vmatmul.mubr.msk.f32.gmra.mxu1 %vm1150_vm2, %v1604_v50 }
 0x1b3   : > { %v1580_v55 = vpop.permute.xlu0 %1579  ;;  %v1432_v16 = vpop.permute.xlu1 %1431  ;;  %2348 = vmatprep.mubr.msk.f32.mxu1 %vm1150_vm2, %v1605_v4 }
 0x1b4   : > { %vm1440_vm10 = vcmp.eq.s32.totalorder %v1432_v16, 1 }
 0x1b7   : > { %v915_v34 = vpop.permute.xlu0 %914  ;;  %v881_v63 = vpop.permute.xlu1 %880 }
 0x1b8   : > { %v932_v33 = vsel %vm926_vm1, %v3296_v15, %v881_v63 }
 0x1bb   : > { %v1550_v52 = vpop.permute.xlu0 %1549  ;;  %v913_v18 = vpop.permute.xlu1 %912 }
 0x1bc   : > { %v940_v32 = vsel %vm490_vm5, %v932_v33, %v913_v18  ;;  %v1599_v56 = vsel %vm926_vm1, %v1447_v38, %v1550_v52 }
 0x1bd   : > { %2331 = vmatmul.mubr.msk.f32.gmra.mxu0 %vm1150_vm2, %v940_v32 }
 0x1bf   : > { %v1582_v25 = vpop.permute.xlu0 %1581  ;;  %v1548_v39 = vpop.permute.xlu1 %1547 }
 0x1c0   : > { %v1598_v11 = vsel %vm926_vm1, %v3557_v6, %v1548_v39  ;;  %v1607_v15 = vsel %vm490_vm5, %v1599_v56, %v1582_v25 }
 0x1c1   : > { %v1606_v35 = vsel %vm490_vm5, %v1598_v11, %v1580_v55 }
 0x1c2   : > { %2349 = vmatmul.mubr.msk.f32.gmra.mxu1 %vm1150_vm2, %v1606_v35 }
 0x1c3   : > { %v883_v49 = vpop.permute.xlu1 %882  ;;  %2351 = vmatprep.mubr.msk.f32.mxu1 %vm1150_vm2, %v1607_v15 }
 0x1c4   : > { %v933_v23 = vsel %vm926_vm1, %v3089_v9, %v883_v49  ;;  %v1448_v9 = vsel %vm1440_vm10, %v3055_v53, 0.0  ;;  %v1926_v53 = vld [vmem:[%s3536_s12 + $0x8] sm:$0xff] }
 0x1c5   : > { %v941_v58 = vsel %vm490_vm5, %v933_v23, %v915_v34  ;;  %2368 = vmatprep.subr.mxu1 %v1926_v53 }
 0x1c6   : > { %2333 = vmatprep.mubr.msk.f32.mxu0 %vm1150_vm2, %v941_v58  ;;  %2369 = vmatpush3.msra.mxu1 %v1926_v53 }
 0x1c7   : > { %v885_v1 = vpop.permute.xlu1 %884  ;;  %2370 = vmatprep.subr.mxu1 %v1925_v24 }
 0x1c8   : > { %v934_v36 = vsel %vm926_vm1, %v755_v46, %v885_v1  ;;  %2371 = vmatpush3.msra.mxu1 %v1925_v24 }
 0x1cb   : > { %v917_v20 = vpop.permute.xlu1 %916 }
 0x1cc   : > { %v942_v7 = vsel %vm490_vm5, %v934_v36, %v917_v20 }
 0x1cd   : > { %2334 = vmatmul.mubr.msk.f32.gmra.mxu0 %vm1150_vm2, %v942_v7 }
 0x1cf   : > { %v1552_v26 = vpop.permute.xlu1 %1551 }
 0x1d0   : > { %v1600_v31 = vsel %vm926_vm1, %v1448_v9, %v1552_v26 }
 0x1d3   : > { %v1584_v21 = vpop.permute.xlu1 %1583 }
 0x1d4   : > { %v1608_v62 = vsel %vm490_vm5, %v1600_v31, %v1584_v21 }
 0x1d5   : > { %2352 = vmatmul.mubr.msk.f32.gmra.mxu1 %vm1150_vm2, %v1608_v62 }
 0x1d6   : > { %2372 = vmatprep.mubr.msk.f32.mxu1 %vm490_vm5, %v2475_v61 }
 0x1d9   : > { %2373 = vmatmul.mubr.msk.f32.vlgmr.msra.gmra.mxu1 %vm490_vm5, %v2476_v48 }
 0x1da   : > { %2375 = vmatprep.mubr.msk.f32.mxu1 %vm490_vm5, %v2477_v3 }
 0x1dd   : > { %2376 = vmatmul.mubr.msk.f32.gmra.mxu1 %vm490_vm5, %v2478_v13 }
 0x1de   : > { %2378 = vmatprep.mubr.msk.f32.mxu1 %vm490_vm5, %v2479_v41 }
 0x1e1   : > { %2379 = vmatmul.mubr.msk.f32.gmra.mxu1 %vm490_vm5, %v2480_v14 }
 0x1e2   : > { %2381 = vmatprep.mubr.msk.f32.mxu1 %vm490_vm5, %v2481_v60 }
 0x1e5   : > { %2382 = vmatmul.mubr.msk.f32.gmra.mxu1 %vm490_vm5, %v2482_v40 }
 0x235   : > { %v2308_v8 = vpop.f32.mrf.mxu1 }
 0x237   : > { %v1241_v19 = vpop.f32.mrf.mxu1 }
 0x245   : > { %v2311_v10 = vpop.f32.mrf.mxu1 }
 0x247   : > { %v1251_v5 = vpop.f32.mrf.mxu1 }
 0x252   : > { %v2326_v17 = vpop.f32.mrf.mxu0 }
 0x253   : > { %v1376_v45 = vadd.f32 %v2326_v17, %v2308_v8 }
 0x254   : > { %v1370_v22 = vpop.f32.mrf.mxu0 }
 0x255   : > { %v1371_v12 = vadd.f32 %v1370_v22, %v1241_v19 }
 0x256   : > { %v2329_v28 = vpop.f32.mrf.mxu0 }
 0x257   : > { %v1386_v34 = vadd.f32 %v2329_v28, %v2311_v10  ;;  %v2199_v10 = vld [vmem:[%s3535_s11] ss:$0 sm:$0xff] }
 0x258   : > { %v1380_v16 = vpop.f32.mrf.mxu0 }
 0x259   : > { %v1381_v33 = vadd.f32 %v1380_v16, %v1251_v5 }
 0x25a   : > { %v2314_v47 = vpop.f32.mrf.mxu1 }
 0x25c   : > { %v1261_v27 = vpop.f32.mrf.mxu1 }
 0x260   : > { %v2317_v54 = vpop.f32.mrf.mxu1 }
 0x262   : > { %v1271_v42 = vpop.f32.mrf.mxu1 }
 0x264   : > { %v2344_v51 = vpop.f32.mrf.mxu1 }
 0x265   : > { %v1743_v59 = vadd.f32 %v2344_v51, %v1376_v45 }
 0x266   : > { %v1703_v29 = vpop.f32.mrf.mxu1 }
 0x267   : > { %v1758_v44 = vmul.f32 %v2197_v30, %v1743_v59  ;;  %v1742_v0 = vadd.f32 %v1703_v29, %v1371_v12 }
 0x269   : > { %v1757_v37 = vmul.f32 %v2197_v30, %v1742_v0  ;;  %v1773_v50 = vadd.f32 %v2198_v57, %v1758_v44 }
 0x26b   : > { %v1772_v43 = vadd.f32 %v2198_v57, %v1757_v37  ;;  %v1781_v55 = vmax.f32 %v1773_v50, 0.0 }
 0x26d   : > { %v1780_v4 = vmax.f32 %v1772_v43, 0.0 }
 0x26f   : > { %2356 = vmatprep.mubr.msk.f32.mxu0 %vm926_vm1, %v1780_v4 }
 0x270   : > { %2357 = vmatmul.mubr.msk.f32.vlgmr.msra.gmra.mxu0 %vm926_vm1, %v1781_v55 }
 0x272   : > { %v2347_v63 = vpop.f32.mrf.mxu1 }
 0x273   : > { %v1745_v52 = vadd.f32 %v2347_v63, %v1386_v34 }
 0x274   : > { %v1713_v18 = vpop.f32.mrf.mxu1 }
 0x275   : > { %v1760_v32 = vmul.f32 %v2197_v30, %v1745_v52  ;;  %v1744_v25 = vadd.f32 %v1713_v18, %v1381_v33 }
 0x277   : > { %v1759_v39 = vmul.f32 %v2197_v30, %v1744_v25  ;;  %v1775_v38 = vadd.f32 %v2198_v57, %v1760_v32 }
 0x279   : > { %v1774_v6 = vadd.f32 %v2198_v57, %v1759_v39  ;;  %v1783_v56 = vmax.f32 %v1775_v38, 0.0 }
 0x27b   : > { %v1782_v11 = vmax.f32 %v1774_v6, 0.0 }
 0x27d   : > { %v2332_v35 = vpop.f32.mrf.mxu0  ;;  %2359 = vmatprep.mubr.msk.f32.mxu0 %vm926_vm1, %v1782_v11 }
 0x27e   : > { %2360 = vmatmul.mubr.msk.f32.gmra.mxu0 %vm926_vm1, %v1783_v56  ;;  %v1396_v49 = vadd.f32 %v2332_v35, %v2314_v47 }
 0x27f   : > { %v1390_v15 = vpop.f32.mrf.mxu0 }
 0x280   : > { %v1391_v58 = vadd.f32 %v1390_v15, %v1261_v27 }
 0x282   : > { %v2350_v23 = vpop.f32.mrf.mxu1 }
 0x283   : > { %v1747_v1 = vadd.f32 %v2350_v23, %v1396_v49 }
 0x284   : > { %v1723_v46 = vpop.f32.mrf.mxu1 }
 0x285   : > { %v1762_v36 = vmul.f32 %v2197_v30, %v1747_v1  ;;  %v1746_v20 = vadd.f32 %v1723_v46, %v1391_v58 }
 0x287   : > { %v1761_v7 = vmul.f32 %v2197_v30, %v1746_v20  ;;  %v1777_v26 = vadd.f32 %v2198_v57, %v1762_v36 }
 0x289   : > { %v1776_v9 = vadd.f32 %v2198_v57, %v1761_v7  ;;  %v1785_v21 = vmax.f32 %v1777_v26, 0.0 }
 0x28b   : > { %v1784_v31 = vmax.f32 %v1776_v9, 0.0 }
 0x28d   : > { %2362 = vmatprep.mubr.msk.f32.mxu0 %vm926_vm1, %v1784_v31  ;;  %v2335_v62 = vpop.f32.mrf.mxu0 }
 0x28e   : > { %2363 = vmatmul.mubr.msk.f32.gmra.mxu0 %vm926_vm1, %v1785_v21  ;;  %v1406_v2 = vadd.f32 %v2335_v62, %v2317_v54 }
 0x28f   : > { %v1400_v61 = vpop.f32.mrf.mxu0 }
 0x290   : > { %v1401_v24 = vadd.f32 %v1400_v61, %v1271_v42 }
 0x295   : > { %v2353_v53 = vpop.f32.mrf.mxu1 }
 0x296   : > { %v1749_v48 = vadd.f32 %v2353_v53, %v1406_v2 }
 0x297   : > { %v1733_v3 = vpop.f32.mrf.mxu1 }
 0x298   : > { %v1764_v13 = vmul.f32 %v2197_v30, %v1749_v48  ;;  %v1748_v41 = vadd.f32 %v1733_v3, %v1401_v24 }
 0x299   : > { %v2374_v5 = vpop.f32.mrf.mxu1 }
 0x29a   : > { %v1763_v14 = vmul.f32 %v2197_v30, %v1748_v41  ;;  %v1779_v60 = vadd.f32 %v2198_v57, %v1764_v13 }
 0x29b   : > { %v2017_v54 = vpop.f32.mrf.mxu1 }
 0x29c   : > { %v1778_v40 = vadd.f32 %v2198_v57, %v1763_v14  ;;  %v1787_v19 = vmax.f32 %v1779_v60, 0.0 }
 0x29d   : > { %v2377_v51 = vpop.f32.mrf.mxu1 }
 0x29e   : > { %v1786_v8 = vmax.f32 %v1778_v40, 0.0 }
 0x29f   : > { %v2027_v29 = vpop.f32.mrf.mxu1 }
 0x2a0   : > { %2365 = vmatprep.mubr.msk.f32.mxu0 %vm926_vm1, %v1786_v8 }
 0x2a1   : > { %2366 = vmatmul.mubr.msk.f32.gmra.mxu0 %vm926_vm1, %v1787_v19  ;;  %v2380_v37 = vpop.f32.mrf.mxu1 }
 0x2a3   : > { %v2037_v4 = vpop.f32.mrf.mxu1 }
 0x2a5   : > { %v2383_v33 = vpop.f32.mrf.mxu1 }
 0x2a7   : > { %v2047_v39 = vpop.f32.mrf.mxu1 }
 0x330   : > { %v2358_v47 = vpop.f32.mrf.mxu0 }
 0x331   : > { %v1892_v17 = vadd.f32 %v2358_v47, %v2199_v10 }
 0x332   : > { %v1886_v27 = vpop.f32.mrf.mxu0 }
 0x333   : > { %v1887_v22 = vadd.f32 %v2199_v10, %v1886_v27  ;;  %v2057_v42 = vadd.f32 %v2374_v5, %v1892_v17 }
 0x335   : > { %2065 = vst [vmem:[%s3462_s15 + $0x8] sm:$0xff] %v2057_v42  ;;  %v2056_v45 = vadd.f32 %v2017_v54, %v1887_v22 }
 0x337   : > { %2064 = vst [vmem:[%s3462_s15] sm:$0xff] %v2056_v45 }
 0x33e   : > { %v2361_v30 = vpop.f32.mrf.mxu0 }
 0x33f   : > { %v1902_v12 = vadd.f32 %v2361_v30, %v2199_v10 }
 0x340   : > { %v1896_v59 = vpop.f32.mrf.mxu0 }
 0x341   : > { %v1897_v44 = vadd.f32 %v2199_v10, %v1896_v59  ;;  %v2059_v57 = vadd.f32 %v2377_v51, %v1902_v12 }
 0x343   : > { %2067 = vst [vmem:[%s3462_s15 + $0x18] sm:$0xff] %v2059_v57  ;;  %v2058_v0 = vadd.f32 %v2027_v29, %v1897_v44 }
 0x345   : > { %2066 = vst [vmem:[%s3462_s15 + $0x10] sm:$0xff] %v2058_v0 }
 0x34e   : > { %v2364_v50 = vpop.f32.mrf.mxu0 }
 0x34f   : > { %v1912_v43 = vadd.f32 %v2364_v50, %v2199_v10 }
 0x350   : > { %v1906_v28 = vpop.f32.mrf.mxu0 }
 0x351   : > { %v1907_v55 = vadd.f32 %v2199_v10, %v1906_v28  ;;  %v2061_v16 = vadd.f32 %v2380_v37, %v1912_v43 }
 0x353   : > { %2069 = vst [vmem:[%s3462_s15 + $0x28] sm:$0xff] %v2061_v16  ;;  %v2060_v34 = vadd.f32 %v2037_v4, %v1907_v55 }
 0x355   : > { %2068 = vst [vmem:[%s3462_s15 + $0x20] sm:$0xff] %v2060_v34 }
 0x361   : > { %v2367_v63 = vpop.f32.mrf.mxu0 }
 0x362   : > { %v1922_v52 = vadd.f32 %v2367_v63, %v2199_v10 }
 0x363   : > { %v1916_v18 = vpop.f32.mrf.mxu0 }
 0x364   : > { %v2063_v32 = vadd.f32 %v2383_v33, %v1922_v52  ;;  %v1917_v25 = vadd.f32 %v2199_v10, %v1916_v18 }
 0x366   : > { %2071 = vst [vmem:[%s3462_s15 + $0x38] sm:$0xff] %v2063_v32  ;;  %v2062_v38 = vadd.f32 %v2047_v39, %v1917_v25 }
 0x368   : > { %2070 = vst [vmem:[%s3462_s15 + $0x30] sm:$0xff] %v2062_v38 }
 0x369   : > { %2496 = shalt.err (!%p2493_p3)
}
 0x36a   : > { %s2497_s23 = scalar_lea.hbm %s3475_s24, 1024  ;;  %s2501_s30 = scalar_lea.hbm %s3537_s13, 2048 }
 0x36b   : > { %p2498_p4 = scmp.ne.s32.totalorder %s3475_s24, %s2497_s23  ;;  %p2502_p9 = scmp.lt.s32.totalorder %s3475_s24, %s3537_s13 }
 0x36c   : > { %p2503_p10 = scmp.lt.s32.totalorder %s2501_s30, %s2497_s23 }
 0x36d   : > { %p2499_p7 = pnand %p2498_p4, %p2666_p5 }
 0x36e   : > { %p2504_p11 = por %p2503_p10, %p2502_p9 }
 0x36f   : > { %p2500_p8 = pneg %p2499_p7 }
 0x371   : > { %p2505_p12 = pnand %p2504_p11, %p2500_p8 }
 0x373   : > { %2508 = shalt.err (!%p2505_p12)
}
 0x374   : > { %s2557_s22 = smov 128   ;;  %s3558_s4 = smov 8  }
 0x375   : > { %2384 = dma.vmem_to_hbm [thread:$0]  (%p2666_p5), %s3478_s16, 1024, %s3475_s24, %s3483_s29, %s2557_s22, %s2557_s22, %s3558_s4  }
 0x376 PF: > { %p2390_p13 = scmp.ge.s32.totalorder %s2543_s28, 2  ;;  %s2101_s17 = sand.u32 1, %s2531_s25  }
 0x377   : > { %s2102_s0 = scalar_lea.sflag [#allocation3], %s2101_s17 }
 0x378   : > { %p2387_p0 = pnand %p2390_p13, %p2670_p6 }
 0x37a   : > { %p2388_p1 = pneg %p2387_p0 }
 0x37c   : > { %2526 = dma.done.wait (%p2388_p1), %s2102_s0, 1024  }
 0x37d   : > { %2528 = vsyncadd (%p2388_p1), %s2102_s0, 4294966272  ;;  %s3559_s18 = sld [smem:[#allocation5_spill]]  ;;  %p23_p2 = scmp.ge.s32.totalorder %s2653_s14, 4  }
 0x37e   : > { %s3560_s25 = smov %s2535_s26  ;;  %s3561_s26 = smov %s2539_s27 }
 0x37f   : > { %s3563_s28 = smov %s2653_s14  ;;  %25 = sbr.rel (!%p23_p2) target bundleno = 6 (0x6), region = 109 }
 0x383   : > { %s3562_s27 = smov %s3559_s18 }
 0x384   :  { %2107 = vsyncpa [#allocation3], 1 }
 0x385   :  { %2109 = vsyncpa [#allocation3 + $0x1], 1 }

</bundles_post_ra>
